<compile_context>
chip_gen: v7x
topology: tpu7x:2x2x1
jax: 0.10.0
libtpu: 0.0.40
codegen_flags: <defaults>
</compile_context>

<pallas_src>
import functools

import jax
import jax.numpy as jnp
from jax.experimental import pallas as pl
from jax.experimental.pallas import tpu as pltpu


# ---------------------------------------------------------------------------
# Kernel 1: tiled linear   y = x @ W + b    (W pre-transposed to (E_in, E_out))
# ---------------------------------------------------------------------------
def _linear_kernel(x_ref, w_ref, b_ref, o_ref):
    y = jnp.dot(x_ref[...], w_ref[...], preferred_element_type=jnp.float32)
    o_ref[...] = (y + b_ref[...]).astype(o_ref.dtype)


def linear(x2d, w_t, b, *, tile_m=512):
    """x2d: (M, E_in), w_t: (E_in, E_out) pre-transposed, b: (E_out,)."""
    M, E_in = x2d.shape
    E_out = w_t.shape[1]
    tm = M if M <= tile_m else tile_m            # tile_m is a multiple of 8
    grid_m = pl.cdiv(M, tm)

    act_item = jnp.dtype(x2d.dtype).itemsize
    w_bytes = E_in * E_out * jnp.dtype(w_t.dtype).itemsize
    b_bytes = E_out * jnp.dtype(b.dtype).itemsize
    tile_bytes = tm * (E_in + E_out) * act_item
    # Resident weights + double-buffered activation/output tiles + slack.
    vmem_limit = max(32 << 20, 2 * (w_bytes + b_bytes + tile_bytes) + (4 << 20))
    vmem_limit = min(vmem_limit, 100 << 20)

    cost = pl.CostEstimate(
        flops=2 * M * E_in * E_out,
        transcendentals=0,
        bytes_accessed=act_item * (M * E_in + M * E_out) + w_bytes + b_bytes,
    )
    return pl.pallas_call(
        _linear_kernel,
        out_shape=jax.ShapeDtypeStruct((M, E_out), x2d.dtype),
        grid=(grid_m,),
        in_specs=[
            pl.BlockSpec((tm, E_in), lambda i: (i, 0)),      # streamed row tiles
            pl.BlockSpec((E_in, E_out), lambda i: (0, 0)),   # weight resident
            pl.BlockSpec((1, E_out), lambda i: (0, 0)),      # bias resident
        ],
        out_specs=pl.BlockSpec((tm, E_out), lambda i: (i, 0)),
        compiler_params=pltpu.CompilerParams(
            dimension_semantics=("parallel",),
            vmem_limit_bytes=vmem_limit,
        ),
        cost_estimate=cost,
    )(x2d, w_t, b.reshape(1, E_out))


# ---------------------------------------------------------------------------
# Kernel 2: head-batched multi-head attention over a (S, 3, group_width) slab.
# One grid step = (batch element, head group).  Scale is pre-folded into Wq.
# ---------------------------------------------------------------------------
def _attn_kernel(qkv_ref, o_ref, *, heads, head_dim):
    # qkv_ref: (1, S, 3, heads*head_dim)   o_ref: (1, S, heads*head_dim)
    S = qkv_ref.shape[1]
    gw = heads * head_dim

    def head_major(i):
        slab = qkv_ref[0, :, i, :]                       # (S, gw) lane-aligned
        return jnp.transpose(slab.reshape(S, heads, head_dim), (1, 0, 2))

    q = head_major(0)                                    # (h, S, D)
    k = head_major(1)
    v = head_major(2)

    # Head-batched QK^T on the MXU (scale already folded into the Q projection).
    s = jnp.einsum("hqd,hkd->hqk", q, k,
                   preferred_element_type=jnp.float32)   # (h, S, S)
    m = jnp.max(s, axis=-1, keepdims=True)
    p = jnp.exp(s - m)                                   # f32 softmax (v5e-safe)
    l = jnp.sum(p, axis=-1, keepdims=True)               # (h, S, 1)

    o = jnp.einsum("hqk,hkd->hqd", p.astype(v.dtype), v,
                   preferred_element_type=jnp.float32)   # (h, S, D)
    # Deferred normalization: O(S*D) muls, EUP approx reciprocal.
    o = o * pl.reciprocal(l, approx=True)

    # Merge heads back: one lane-dense (S, gw) store (gw is a multiple of 128
    # or the full embed width) == torch transpose(1,2).reshape.
    o_ref[0] = jnp.transpose(o, (1, 0, 2)).reshape(S, gw).astype(o_ref.dtype)


def _heads_per_group(num_heads: int, head_dim: int) -> int:
    """Largest head group whose lane width is a multiple of 128 while still
    leaving >= 2 groups (so v7x's second TensorCore gets work even at B=1);
    falls back to a single full-width group when no aligned split exists."""
    best = num_heads
    for g in range(1, num_heads + 1):
        if num_heads % g:
            continue
        if (g * head_dim) % 128 == 0 and num_heads // g >= 2:
            best = g
    return best


def fused_multihead_attention(qkv, num_heads, head_dim):
    """qkv: (B, S, 3, E) fused projections -> context (B, S, E)."""
    B, S, _, E = qkv.shape
    g = _heads_per_group(num_heads, head_dim)
    num_groups = num_heads // g
    gw = g * head_dim

    itemsize = jnp.dtype(qkv.dtype).itemsize
    in_block = S * 3 * gw * itemsize
    out_block = S * gw * itemsize
    scratch = 3 * g * S * S * 4 + 4 * S * gw * 4         # scores/probs + o/q/k/v f32
    vmem_limit = max(32 << 20, 2 * (in_block + out_block) + scratch + (4 << 20))
    vmem_limit = min(vmem_limit, 100 << 20)

    cost = pl.CostEstimate(
        flops=4 * B * num_heads * S * S * head_dim,
        transcendentals=B * num_heads * S * S,
        bytes_accessed=itemsize * (B * S * 3 * E + B * S * E),
    )
    return pl.pallas_call(
        functools.partial(_attn_kernel, heads=g, head_dim=head_dim),
        out_shape=jax.ShapeDtypeStruct((B, S, E), qkv.dtype),
        grid=(B, num_groups),
        in_specs=[pl.BlockSpec((1, S, 3, gw), lambda b, gi: (b, 0, 0, gi))],
        out_specs=pl.BlockSpec((1, S, gw), lambda b, gi: (b, 0, gi)),
        compiler_params=pltpu.CompilerParams(
            dimension_semantics=("parallel", "parallel"),
            vmem_limit_bytes=vmem_limit,
        ),
        cost_estimate=cost,
    )(qkv)


# ---------------------------------------------------------------------------
# One-time parameter preparation (hoisted out of the per-forward path)
# ---------------------------------------------------------------------------
def prepare_clip_attention_params(params, num_heads, dtype=jnp.float32):
    """Transpose torch-style (out,in) weights once, fuse Q|K|V, fold the
    attention scale into Wq/bq, and cast to the compute dtype."""
    E = params["wq"].shape[0]
    scale = (E // num_heads) ** (-0.5)
    wqkv_t = jnp.concatenate(
        [params["wq"].T * scale, params["wk"].T, params["wv"].T], axis=1)   # (E, 3E)
    bqkv = jnp.concatenate([params["bq"] * scale, params["bk"], params["bv"]])
    return {
        "wqkv_t": wqkv_t.astype(dtype),
        "bqkv": bqkv.astype(dtype),
        "wo_t": params["wo"].T.astype(dtype),
        "bo": params["bo"].astype(dtype),
    }


# ---------------------------------------------------------------------------
# CLIPAttention forward (mask-free path, output_attentions=False)
# ---------------------------------------------------------------------------
def clip_attention_forward(hidden_states, prep, *, num_heads):
    B, S, E = hidden_states.shape
    D = E // num_heads

    x2d = hidden_states.reshape(B * S, E)
    qkv = linear(x2d, prep["wqkv_t"], prep["bqkv"])        # (B*S, 3E), fused GEMM
    qkv = qkv.reshape(B, S, 3, E)                          # free reshape, no copy

    ctx = fused_multihead_attention(qkv, num_heads, D)     # (B, S, E)

    out = linear(ctx.reshape(B * S, E), prep["wo_t"], prep["bo"])
    return out.reshape(B, S, E)


# ---------------------------------------------------------------------------
# Pure-JAX reference for correctness check
# ---------------------------------------------------------------------------
def clip_attention_ref(x, params, num_heads):
    B, S, E = x.shape
    D = E // num_heads
    scale = D ** (-0.5)
    q = x @ params["wq"].T + params["bq"]
    k = x @ params["wk"].T + params["bk"]
    v = x @ params["wv"].T + params["bv"]

    def heads(t):
        return t.reshape(B, S, num_heads, D).transpose(0, 2, 1, 3)

    q, k, v = heads(q), heads(k), heads(v)
    s = jnp.einsum("bhqd,bhkd->bhqk", q, k) * scale
    p = jax.nn.softmax(s, axis=-1)
    o = jnp.einsum("bhqk,bhkd->bhqd", p, v)
    o = o.transpose(0, 2, 1, 3).reshape(B, S, E)
    return o @ params["wo"].T + params["bo"]


if __name__ == "__main__":
    # Downscaled CLIP-vision-like config: embed_dim=256, heads=4 -> head_dim=64
    # (same head_dim as the real model), seq=64, batch=2.
    B, S, E, H = 2, 64, 256, 4

    key = jax.random.PRNGKey(0)
    ks = jax.random.split(key, 9)
    init = lambda k, shape: (0.05 * jax.random.normal(k, shape)).astype(jnp.float32)

    params = {
        "wq": init(ks[0], (E, E)), "bq": init(ks[1], (E,)),
        "wk": init(ks[2], (E, E)), "bk": init(ks[3], (E,)),
        "wv": init(ks[4], (E, E)), "bv": init(ks[5], (E,)),
        "wo": init(ks[6], (E, E)), "bo": init(ks[7], (E,)),
    }
    x = jax.random.normal(ks[8], (B, S, E), dtype=jnp.float32)

    ref = clip_attention_ref(x, params, H)
    fwd = jax.jit(functools.partial(clip_attention_forward, num_heads=H))

    # f32 path.  Tolerance accounts for the EUP approx reciprocal (~1e-3) and
    # MXU default-precision truncation-order differences (scale folded into Wq
    # in the kernel path vs. post-matmul scaling in the reference).
    prep_f32 = prepare_clip_attention_params(params, H, dtype=jnp.float32)
    out_f32 = jax.block_until_ready(fwd(x, prep_f32))
    assert out_f32.shape == (B, S, E)
    assert jnp.allclose(out_f32, ref, atol=1e-2, rtol=1e-2), "f32 mismatch vs reference"

    # bf16 path (recommended on v6e/v7x): bf16 activations + weights, f32 accumulation.
    prep_bf16 = prepare_clip_attention_params(params, H, dtype=jnp.bfloat16)
    out_bf16 = jax.block_until_ready(fwd(x.astype(jnp.bfloat16), prep_bf16))
    assert out_bf16.shape == (B, S, E)
    assert jnp.allclose(out_bf16.astype(jnp.float32), ref, atol=1e-1, rtol=1e-1), \
        "bf16 mismatch vs reference"

    print("KERNEL_OK")
</pallas_src>

<mosaic_0001>
module attributes {stable_mosaic.version = 11 : i64} {
  func.func @_linear_kernel(%arg0: i32, %arg1: memref<128x256xf32, #tpu.memory_space<vmem>>, %arg2: memref<256x768xf32, #tpu.memory_space<vmem>>, %arg3: memref<1x768xf32, #tpu.memory_space<vmem>>, %arg4: memref<128x768xf32, #tpu.memory_space<vmem>>) attributes {dimension_semantics = [#tpu.dimension_semantics<parallel>], iteration_bounds = array<i64: 1>, scalar_prefetch = 0 : i64, scratch_operands = 0 : i64, tpu.core_type = #tpu.core_type<tc>, window_params = [{transform_indices = @transform_0, window_bounds = array<i64: 128, 256>}, {pipeline_mode = #tpu.pipeline_mode<synchronous>, transform_indices = @transform_1, window_bounds = array<i64: 256, 768>}, {pipeline_mode = #tpu.pipeline_mode<synchronous>, transform_indices = @transform_2, window_bounds = array<i64: 1, 768>}, {transform_indices = @transform_3, window_bounds = array<i64: 128, 768>}]} {
    %c0 = arith.constant 0 : index
    %c0_0 = arith.constant 0 : index
    %0 = vector.load %arg1[%c0, %c0_0] : memref<128x256xf32, #tpu.memory_space<vmem>>, vector<128x256xf32>
    %c0_1 = arith.constant 0 : index
    %c0_2 = arith.constant 0 : index
    %1 = vector.load %arg2[%c0_1, %c0_2] : memref<256x768xf32, #tpu.memory_space<vmem>>, vector<256x768xf32>
    %cst = arith.constant dense<0.000000e+00> : vector<128x768xf32>
    %2 = tpu.matmul %0, %1, %cst {dimension_numbers = #tpu.dot_dimension_numbers<[1], [0], [0], [1], [0, 0, 1, 1], [], []>} : vector<128x256xf32>, vector<256x768xf32>, vector<128x768xf32> -> vector<128x768xf32>
    %c0_3 = arith.constant 0 : index
    %c0_4 = arith.constant 0 : index
    %3 = vector.load %arg3[%c0_3, %c0_4] : memref<1x768xf32, #tpu.memory_space<vmem>>, vector<1x768xf32>
    %4 = vector.broadcast %3 : vector<1x768xf32> to vector<128x768xf32>
    %5 = arith.addf %2, %4 : vector<128x768xf32>
    %c0_5 = arith.constant 0 : index
    %c0_6 = arith.constant 0 : index
    %6 = vector.load %arg4[%c0_5, %c0_6] : memref<128x768xf32, #tpu.memory_space<vmem>>, vector<128x768xf32>
    tpu.vector_store %arg4[%c0_5, %c0_6], %5 {strides = array<i32>} : memref<128x768xf32, #tpu.memory_space<vmem>>, vector<128x768xf32>,
    return
  }
  func.func @transform_0(%arg0: i32) -> (i32, i32) {
    %c0_i32 = arith.constant 0 : i32
    %c0_i32_0 = arith.constant 0 : i32
    return %arg0, %c0_i32 : i32, i32
  }
  func.func @transform_1(%arg0: i32) -> (i32, i32) {
    %c0_i32 = arith.constant 0 : i32
    %c0_i32_0 = arith.constant 0 : i32
    %c0_i32_1 = arith.constant 0 : i32
    return %c0_i32, %c0_i32_0 : i32, i32
  }
  func.func @transform_2(%arg0: i32) -> (i32, i32) {
    %c0_i32 = arith.constant 0 : i32
    %c0_i32_0 = arith.constant 0 : i32
    %c0_i32_1 = arith.constant 0 : i32
    return %c0_i32, %c0_i32_0 : i32, i32
  }
  func.func @transform_3(%arg0: i32) -> (i32, i32) {
    %c0_i32 = arith.constant 0 : i32
    %c0_i32_0 = arith.constant 0 : i32
    return %arg0, %c0_i32 : i32, i32
  }
}

module attributes {stable_mosaic.version = 11 : i64} {
  func.func @_attn_kernel(%arg0: i32, %arg1: i32, %arg2: memref<1x64x3x128xf32, #tpu.memory_space<vmem>>, %arg3: memref<1x64x128xf32, #tpu.memory_space<vmem>>) attributes {dimension_semantics = [#tpu.dimension_semantics<parallel>, #tpu.dimension_semantics<parallel>], iteration_bounds = array<i64: 2, 2>, scalar_prefetch = 0 : i64, scratch_operands = 0 : i64, tpu.core_type = #tpu.core_type<tc>, window_params = [{transform_indices = @transform_0, window_bounds = array<i64: 1, 64, 3, 128>}, {transform_indices = @transform_1, window_bounds = array<i64: 1, 64, 128>}]} {
    %c0 = arith.constant 0 : index
    %c0_0 = arith.constant 0 : index
    %c0_1 = arith.constant 0 : index
    %c0_2 = arith.constant 0 : index
    %0 = vector.load %arg2[%c0, %c0_0, %c0_1, %c0_2] : memref<1x64x3x128xf32, #tpu.memory_space<vmem>>, vector<1x64x1x128xf32>
    %1 = vector.shape_cast %0 : vector<1x64x1x128xf32> to vector<64x128xf32>
    %2 = vector.shape_cast %1 : vector<64x128xf32> to vector<64x2x64xf32>
    %3 = tpu.transpose %2, [1, 0, 2] : vector<64x2x64xf32> -> vector<2x64x64xf32>
    %c0_3 = arith.constant 0 : index
    %c0_4 = arith.constant 0 : index
    %c1 = arith.constant 1 : index
    %c0_5 = arith.constant 0 : index
    %4 = vector.load %arg2[%c0_3, %c0_4, %c1, %c0_5] : memref<1x64x3x128xf32, #tpu.memory_space<vmem>>, vector<1x64x1x128xf32>
    %5 = vector.shape_cast %4 : vector<1x64x1x128xf32> to vector<64x128xf32>
    %6 = vector.shape_cast %5 : vector<64x128xf32> to vector<64x2x64xf32>
    %7 = tpu.transpose %6, [1, 0, 2] : vector<64x2x64xf32> -> vector<2x64x64xf32>
    %c0_6 = arith.constant 0 : index
    %c0_7 = arith.constant 0 : index
    %c2 = arith.constant 2 : index
    %c0_8 = arith.constant 0 : index
    %8 = vector.load %arg2[%c0_6, %c0_7, %c2, %c0_8] : memref<1x64x3x128xf32, #tpu.memory_space<vmem>>, vector<1x64x1x128xf32>
    %9 = vector.shape_cast %8 : vector<1x64x1x128xf32> to vector<64x128xf32>
    %10 = vector.shape_cast %9 : vector<64x128xf32> to vector<64x2x64xf32>
    %11 = tpu.transpose %10, [1, 0, 2] : vector<64x2x64xf32> -> vector<2x64x64xf32>
    "tpu.trace_start"() <{level = 10 : i32, message = "hqd,hkd->hqk"}> : () -> ()
    %cst = arith.constant dense<0.000000e+00> : vector<2x64x64xf32>
    %12 = tpu.matmul %3, %7, %cst {dimension_numbers = #tpu.dot_dimension_numbers<[2], [2], [1], [1], [0, 0, 0, 1, 1, 1], [0], [0]>} : vector<2x64x64xf32>, vector<2x64x64xf32>, vector<2x64x64xf32> -> vector<2x64x64xf32>
    "tpu.trace_stop"() : () -> ()
    %cst_9 = arith.constant dense<0xFF800000> : vector<2x64xf32>
    %13 = vector.multi_reduction <maximumf>, %12, %cst_9 [2] : vector<2x64x64xf32> to vector<2x64xf32>
    %14 = vector.shape_cast %13 : vector<2x64xf32> to vector<2x64x1xf32>
    %15 = vector.broadcast %14 : vector<2x64x1xf32> to vector<2x64x64xf32>
    %16 = arith.subf %12, %15 : vector<2x64x64xf32>
    %17 = math.exp %16 : vector<2x64x64xf32>
    %cst_10 = arith.constant dense<0.000000e+00> : vector<2x64xf32>
    %18 = vector.multi_reduction <add>, %17, %cst_10 [2] : vector<2x64x64xf32> to vector<2x64xf32>
    %19 = vector.shape_cast %18 : vector<2x64xf32> to vector<2x64x1xf32>
    "tpu.trace_start"() <{level = 10 : i32, message = "hqk,hkd->hqd"}> : () -> ()
    %cst_11 = arith.constant dense<0.000000e+00> : vector<2x64x64xf32>
    %20 = tpu.matmul %17, %11, %cst_11 {dimension_numbers = #tpu.dot_dimension_numbers<[2], [1], [1], [2], [0, 0, 0, 1, 1, 2], [0], [0]>} : vector<2x64x64xf32>, vector<2x64x64xf32>, vector<2x64x64xf32> -> vector<2x64x64xf32>
    "tpu.trace_stop"() : () -> ()
    %21 = tpu.reciprocal %19 {approx = true} : vector<2x64x1xf32> -> vector<2x64x1xf32>
    %22 = vector.broadcast %21 : vector<2x64x1xf32> to vector<2x64x64xf32>
    %23 = arith.mulf %20, %22 : vector<2x64x64xf32>
    %24 = tpu.transpose %23, [1, 0, 2] : vector<2x64x64xf32> -> vector<64x2x64xf32>
    %25 = vector.shape_cast %24 : vector<64x2x64xf32> to vector<64x128xf32>
    %c0_12 = arith.constant 0 : index
    %c0_13 = arith.constant 0 : index
    %c0_14 = arith.constant 0 : index
    %26 = vector.load %arg3[%c0_12, %c0_13, %c0_14] : memref<1x64x128xf32, #tpu.memory_space<vmem>>, vector<1x64x128xf32>
    %27 = vector.shape_cast %26 : vector<1x64x128xf32> to vector<64x128xf32>
    %28 = vector.shape_cast %25 : vector<64x128xf32> to vector<1x64x128xf32>
    tpu.vector_store %arg3[%c0_12, %c0_13, %c0_14], %28 {strides = array<i32>} : memref<1x64x128xf32, #tpu.memory_space<vmem>>, vector<1x64x128xf32>,
    return
  }
  func.func @transform_0(%arg0: i32, %arg1: i32) -> (i32, i32, i32, i32) {
    %c0_i32 = arith.constant 0 : i32
    %c0_i32_0 = arith.constant 0 : i32
    %c0_i32_1 = arith.constant 0 : i32
    return %arg0, %c0_i32, %c0_i32_0, %arg1 : i32, i32, i32, i32
  }
  func.func @transform_1(%arg0: i32, %arg1: i32) -> (i32, i32, i32) {
    %c0_i32 = arith.constant 0 : i32
    %c0_i32_0 = arith.constant 0 : i32
    return %arg0, %c0_i32, %arg1 : i32, i32, i32
  }
}

module attributes {stable_mosaic.version = 11 : i64} {
  func.func @_linear_kernel(%arg0: i32, %arg1: memref<128x256xf32, #tpu.memory_space<vmem>>, %arg2: memref<256x256xf32, #tpu.memory_space<vmem>>, %arg3: memref<1x256xf32, #tpu.memory_space<vmem>>, %arg4: memref<128x256xf32, #tpu.memory_space<vmem>>) attributes {dimension_semantics = [#tpu.dimension_semantics<parallel>], iteration_bounds = array<i64: 1>, scalar_prefetch = 0 : i64, scratch_operands = 0 : i64, tpu.core_type = #tpu.core_type<tc>, window_params = [{transform_indices = @transform_0, window_bounds = array<i64: 128, 256>}, {pipeline_mode = #tpu.pipeline_mode<synchronous>, transform_indices = @transform_1, window_bounds = array<i64: 256, 256>}, {pipeline_mode = #tpu.pipeline_mode<synchronous>, transform_indices = @transform_2, window_bounds = array<i64: 1, 256>}, {transform_indices = @transform_3, window_bounds = array<i64: 128, 256>}]} {
    %c0 = arith.constant 0 : index
    %c0_0 = arith.constant 0 : index
    %0 = vector.load %arg1[%c0, %c0_0] : memref<128x256xf32, #tpu.memory_space<vmem>>, vector<128x256xf32>
    %c0_1 = arith.constant 0 : index
    %c0_2 = arith.constant 0 : index
    %1 = vector.load %arg2[%c0_1, %c0_2] : memref<256x256xf32, #tpu.memory_space<vmem>>, vector<256x256xf32>
    %cst = arith.constant dense<0.000000e+00> : vector<128x256xf32>
    %2 = tpu.matmul %0, %1, %cst {dimension_numbers = #tpu.dot_dimension_numbers<[1], [0], [0], [1], [0, 0, 1, 1], [], []>} : vector<128x256xf32>, vector<256x256xf32>, vector<128x256xf32> -> vector<128x256xf32>
    %c0_3 = arith.constant 0 : index
    %c0_4 = arith.constant 0 : index
    %3 = vector.load %arg3[%c0_3, %c0_4] : memref<1x256xf32, #tpu.memory_space<vmem>>, vector<1x256xf32>
    %4 = vector.broadcast %3 : vector<1x256xf32> to vector<128x256xf32>
    %5 = arith.addf %2, %4 : vector<128x256xf32>
    %c0_5 = arith.constant 0 : index
    %c0_6 = arith.constant 0 : index
    %6 = vector.load %arg4[%c0_5, %c0_6] : memref<128x256xf32, #tpu.memory_space<vmem>>, vector<128x256xf32>
    tpu.vector_store %arg4[%c0_5, %c0_6], %5 {strides = array<i32>} : memref<128x256xf32, #tpu.memory_space<vmem>>, vector<128x256xf32>,
    return
  }
  func.func @transform_0(%arg0: i32) -> (i32, i32) {
    %c0_i32 = arith.constant 0 : i32
    %c0_i32_0 = arith.constant 0 : i32
    return %arg0, %c0_i32 : i32, i32
  }
  func.func @transform_1(%arg0: i32) -> (i32, i32) {
    %c0_i32 = arith.constant 0 : i32
    %c0_i32_0 = arith.constant 0 : i32
    %c0_i32_1 = arith.constant 0 : i32
    return %c0_i32, %c0_i32_0 : i32, i32
  }
  func.func @transform_2(%arg0: i32) -> (i32, i32) {
    %c0_i32 = arith.constant 0 : i32
    %c0_i32_0 = arith.constant 0 : i32
    %c0_i32_1 = arith.constant 0 : i32
    return %c0_i32, %c0_i32_0 : i32, i32
  }
  func.func @transform_3(%arg0: i32) -> (i32, i32) {
    %c0_i32 = arith.constant 0 : i32
    %c0_i32_0 = arith.constant 0 : i32
    return %arg0, %c0_i32 : i32, i32
  }
}

</mosaic_0001>

<bundles_post_ra>
// kernel: clip_attention_forward.5
= control target key start
LH: loop header
LB: loop body
LE: loop exit
PB: predicated region body
PF: predicated region fallthrough
CT: control target
= control target key end

     0   :  { %s817_s0 = inlined_call_operand.vmem [shape: f32[128,256], index: 0, kind: input, shape index: {}]   ;;  %s818_s1 = inlined_call_operand.vmem [shape: f32[256,256], index: 1, kind: input, shape index: {}]   ;;  %s819_s2 = inlined_call_operand.vmem [shape: f32[1,256], index: 2, kind: input, shape index: {}]   ;;  %s820_s3 = inlined_call_operand.hbm [shape: f32[128,256], index: 3, kind: output, shape index: {}]  }
   0x1   :  { %v48_v0 = vld [vmem:[%s818_s1 + $0x8] sm:$0xff]  ;;  %v50_v1 = vld [vmem:[%s818_s1 + $0x18] sm:$0xff]  ;;  %v47_v2 = vld [vmem:[%s818_s1] sm:$0xff] }
   0x2   :  { %v332_v3 = vpack.c.bf16 %v50_v1, %v48_v0  ;;  %v49_v4 = vld [vmem:[%s818_s1 + $0x10] sm:$0xff]  ;;  %v52_v5 = vld [vmem:[%s818_s1 + $0x28] sm:$0xff]  ;;  %v54_v6 = vld [vmem:[%s818_s1 + $0x38] sm:$0xff] }
   0x3   :  { %v334_v7 = vpack.c.bf16 %v49_v4, %v47_v2  ;;  %v336_v8 = vpack.c.bf16 %v54_v6, %v52_v5  ;;  %v51_v9 = vld [vmem:[%s818_s1 + $0x20] sm:$0xff]  ;;  %v53_v10 = vld [vmem:[%s818_s1 + $0x30] sm:$0xff]  ;;  %v56_v11 = vld [vmem:[%s818_s1 + $0x48] sm:$0xff] }
   0x4   :  { %333 = vmatprep.subr.bf16.mxu0 %v332_v3  ;;  %396 = vmatprep.subr.bf16.mxu1 %v332_v3  ;;  %v58_v12 = vld [vmem:[%s818_s1 + $0x58] sm:$0xff]  ;;  %v338_v13 = vpack.c.bf16 %v53_v10, %v51_v9  ;;  %v55_v15 = vld [vmem:[%s818_s1 + $0x40] sm:$0xff]  ;;  %v57_v16 = vld [vmem:[%s818_s1 + $0x50] sm:$0xff] }
   0x5   :  { %335 = vmatpush1.bf16.msra.mxu0 %v334_v7  ;;  %412 = vmatpush1.bf16.msra.mxu1 %v334_v7  ;;  %v340_v14 = vpack.c.bf16 %v58_v12, %v56_v11  ;;  %v60_v17 = vld [vmem:[%s818_s1 + $0x68] sm:$0xff]  ;;  %v62_v18 = vld [vmem:[%s818_s1 + $0x78] sm:$0xff]  ;;  %v342_v19 = vpack.c.bf16 %v57_v16, %v55_v15  ;;  %v59_v21 = vld [vmem:[%s818_s1 + $0x60] sm:$0xff] }
   0x6   :  { %337 = vmatprep.subr.bf16.mxu0 %v336_v8  ;;  %397 = vmatprep.subr.bf16.mxu1 %v336_v8  ;;  %v344_v20 = vpack.c.bf16 %v62_v18, %v60_v17  ;;  %v61_v22 = vld [vmem:[%s818_s1 + $0x70] sm:$0xff]  ;;  %v64_v23 = vld [vmem:[%s818_s1 + $0x88] sm:$0xff]  ;;  %v66_v24 = vld [vmem:[%s818_s1 + $0x98] sm:$0xff] }
   0x7   :  { %v346_v25 = vpack.c.bf16 %v61_v22, %v59_v21  ;;  %v348_v26 = vpack.c.bf16 %v66_v24, %v64_v23  ;;  %v63_v27 = vld [vmem:[%s818_s1 + $0x80] sm:$0xff]  ;;  %v65_v28 = vld [vmem:[%s818_s1 + $0x90] sm:$0xff]  ;;  %v68_v29 = vld [vmem:[%s818_s1 + $0xa8] sm:$0xff] }
   0x8   :  { %v70_v30 = vld [vmem:[%s818_s1 + $0xb8] sm:$0xff]  ;;  %v350_v31 = vpack.c.bf16 %v65_v28, %v63_v27  ;;  %v67_v33 = vld [vmem:[%s818_s1 + $0xa0] sm:$0xff]  ;;  %v69_v34 = vld [vmem:[%s818_s1 + $0xb0] sm:$0xff] }
   0x9   :  { %339 = vmatpush1.bf16.msra.mxu0 %v338_v13  ;;  %413 = vmatpush1.bf16.msra.mxu1 %v338_v13  ;;  %v352_v32 = vpack.c.bf16 %v70_v30, %v68_v29  ;;  %v72_v35 = vld [vmem:[%s818_s1 + $0xc8] sm:$0xff]  ;;  %v74_v36 = vld [vmem:[%s818_s1 + $0xd8] sm:$0xff]  ;;  %v354_v37 = vpack.c.bf16 %v69_v34, %v67_v33  ;;  %v71_v38 = vld [vmem:[%s818_s1 + $0xc0] sm:$0xff] }
   0xa   :  { %341 = vmatprep.subr.bf16.mxu0 %v340_v14  ;;  %398 = vmatprep.subr.bf16.mxu1 %v340_v14  ;;  %v356_v39 = vpack.c.bf16 %v74_v36, %v72_v35  ;;  %v73_v40 = vld [vmem:[%s818_s1 + $0xd0] sm:$0xff]  ;;  %v16_v41 = vld [vmem:[%s817_s0 + $0x8] sm:$0xff]  ;;  %v78_v44 = vld [vmem:[%s818_s1 + $0xf8] sm:$0xff] }
   0xb   :  { %v32_v42 = vld [vmem:[%s817_s0 + $0x88] sm:$0xff]  ;;  %187 = vmatprep.mubr.f32.mxu0 %v16_v41  ;;  %v358_v45 = vpack.c.bf16 %v73_v40, %v71_v38  ;;  %v75_v47 = vld [vmem:[%s818_s1 + $0xe0] sm:$0xff]  ;;  %v77_v48 = vld [vmem:[%s818_s1 + $0xf0] sm:$0xff] }
   0xc   :  { %v76_v43 = vld [vmem:[%s818_s1 + $0xe8] sm:$0xff]  ;;  %235 = vmatprep.mubr.f32.mxu1 %v32_v42  ;;  %v82_v50 = vld [vmem:[%s818_s1 + $0x118] sm:$0xff]  ;;  %v362_v51 = vpack.c.bf16 %v77_v48, %v75_v47  ;;  %v79_v53 = vld [vmem:[%s818_s1 + $0x100] sm:$0xff] }
   0xd   :  { %343 = vmatpush1.bf16.msra.mxu0 %v342_v19  ;;  %414 = vmatpush1.bf16.msra.mxu1 %v342_v19  ;;  %v360_v46 = vpack.c.bf16 %v78_v44, %v76_v43  ;;  %v80_v49 = vld [vmem:[%s818_s1 + $0x108] sm:$0xff]  ;;  %v81_v54 = vld [vmem:[%s818_s1 + $0x110] sm:$0xff]  ;;  %v86_v56 = vld [vmem:[%s818_s1 + $0x138] sm:$0xff] }
   0xe   :  { %345 = vmatprep.subr.bf16.mxu0 %v344_v20  ;;  %399 = vmatprep.subr.bf16.mxu1 %v344_v20  ;;  %v364_v52 = vpack.c.bf16 %v82_v50, %v80_v49  ;;  %v84_v55 = vld [vmem:[%s818_s1 + $0x128] sm:$0xff]  ;;  %v366_v57 = vpack.c.bf16 %v81_v54, %v79_v53 }
  0x11   :  { %347 = vmatpush1.bf16.msra.mxu0 %v346_v25  ;;  %415 = vmatpush1.bf16.msra.mxu1 %v346_v25 }
  0x12   :  { %349 = vmatprep.subr.bf16.mxu0 %v348_v26  ;;  %400 = vmatprep.subr.bf16.mxu1 %v348_v26 }
  0x15   :  { %351 = vmatpush1.bf16.msra.mxu0 %v350_v31  ;;  %416 = vmatpush1.bf16.msra.mxu1 %v350_v31 }
  0x16   :  { %353 = vmatprep.subr.bf16.mxu0 %v352_v32  ;;  %401 = vmatprep.subr.bf16.mxu1 %v352_v32 }
  0x19   :  { %355 = vmatpush1.bf16.msra.mxu0 %v354_v37  ;;  %417 = vmatpush1.bf16.msra.mxu1 %v354_v37 }
  0x1a   :  { %357 = vmatprep.subr.bf16.mxu0 %v356_v39  ;;  %402 = vmatprep.subr.bf16.mxu1 %v356_v39 }
  0x1d   :  { %359 = vmatpush1.bf16.msra.mxu0 %v358_v45  ;;  %418 = vmatpush1.bf16.msra.mxu1 %v358_v45 }
  0x1e   :  { %361 = vmatprep.subr.bf16.mxu0 %v360_v46  ;;  %403 = vmatprep.subr.bf16.mxu1 %v360_v46 }
  0x21   :  { %363 = vmatpush1.bf16.msra.mxu0 %v362_v51  ;;  %419 = vmatpush1.bf16.msra.mxu1 %v362_v51 }
  0x22   :  { %8 = vsyncpa [#allocation3], 0  ;;  %365 = vmatprep.subr.bf16.mxu0 %v364_v52  ;;  %404 = vmatprep.subr.bf16.mxu1 %v364_v52  ;;  %v368_v58 = vpack.c.bf16 %v86_v56, %v84_v55  ;;  %v83_v59 = vld [vmem:[%s818_s1 + $0x120] sm:$0xff]  ;;  %v85_v60 = vld [vmem:[%s818_s1 + $0x130] sm:$0xff] }
  0x23   :  { %v88_v61 = vld [vmem:[%s818_s1 + $0x148] sm:$0xff]  ;;  %v90_v62 = vld [vmem:[%s818_s1 + $0x158] sm:$0xff]  ;;  %v370_v63 = vpack.c.bf16 %v85_v60, %v83_v59  ;;  %v87_v1 = vld [vmem:[%s818_s1 + $0x140] sm:$0xff] }
  0x24   :  { %v372_v0 = vpack.c.bf16 %v90_v62, %v88_v61  ;;  %v89_v2 = vld [vmem:[%s818_s1 + $0x150] sm:$0xff]  ;;  %v92_v3 = vld [vmem:[%s818_s1 + $0x168] sm:$0xff]  ;;  %v94_v4 = vld [vmem:[%s818_s1 + $0x178] sm:$0xff] }
  0x25   :  { %367 = vmatpush1.bf16.msra.mxu0 %v366_v57  ;;  %420 = vmatpush1.bf16.msra.mxu1 %v366_v57  ;;  %v374_v5 = vpack.c.bf16 %v89_v2, %v87_v1  ;;  %v376_v6 = vpack.c.bf16 %v94_v4, %v92_v3  ;;  %v91_v7 = vld [vmem:[%s818_s1 + $0x160] sm:$0xff]  ;;  %v93_v8 = vld [vmem:[%s818_s1 + $0x170] sm:$0xff]  ;;  %v96_v9 = vld [vmem:[%s818_s1 + $0x188] sm:$0xff] }
  0x26   :  { %369 = vmatprep.subr.bf16.mxu0 %v368_v58  ;;  %405 = vmatprep.subr.bf16.mxu1 %v368_v58  ;;  %v98_v10 = vld [vmem:[%s818_s1 + $0x198] sm:$0xff]  ;;  %v378_v11 = vpack.c.bf16 %v93_v8, %v91_v7  ;;  %v95_v13 = vld [vmem:[%s818_s1 + $0x180] sm:$0xff]  ;;  %v97_v14 = vld [vmem:[%s818_s1 + $0x190] sm:$0xff] }
  0x27   :  { %v380_v12 = vpack.c.bf16 %v98_v10, %v96_v9  ;;  %v100_v15 = vld [vmem:[%s818_s1 + $0x1a8] sm:$0xff]  ;;  %v102_v16 = vld [vmem:[%s818_s1 + $0x1b8] sm:$0xff]  ;;  %v382_v17 = vpack.c.bf16 %v97_v14, %v95_v13  ;;  %v99_v19 = vld [vmem:[%s818_s1 + $0x1a0] sm:$0xff] }
  0x28   :  { %v384_v18 = vpack.c.bf16 %v102_v16, %v100_v15  ;;  %v101_v20 = vld [vmem:[%s818_s1 + $0x1b0] sm:$0xff]  ;;  %v104_v21 = vld [vmem:[%s818_s1 + $0x1c8] sm:$0xff]  ;;  %v106_v22 = vld [vmem:[%s818_s1 + $0x1d8] sm:$0xff] }
  0x29   :  { %371 = vmatpush1.bf16.msra.mxu0 %v370_v63  ;;  %421 = vmatpush1.bf16.msra.mxu1 %v370_v63  ;;  %v386_v23 = vpack.c.bf16 %v101_v20, %v99_v19  ;;  %v388_v24 = vpack.c.bf16 %v106_v22, %v104_v21  ;;  %v103_v25 = vld [vmem:[%s818_s1 + $0x1c0] sm:$0xff]  ;;  %v105_v26 = vld [vmem:[%s818_s1 + $0x1d0] sm:$0xff]  ;;  %v108_v27 = vld [vmem:[%s818_s1 + $0x1e8] sm:$0xff] }
  0x2a   :  { %373 = vmatprep.subr.bf16.mxu0 %v372_v0  ;;  %406 = vmatprep.subr.bf16.mxu1 %v372_v0  ;;  %v110_v28 = vld [vmem:[%s818_s1 + $0x1f8] sm:$0xff]  ;;  %v390_v29 = vpack.c.bf16 %v105_v26, %v103_v25  ;;  %v107_v31 = vld [vmem:[%s818_s1 + $0x1e0] sm:$0xff]  ;;  %v109_v32 = vld [vmem:[%s818_s1 + $0x1f0] sm:$0xff]  ;;  %v113_v0 = vlaneseq }
  0x2b   :  { %v392_v30 = vpack.c.bf16 %v110_v28, %v108_v27  ;;  %v394_v33 = vpack.c.bf16 %v109_v32, %v107_v31  ;;  %v15_v34 = vld [vmem:[%s817_s0] sm:$0xff]  ;;  %v18_v36 = vld [vmem:[%s817_s0 + $0x18] sm:$0xff]  ;;  %v17_v38 = vld [vmem:[%s817_s0 + $0x10] sm:$0xff] }
  0x2c   :  { %v31_v35 = vld [vmem:[%s817_s0 + $0x80] sm:$0xff]  ;;  %v34_v37 = vld [vmem:[%s817_s0 + $0x98] sm:$0xff]  ;;  %v33_v39 = vld [vmem:[%s817_s0 + $0x90] sm:$0xff]  ;;  %v114_v1 = vshrl.u32 %v113_v0, 7 }
  0x2d   :  { %375 = vmatpush1.bf16.msra.mxu0 %v374_v5  ;;  %422 = vmatpush1.bf16.msra.mxu1 %v374_v5  ;;  %v20_v40 = vld [vmem:[%s817_s0 + $0x28] sm:$0xff]  ;;  %v19_v42 = vld [vmem:[%s817_s0 + $0x20] sm:$0xff]  ;;  %v22_v44 = vld [vmem:[%s817_s0 + $0x38] sm:$0xff] }
  0x2e   :  { %377 = vmatprep.subr.bf16.mxu0 %v376_v6  ;;  %407 = vmatprep.subr.bf16.mxu1 %v376_v6  ;;  %v36_v41 = vld [vmem:[%s817_s0 + $0xa8] sm:$0xff]  ;;  %v35_v43 = vld [vmem:[%s817_s0 + $0xa0] sm:$0xff]  ;;  %v38_v45 = vld [vmem:[%s817_s0 + $0xb8] sm:$0xff]  ;;  %v115_v2 = vsub.s32 0, %v114_v1  ;;  %v119_v4 = vsub.s32 1, %v114_v1 }
  0x2f   :  { %v21_v46 = vld [vmem:[%s817_s0 + $0x30] sm:$0xff]  ;;  %v24_v48 = vld [vmem:[%s817_s0 + $0x48] sm:$0xff]  ;;  %v23_v50 = vld [vmem:[%s817_s0 + $0x40] sm:$0xff] }
  0x30   :  { %v37_v47 = vld [vmem:[%s817_s0 + $0xb0] sm:$0xff]  ;;  %v40_v49 = vld [vmem:[%s817_s0 + $0xc8] sm:$0xff]  ;;  %v39_v51 = vld [vmem:[%s817_s0 + $0xc0] sm:$0xff] }
  0x31   :  { %379 = vmatpush1.bf16.msra.mxu0 %v378_v11  ;;  %423 = vmatpush1.bf16.msra.mxu1 %v378_v11  ;;  %v26_v52 = vld [vmem:[%s817_s0 + $0x58] sm:$0xff]  ;;  %v25_v54 = vld [vmem:[%s817_s0 + $0x50] sm:$0xff]  ;;  %v28_v56 = vld [vmem:[%s817_s0 + $0x68] sm:$0xff] }
  0x32   :  { %381 = vmatprep.subr.bf16.mxu0 %v380_v12  ;;  %408 = vmatprep.subr.bf16.mxu1 %v380_v12  ;;  %v42_v53 = vld [vmem:[%s817_s0 + $0xd8] sm:$0xff]  ;;  %v41_v55 = vld [vmem:[%s817_s0 + $0xd0] sm:$0xff]  ;;  %v44_v57 = vld [vmem:[%s817_s0 + $0xe8] sm:$0xff] }
  0x33   :  { %v27_v58 = vld [vmem:[%s817_s0 + $0x60] sm:$0xff]  ;;  %v30_v60 = vld [vmem:[%s817_s0 + $0x78] sm:$0xff]  ;;  %v29_v62 = vld [vmem:[%s817_s0 + $0x70] sm:$0xff] }
  0x34   :  { %v43_v59 = vld [vmem:[%s817_s0 + $0xe0] sm:$0xff]  ;;  %v46_v61 = vld [vmem:[%s817_s0 + $0xf8] sm:$0xff]  ;;  %v45_v63 = vld [vmem:[%s817_s0 + $0xf0] sm:$0xff]  ;;  %s455_s0 = smov [#allocation2]  }
  0x35   :  { %383 = vmatpush1.bf16.msra.mxu0 %v382_v17  ;;  %424 = vmatpush1.bf16.msra.mxu1 %v382_v17  ;;  %v111_v3 = vld [vmem:[%s819_s2] sm:$0x3]  ;;  %s321_s2 = sshll.u32 %s455_s0, 4  ;;  %s322_s2 = int_to_ptr.vmem [resolvable:$true] %s321_s2 }
  0x36   :  { %385 = vmatprep.subr.bf16.mxu0 %v384_v18  ;;  %409 = vmatprep.subr.bf16.mxu1 %v384_v18  ;;  %v769_v5 = vrot.slane %v111_v3, %v115_v2  ;;  %v771_v6 = vrot.slane %v111_v3, %v119_v4  ;;  %s431_s1 = scalar_lea.vmem %s322_s2, 4096  ;;  %p436_p1 = scmp.lt.s32.totalorder %s322_s2, %s322_s2 }
  0x37   :  { %p432_p0 = scmp.ne.s32.totalorder %s322_s2, %s431_s1  ;;  %p437_p2 = scmp.lt.s32.totalorder %s431_s1, %s431_s1 }
  0x39   :  { %387 = vmatpush1.bf16.msra.mxu0 %v386_v23  ;;  %425 = vmatpush1.bf16.msra.mxu1 %v386_v23  ;;  %p438_p3 = por %p437_p2, %p436_p1 }
  0x3a   :  { %389 = vmatprep.subr.bf16.mxu0 %v388_v24  ;;  %410 = vmatprep.subr.bf16.mxu1 %v388_v24 }
  0x3b   :  { %p439_p4 = pnand %p438_p3, %p432_p0 }
  0x3d   :  { %391 = vmatpush1.bf16.msra.mxu0 %v390_v29  ;;  %426 = vmatpush1.bf16.msra.mxu1 %v390_v29 }
  0x3e   :  { %393 = vmatprep.subr.bf16.mxu0 %v392_v30  ;;  %411 = vmatprep.subr.bf16.mxu1 %v392_v30 }
  0x41   :  { %395 = vmatpush1.bf16.msra.mxu0 %v394_v33  ;;  %427 = vmatpush1.bf16.msra.mxu1 %v394_v33 }
  0x44   :  { %188 = vmatmul.mubr.f32.vlgmr.msra.gmra.mrb[0].mxu0 %v15_v34  ;;  %236 = vmatmul.mubr.f32.vlgmr.msra.gmra.mrb[0].mxu1 %v31_v35 }
  0x45   :  { %193 = vmatprep.mubr.f32.mxu0 %v18_v36  ;;  %241 = vmatprep.mubr.f32.mxu1 %v34_v37 }
  0x48   :  { %194 = vmatmul.mubr.f32.gmra.mrb[2].mxu0 %v17_v38  ;;  %242 = vmatmul.mubr.f32.gmra.mrb[2].mxu1 %v33_v39 }
  0x49   :  { %199 = vmatprep.mubr.f32.mxu0 %v20_v40  ;;  %247 = vmatprep.mubr.f32.mxu1 %v36_v41 }
  0x4c   :  { %200 = vmatmul.mubr.f32.gmra.mrb[4].mxu0 %v19_v42  ;;  %248 = vmatmul.mubr.f32.gmra.mrb[4].mxu1 %v35_v43 }
  0x4d   :  { %205 = vmatprep.mubr.f32.mxu0 %v22_v44  ;;  %253 = vmatprep.mubr.f32.mxu1 %v38_v45 }
  0x50   :  { %206 = vmatmul.mubr.f32.gmra.mrb[6].mxu0 %v21_v46  ;;  %254 = vmatmul.mubr.f32.gmra.mrb[6].mxu1 %v37_v47 }
  0x51   :  { %211 = vmatprep.mubr.f32.mxu0 %v24_v48  ;;  %259 = vmatprep.mubr.f32.mxu1 %v40_v49 }
  0x54   :  { %212 = vmatmul.mubr.f32.gmra.mrb[8].mxu0 %v23_v50  ;;  %260 = vmatmul.mubr.f32.gmra.mrb[8].mxu1 %v39_v51 }
  0x55   :  { %217 = vmatprep.mubr.f32.mxu0 %v26_v52  ;;  %265 = vmatprep.mubr.f32.mxu1 %v42_v53 }
  0x58   :  { %218 = vmatmul.mubr.f32.gmra.mrb[10].mxu0 %v25_v54  ;;  %266 = vmatmul.mubr.f32.gmra.mrb[10].mxu1 %v41_v55 }
  0x59   :  { %223 = vmatprep.mubr.f32.mxu0 %v28_v56  ;;  %271 = vmatprep.mubr.f32.mxu1 %v44_v57 }
  0x5c   :  { %224 = vmatmul.mubr.f32.gmra.mrb[12].mxu0 %v27_v58  ;;  %272 = vmatmul.mubr.f32.gmra.mrb[12].mxu1 %v43_v59 }
  0x5d   :  { %229 = vmatprep.mubr.f32.mxu0 %v30_v60  ;;  %277 = vmatprep.mubr.f32.mxu1 %v46_v61 }
  0x60   :  { %230 = vmatmul.mubr.f32.gmra.mrb[14].mxu0 %v29_v62  ;;  %278 = vmatmul.mubr.f32.gmra.mrb[14].mxu1 %v45_v63 }
 0x117   :  { %v189_v7 = vpop.f32.mrb[0].mxu0  ;;  %v237_v8 = vpop.f32.mrb[0].mxu1 }
 0x118   :  { %v190_v9 = vadd.f32 %v189_v7, %v769_v5  ;;  %v238_v10 = vadd.f32 %v237_v8, %v769_v5  ;;  %v191_v11 = vpop.f32.mrb[1].mxu0  ;;  %v239_v12 = vpop.f32.mrb[1].mxu1 }
 0x119   :  { %v192_v13 = vadd.f32 %v191_v11, %v771_v6  ;;  %v240_v14 = vadd.f32 %v239_v12, %v771_v6 }
 0x11a   :  { %284 = vst [vmem:[#allocation2] sm:$0xff] %v190_v9  ;;  %300 = vst [vmem:[#allocation2 + $0x80] sm:$0xff] %v238_v10 }
 0x11b   :  { %285 = vst [vmem:[#allocation2 + $0x8] sm:$0xff] %v192_v13  ;;  %301 = vst [vmem:[#allocation2 + $0x88] sm:$0xff] %v240_v14  ;;  %v195_v15 = vpop.f32.mrb[2].mxu0  ;;  %v243_v16 = vpop.f32.mrb[2].mxu1 }
 0x11c   :  { %v196_v17 = vadd.f32 %v195_v15, %v769_v5  ;;  %v244_v18 = vadd.f32 %v243_v16, %v769_v5  ;;  %v197_v19 = vpop.f32.mrb[3].mxu0  ;;  %v245_v20 = vpop.f32.mrb[3].mxu1 }
 0x11d   :  { %v198_v21 = vadd.f32 %v197_v19, %v771_v6  ;;  %v246_v22 = vadd.f32 %v245_v20, %v771_v6 }
 0x11e   :  { %286 = vst [vmem:[#allocation2 + $0x10] sm:$0xff] %v196_v17  ;;  %302 = vst [vmem:[#allocation2 + $0x90] sm:$0xff] %v244_v18 }
 0x11f   :  { %287 = vst [vmem:[#allocation2 + $0x18] sm:$0xff] %v198_v21  ;;  %303 = vst [vmem:[#allocation2 + $0x98] sm:$0xff] %v246_v22  ;;  %v201_v23 = vpop.f32.mrb[4].mxu0  ;;  %v249_v24 = vpop.f32.mrb[4].mxu1 }
 0x120   :  { %v202_v25 = vadd.f32 %v201_v23, %v769_v5  ;;  %v250_v26 = vadd.f32 %v249_v24, %v769_v5  ;;  %v203_v27 = vpop.f32.mrb[5].mxu0  ;;  %v251_v28 = vpop.f32.mrb[5].mxu1 }
 0x121   :  { %v204_v29 = vadd.f32 %v203_v27, %v771_v6  ;;  %v252_v30 = vadd.f32 %v251_v28, %v771_v6 }
 0x122   :  { %288 = vst [vmem:[#allocation2 + $0x20] sm:$0xff] %v202_v25  ;;  %304 = vst [vmem:[#allocation2 + $0xa0] sm:$0xff] %v250_v26 }
 0x123   :  { %289 = vst [vmem:[#allocation2 + $0x28] sm:$0xff] %v204_v29  ;;  %305 = vst [vmem:[#allocation2 + $0xa8] sm:$0xff] %v252_v30  ;;  %v207_v31 = vpop.f32.mrb[6].mxu0  ;;  %v255_v32 = vpop.f32.mrb[6].mxu1 }
 0x124   :  { %v208_v33 = vadd.f32 %v207_v31, %v769_v5  ;;  %v256_v34 = vadd.f32 %v255_v32, %v769_v5  ;;  %v209_v35 = vpop.f32.mrb[7].mxu0  ;;  %v257_v36 = vpop.f32.mrb[7].mxu1 }
 0x125   :  { %v210_v37 = vadd.f32 %v209_v35, %v771_v6  ;;  %v258_v38 = vadd.f32 %v257_v36, %v771_v6 }
 0x126   :  { %290 = vst [vmem:[#allocation2 + $0x30] sm:$0xff] %v208_v33  ;;  %306 = vst [vmem:[#allocation2 + $0xb0] sm:$0xff] %v256_v34 }
 0x127   :  { %291 = vst [vmem:[#allocation2 + $0x38] sm:$0xff] %v210_v37  ;;  %307 = vst [vmem:[#allocation2 + $0xb8] sm:$0xff] %v258_v38  ;;  %v213_v39 = vpop.f32.mrb[8].mxu0  ;;  %v261_v40 = vpop.f32.mrb[8].mxu1 }
 0x128   :  { %v214_v41 = vadd.f32 %v213_v39, %v769_v5  ;;  %v262_v42 = vadd.f32 %v261_v40, %v769_v5  ;;  %v215_v43 = vpop.f32.mrb[9].mxu0  ;;  %v263_v44 = vpop.f32.mrb[9].mxu1 }
 0x129   :  { %v216_v45 = vadd.f32 %v215_v43, %v771_v6  ;;  %v264_v46 = vadd.f32 %v263_v44, %v771_v6 }
 0x12a   :  { %292 = vst [vmem:[#allocation2 + $0x40] sm:$0xff] %v214_v41  ;;  %308 = vst [vmem:[#allocation2 + $0xc0] sm:$0xff] %v262_v42 }
 0x12b   :  { %293 = vst [vmem:[#allocation2 + $0x48] sm:$0xff] %v216_v45  ;;  %309 = vst [vmem:[#allocation2 + $0xc8] sm:$0xff] %v264_v46  ;;  %v219_v47 = vpop.f32.mrb[10].mxu0  ;;  %v267_v48 = vpop.f32.mrb[10].mxu1 }
 0x12c   :  { %v220_v49 = vadd.f32 %v219_v47, %v769_v5  ;;  %v268_v50 = vadd.f32 %v267_v48, %v769_v5  ;;  %v221_v51 = vpop.f32.mrb[11].mxu0  ;;  %v269_v52 = vpop.f32.mrb[11].mxu1 }
 0x12d   :  { %v222_v53 = vadd.f32 %v221_v51, %v771_v6  ;;  %v270_v54 = vadd.f32 %v269_v52, %v771_v6 }
 0x12e   :  { %294 = vst [vmem:[#allocation2 + $0x50] sm:$0xff] %v220_v49  ;;  %310 = vst [vmem:[#allocation2 + $0xd0] sm:$0xff] %v268_v50 }
 0x12f   :  { %295 = vst [vmem:[#allocation2 + $0x58] sm:$0xff] %v222_v53  ;;  %311 = vst [vmem:[#allocation2 + $0xd8] sm:$0xff] %v270_v54  ;;  %v225_v55 = vpop.f32.mrb[12].mxu0  ;;  %v273_v56 = vpop.f32.mrb[12].mxu1 }
 0x130   :  { %v226_v57 = vadd.f32 %v225_v55, %v769_v5  ;;  %v274_v58 = vadd.f32 %v273_v56, %v769_v5  ;;  %v227_v59 = vpop.f32.mrb[13].mxu0  ;;  %v275_v60 = vpop.f32.mrb[13].mxu1 }
 0x131   :  { %v228_v61 = vadd.f32 %v227_v59, %v771_v6  ;;  %v276_v62 = vadd.f32 %v275_v60, %v771_v6 }
 0x132   :  { %296 = vst [vmem:[#allocation2 + $0x60] sm:$0xff] %v226_v57  ;;  %312 = vst [vmem:[#allocation2 + $0xe0] sm:$0xff] %v274_v58 }
 0x133   :  { %297 = vst [vmem:[#allocation2 + $0x68] sm:$0xff] %v228_v61  ;;  %313 = vst [vmem:[#allocation2 + $0xe8] sm:$0xff] %v276_v62  ;;  %v231_v63 = vpop.f32.mrb[14].mxu0  ;;  %v279_v0 = vpop.f32.mrb[14].mxu1 }
 0x134   :  { %v232_v1 = vadd.f32 %v231_v63, %v769_v5  ;;  %v280_v2 = vadd.f32 %v279_v0, %v769_v5  ;;  %v233_v3 = vpop.f32.mrb[15].mxu0  ;;  %v281_v4 = vpop.f32.mrb[15].mxu1 }
 0x135   :  { %v234_v7 = vadd.f32 %v233_v3, %v771_v6  ;;  %v282_v8 = vadd.f32 %v281_v4, %v771_v6 }
 0x136   :  { %298 = vst [vmem:[#allocation2 + $0x70] sm:$0xff] %v232_v1  ;;  %314 = vst [vmem:[#allocation2 + $0xf0] sm:$0xff] %v280_v2 }
 0x137   :  { %299 = vst [vmem:[#allocation2 + $0x78] sm:$0xff] %v234_v7  ;;  %315 = vst [vmem:[#allocation2 + $0xf8] sm:$0xff] %v282_v8 }
 0x138   :  { %442 = shalt.err (!%p439_p4)
}
 0x139   :  { %s443_s17 = scalar_lea.hbm %s820_s3, 4096 }
 0x13a   :  { %p444_p5 = scmp.ne.s32.totalorder %s820_s3, %s443_s17  ;;  %p447_p6 = scmp.lt.u32.totalorder %s443_s17, %s820_s3 }
 0x13c   :  { %p449_p7 = pnand %p447_p6, %p444_p5 }
 0x13e   :  { %452 = shalt.err (!%p449_p7)
}
 0x13f   :  { %s456_s22 = smov 256   ;;  %s457_s23 = smov 16  }
 0x140   :  { %327 = dma.vmem_to_hbm [thread:$0]  %s322_s2, 4096, %s820_s3, [#allocation3], %s456_s22, %s456_s22, %s457_s23  }
 0x141   :  { %453 = dma.done.wait [#allocation3], 4096  }
 0x142   :  { %454 = vsyncadd [#allocation3], 4294963200 }
 0x143   :  { %331 = vsyncpa [#allocation3], 1 }

// kernel: clip_attention_forward.3
= control target key start
LH: loop header
LB: loop body
LE: loop exit
PB: predicated region body
PF: predicated region fallthrough
CT: control target
= control target key end

     0   :  { %8 = vsyncpa [#allocation3], 0  ;;  %s1766_s0 = inlined_call_operand.hbm [shape: f32[128,256], index: 0, kind: input, shape index: {}]   ;;  %s1767_s1 = inlined_call_operand.hbm [shape: f32[256,768], index: 1, kind: input, shape index: {}]   ;;  %s1768_s2 = inlined_call_operand.vmem [shape: f32[1,768], index: 2, kind: input, shape index: {}]   ;;  %s1769_s3 = inlined_call_operand.vmem [shape: f32[128,768], index: 3, kind: output, shape index: {}]  }
   0x1   :  { %9 = vsyncpa [#allocation5], 0  ;;  %s1161_s12 = smov [#allocation2]   ;;  %s1113_s16 = scalar_lea.hbm %s1766_s0, 4096 }
   0x2   :  { %s15_s13 = sshll.u32 %s1161_s12, 4  ;;  %p1114_p0 = scmp.ne.s32.totalorder %s1766_s0, %s1113_s16  ;;  %s16_s13 = int_to_ptr.vmem [resolvable:$true] %s15_s13 }
   0x3   :  { %p1117_p1 = scmp.lt.u32.totalorder %s1113_s16, %s1766_s0 }
   0x5   :  { %p1119_p2 = pnand %p1117_p1, %p1114_p0 }
   0x7   :  { %1122 = shalt.err (!%p1119_p2)
}
   0x8   :  { %s1123_s21 = scalar_lea.vmem %s16_s13, 4096  ;;  %p1128_p4 = scmp.lt.s32.totalorder %s16_s13, %s16_s13 }
   0x9   :  { %p1124_p3 = scmp.ne.s32.totalorder %s16_s13, %s1123_s21  ;;  %p1129_p5 = scmp.lt.s32.totalorder %s1123_s21, %s1123_s21 }
   0xb   :  { %p1130_p6 = por %p1129_p5, %p1128_p4 }
   0xd   :  { %p1131_p7 = pnand %p1130_p6, %p1124_p3 }
   0xf   :  { %1134 = shalt.err (!%p1131_p7)
}
  0x10   :  { %s1162_s22 = smov 256   ;;  %s1163_s23 = smov 16  }
  0x11   :  { %21 = dma.hbm_to_vmem [thread:$0]  %s1766_s0, 4096, %s16_s13, [#allocation3], %s1162_s22, %s1162_s22, %s1163_s23  }
  0x12   :  { %s1164_s26 = smov [#allocation4]   ;;  %s1135_s30 = scalar_lea.hbm %s1767_s1, 24576 }
  0x13   :  { %s27_s27 = sshll.u32 %s1164_s26, 4  ;;  %p1136_p8 = scmp.ne.s32.totalorder %s1767_s1, %s1135_s30  ;;  %s28_s27 = int_to_ptr.vmem [resolvable:$true] %s27_s27 }
  0x14   :  { %p1139_p9 = scmp.lt.u32.totalorder %s1135_s30, %s1767_s1 }
  0x16   :  { %p1141_p10 = pnand %p1139_p9, %p1136_p8 }
  0x18   :  { %1144 = shalt.err (!%p1141_p10)
}
  0x19   :  { %s1145_s8 = scalar_lea.vmem %s28_s27, 24576  ;;  %p1150_p12 = scmp.lt.s32.totalorder %s28_s27, %s28_s27 }
  0x1a   :  { %p1146_p11 = scmp.ne.s32.totalorder %s28_s27, %s1145_s8  ;;  %p1151_p13 = scmp.lt.s32.totalorder %s1145_s8, %s1145_s8 }
  0x1c   :  { %p1152_p0 = por %p1151_p13, %p1150_p12 }
  0x1e   :  { %p1153_p1 = pnand %p1152_p0, %p1146_p11 }
  0x20   :  { %1156 = shalt.err (!%p1153_p1)
}
  0x21   :  { %s1165_s0 = smov 768   ;;  %s1166_s9 = smov 48  }
  0x22   :  { %33 = dma.hbm_to_vmem [thread:$0]  %s1767_s1, 24576, %s28_s27, [#allocation5], %s1165_s0, %s1165_s0, %s1166_s9  }
  0x23   :  { %1157 = dma.done.wait [#allocation3], 4096  }
  0x24   :  { %1158 = vsyncadd [#allocation3], 4294963200 }
  0x25   :  { %1159 = dma.done.wait [#allocation5], 24576  }
  0x26   :  { %1160 = vsyncadd [#allocation5], 4294942720  ;;  %v75_v0 = vld [vmem:[#allocation4 + $0x8] sm:$0xff]  ;;  %v81_v1 = vld [vmem:[#allocation4 + $0x38] sm:$0xff] }
  0x27   :  { %v77_v2 = vld [vmem:[#allocation4 + $0x18] sm:$0xff]  ;;  %v883_v3 = vpack.c.bf16 %v81_v1, %v75_v0  ;;  %v83_v4 = vld [vmem:[#allocation4 + $0x48] sm:$0xff]  ;;  %v74_v5 = vld [vmem:[#allocation4] sm:$0xff] }
  0x28   :  { %v80_v6 = vld [vmem:[#allocation4 + $0x30] sm:$0xff]  ;;  %v947_v7 = vpack.c.bf16 %v83_v4, %v77_v2  ;;  %v82_v10 = vld [vmem:[#allocation4 + $0x40] sm:$0xff]  ;;  %v87_v11 = vld [vmem:[#allocation4 + $0x68] sm:$0xff] }
  0x29   :  { %v885_v8 = vpack.c.bf16 %v80_v6, %v74_v5  ;;  %v76_v9 = vld [vmem:[#allocation4 + $0x10] sm:$0xff]  ;;  %884 = vmatprep.subr.bf16.mxu0 %v883_v3  ;;  %v93_v13 = vld [vmem:[#allocation4 + $0x98] sm:$0xff]  ;;  %v95_v15 = vld [vmem:[#allocation4 + $0xa8] sm:$0xff] }
  0x2a   :  { %v949_v12 = vpack.c.bf16 %v82_v10, %v76_v9  ;;  %v89_v14 = vld [vmem:[#allocation4 + $0x78] sm:$0xff]  ;;  %948 = vmatprep.subr.bf16.mxu1 %v947_v7  ;;  %v887_v16 = vpack.c.bf16 %v93_v13, %v87_v11  ;;  %v86_v18 = vld [vmem:[#allocation4 + $0x60] sm:$0xff]  ;;  %v92_v19 = vld [vmem:[#allocation4 + $0x90] sm:$0xff] }
  0x2b   :  { %886 = vmatpush1.bf16.msra.mxu0 %v885_v8  ;;  %v951_v17 = vpack.c.bf16 %v95_v15, %v89_v14  ;;  %v88_v20 = vld [vmem:[#allocation4 + $0x70] sm:$0xff]  ;;  %v889_v21 = vpack.c.bf16 %v92_v19, %v86_v18  ;;  %v94_v22 = vld [vmem:[#allocation4 + $0xa0] sm:$0xff]  ;;  %v99_v23 = vld [vmem:[#allocation4 + $0xc8] sm:$0xff] }
  0x2c   :  { %950 = vmatpush1.bf16.msra.mxu1 %v949_v12  ;;  %v105_v24 = vld [vmem:[#allocation4 + $0xf8] sm:$0xff]  ;;  %888 = vmatprep.subr.bf16.mxu0 %v887_v16  ;;  %v953_v25 = vpack.c.bf16 %v94_v22, %v88_v20  ;;  %v107_v28 = vld [vmem:[#allocation4 + $0x108] sm:$0xff]  ;;  %v98_v29 = vld [vmem:[#allocation4 + $0xc0] sm:$0xff] }
  0x2d   :  { %952 = vmatprep.subr.bf16.mxu1 %v951_v17  ;;  %v891_v26 = vpack.c.bf16 %v105_v24, %v99_v23  ;;  %v101_v27 = vld [vmem:[#allocation4 + $0xd8] sm:$0xff]  ;;  %v104_v31 = vld [vmem:[#allocation4 + $0xf0] sm:$0xff]  ;;  %v106_v33 = vld [vmem:[#allocation4 + $0x100] sm:$0xff] }
  0x2e   :  { %v955_v30 = vpack.c.bf16 %v107_v28, %v101_v27  ;;  %v100_v32 = vld [vmem:[#allocation4 + $0xd0] sm:$0xff]  ;;  %v893_v34 = vpack.c.bf16 %v104_v31, %v98_v29  ;;  %v111_v35 = vld [vmem:[#allocation4 + $0x128] sm:$0xff]  ;;  %v117_v36 = vld [vmem:[#allocation4 + $0x158] sm:$0xff] }
  0x2f   :  { %890 = vmatpush1.bf16.msra.mxu0 %v889_v21  ;;  %v113_v37 = vld [vmem:[#allocation4 + $0x138] sm:$0xff]  ;;  %v957_v38 = vpack.c.bf16 %v106_v33, %v100_v32  ;;  %v895_v39 = vpack.c.bf16 %v117_v36, %v111_v35  ;;  %v119_v40 = vld [vmem:[#allocation4 + $0x168] sm:$0xff]  ;;  %v110_v41 = vld [vmem:[#allocation4 + $0x120] sm:$0xff] }
  0x30   :  { %954 = vmatpush1.bf16.msra.mxu1 %v953_v25  ;;  %892 = vmatprep.subr.bf16.mxu0 %v891_v26  ;;  %v116_v42 = vld [vmem:[#allocation4 + $0x150] sm:$0xff]  ;;  %v959_v43 = vpack.c.bf16 %v119_v40, %v113_v37  ;;  %v118_v45 = vld [vmem:[#allocation4 + $0x160] sm:$0xff]  ;;  %v123_v46 = vld [vmem:[#allocation4 + $0x188] sm:$0xff] }
  0x31   :  { %956 = vmatprep.subr.bf16.mxu1 %v955_v30  ;;  %v112_v44 = vld [vmem:[#allocation4 + $0x130] sm:$0xff]  ;;  %v129_v47 = vld [vmem:[#allocation4 + $0x1b8] sm:$0xff]  ;;  %v131_v49 = vld [vmem:[#allocation4 + $0x1c8] sm:$0xff]  ;;  %v897_v50 = vpack.c.bf16 %v116_v42, %v110_v41 }
  0x32   :  { %v125_v48 = vld [vmem:[#allocation4 + $0x198] sm:$0xff]  ;;  %v961_v51 = vpack.c.bf16 %v118_v45, %v112_v44  ;;  %v899_v52 = vpack.c.bf16 %v129_v47, %v123_v46  ;;  %v122_v53 = vld [vmem:[#allocation4 + $0x180] sm:$0xff]  ;;  %v128_v54 = vld [vmem:[#allocation4 + $0x1b0] sm:$0xff] }
  0x33   :  { %894 = vmatpush1.bf16.msra.mxu0 %v893_v34  ;;  %v124_v55 = vld [vmem:[#allocation4 + $0x190] sm:$0xff]  ;;  %v963_v56 = vpack.c.bf16 %v131_v49, %v125_v48  ;;  %v130_v57 = vld [vmem:[#allocation4 + $0x1c0] sm:$0xff]  ;;  %v135_v58 = vld [vmem:[#allocation4 + $0x1e8] sm:$0xff]  ;;  %v901_v62 = vpack.c.bf16 %v128_v54, %v122_v53 }
  0x34   :  { %958 = vmatpush1.bf16.msra.mxu1 %v957_v38  ;;  %896 = vmatprep.subr.bf16.mxu0 %v895_v39  ;;  %v141_v59 = vld [vmem:[#allocation4 + $0x218] sm:$0xff]  ;;  %v143_v61 = vld [vmem:[#allocation4 + $0x228] sm:$0xff]  ;;  %v965_v63 = vpack.c.bf16 %v130_v57, %v124_v55  ;;  %v134_v1 = vld [vmem:[#allocation4 + $0x1e0] sm:$0xff] }
  0x35   :  { %960 = vmatprep.subr.bf16.mxu1 %v959_v43  ;;  %v137_v60 = vld [vmem:[#allocation4 + $0x1f8] sm:$0xff]  ;;  %v903_v0 = vpack.c.bf16 %v141_v59, %v135_v58  ;;  %v140_v2 = vld [vmem:[#allocation4 + $0x210] sm:$0xff]  ;;  %v142_v5 = vld [vmem:[#allocation4 + $0x220] sm:$0xff] }
  0x36   :  { %v136_v3 = vld [vmem:[#allocation4 + $0x1f0] sm:$0xff]  ;;  %v967_v4 = vpack.c.bf16 %v143_v61, %v137_v60  ;;  %v147_v6 = vld [vmem:[#allocation4 + $0x248] sm:$0xff]  ;;  %v153_v7 = vld [vmem:[#allocation4 + $0x278] sm:$0xff]  ;;  %v905_v10 = vpack.c.bf16 %v140_v2, %v134_v1 }
  0x37   :  { %898 = vmatpush1.bf16.msra.mxu0 %v897_v50  ;;  %v149_v8 = vld [vmem:[#allocation4 + $0x258] sm:$0xff]  ;;  %v155_v9 = vld [vmem:[#allocation4 + $0x288] sm:$0xff]  ;;  %v969_v11 = vpack.c.bf16 %v142_v5, %v136_v3  ;;  %v907_v12 = vpack.c.bf16 %v153_v7, %v147_v6  ;;  %v146_v13 = vld [vmem:[#allocation4 + $0x240] sm:$0xff] }
  0x38   :  { %962 = vmatpush1.bf16.msra.mxu1 %v961_v51  ;;  %900 = vmatprep.subr.bf16.mxu0 %v899_v52  ;;  %v152_v14 = vld [vmem:[#allocation4 + $0x270] sm:$0xff]  ;;  %v971_v16 = vpack.c.bf16 %v155_v9, %v149_v8  ;;  %v154_v17 = vld [vmem:[#allocation4 + $0x280] sm:$0xff]  ;;  %v159_v18 = vld [vmem:[#allocation4 + $0x2a8] sm:$0xff] }
  0x39   :  { %964 = vmatprep.subr.bf16.mxu1 %v963_v56  ;;  %v148_v15 = vld [vmem:[#allocation4 + $0x250] sm:$0xff]  ;;  %v165_v19 = vld [vmem:[#allocation4 + $0x2d8] sm:$0xff]  ;;  %v167_v21 = vld [vmem:[#allocation4 + $0x2e8] sm:$0xff]  ;;  %v909_v22 = vpack.c.bf16 %v152_v14, %v146_v13 }
  0x3a   :  { %v161_v20 = vld [vmem:[#allocation4 + $0x2b8] sm:$0xff]  ;;  %v973_v23 = vpack.c.bf16 %v154_v17, %v148_v15  ;;  %v911_v24 = vpack.c.bf16 %v165_v19, %v159_v18  ;;  %v158_v25 = vld [vmem:[#allocation4 + $0x2a0] sm:$0xff]  ;;  %v164_v26 = vld [vmem:[#allocation4 + $0x2d0] sm:$0xff] }
  0x3b   :  { %902 = vmatpush1.bf16.msra.mxu0 %v901_v62  ;;  %v160_v27 = vld [vmem:[#allocation4 + $0x2b0] sm:$0xff]  ;;  %v975_v28 = vpack.c.bf16 %v167_v21, %v161_v20  ;;  %v166_v29 = vld [vmem:[#allocation4 + $0x2e0] sm:$0xff]  ;;  %v171_v30 = vld [vmem:[#allocation4 + $0x308] sm:$0xff]  ;;  %v913_v34 = vpack.c.bf16 %v164_v26, %v158_v25 }
  0x3c   :  { %966 = vmatpush1.bf16.msra.mxu1 %v965_v63  ;;  %904 = vmatprep.subr.bf16.mxu0 %v903_v0  ;;  %v177_v31 = vld [vmem:[#allocation4 + $0x338] sm:$0xff]  ;;  %v179_v33 = vld [vmem:[#allocation4 + $0x348] sm:$0xff]  ;;  %v977_v35 = vpack.c.bf16 %v166_v29, %v160_v27  ;;  %v170_v37 = vld [vmem:[#allocation4 + $0x300] sm:$0xff] }
  0x3d   :  { %968 = vmatprep.subr.bf16.mxu1 %v967_v4  ;;  %v173_v32 = vld [vmem:[#allocation4 + $0x318] sm:$0xff]  ;;  %v915_v36 = vpack.c.bf16 %v177_v31, %v171_v30  ;;  %v176_v38 = vld [vmem:[#allocation4 + $0x330] sm:$0xff]  ;;  %v178_v41 = vld [vmem:[#allocation4 + $0x340] sm:$0xff] }
  0x3e   :  { %v172_v39 = vld [vmem:[#allocation4 + $0x310] sm:$0xff]  ;;  %v979_v40 = vpack.c.bf16 %v179_v33, %v173_v32  ;;  %v183_v42 = vld [vmem:[#allocation4 + $0x368] sm:$0xff]  ;;  %v189_v43 = vld [vmem:[#allocation4 + $0x398] sm:$0xff]  ;;  %v917_v46 = vpack.c.bf16 %v176_v38, %v170_v37 }
  0x3f   :  { %906 = vmatpush1.bf16.msra.mxu0 %v905_v10  ;;  %v185_v44 = vld [vmem:[#allocation4 + $0x378] sm:$0xff]  ;;  %v191_v45 = vld [vmem:[#allocation4 + $0x3a8] sm:$0xff]  ;;  %v981_v47 = vpack.c.bf16 %v178_v41, %v172_v39  ;;  %v919_v48 = vpack.c.bf16 %v189_v43, %v183_v42  ;;  %v182_v49 = vld [vmem:[#allocation4 + $0x360] sm:$0xff] }
  0x40   :  { %970 = vmatpush1.bf16.msra.mxu1 %v969_v11  ;;  %908 = vmatprep.subr.bf16.mxu0 %v907_v12  ;;  %v188_v50 = vld [vmem:[#allocation4 + $0x390] sm:$0xff]  ;;  %v983_v52 = vpack.c.bf16 %v191_v45, %v185_v44  ;;  %v190_v53 = vld [vmem:[#allocation4 + $0x3a0] sm:$0xff]  ;;  %v195_v54 = vld [vmem:[#allocation4 + $0x3c8] sm:$0xff] }
  0x41   :  { %972 = vmatprep.subr.bf16.mxu1 %v971_v16  ;;  %v184_v51 = vld [vmem:[#allocation4 + $0x370] sm:$0xff]  ;;  %v201_v55 = vld [vmem:[#allocation4 + $0x3f8] sm:$0xff]  ;;  %v203_v57 = vld [vmem:[#allocation4 + $0x408] sm:$0xff]  ;;  %v921_v58 = vpack.c.bf16 %v188_v50, %v182_v49 }
  0x42   :  { %v197_v56 = vld [vmem:[#allocation4 + $0x3d8] sm:$0xff]  ;;  %v985_v59 = vpack.c.bf16 %v190_v53, %v184_v51  ;;  %v923_v60 = vpack.c.bf16 %v201_v55, %v195_v54  ;;  %v194_v61 = vld [vmem:[#allocation4 + $0x3c0] sm:$0xff]  ;;  %v200_v62 = vld [vmem:[#allocation4 + $0x3f0] sm:$0xff] }
  0x43   :  { %910 = vmatpush1.bf16.msra.mxu0 %v909_v22  ;;  %v196_v63 = vld [vmem:[#allocation4 + $0x3d0] sm:$0xff]  ;;  %v987_v0 = vpack.c.bf16 %v203_v57, %v197_v56  ;;  %v202_v1 = vld [vmem:[#allocation4 + $0x400] sm:$0xff]  ;;  %v207_v2 = vld [vmem:[#allocation4 + $0x428] sm:$0xff]  ;;  %v925_v6 = vpack.c.bf16 %v200_v62, %v194_v61 }
  0x44   :  { %974 = vmatpush1.bf16.msra.mxu1 %v973_v23  ;;  %912 = vmatprep.subr.bf16.mxu0 %v911_v24  ;;  %v213_v3 = vld [vmem:[#allocation4 + $0x458] sm:$0xff]  ;;  %v215_v5 = vld [vmem:[#allocation4 + $0x468] sm:$0xff]  ;;  %v206_v7 = vld [vmem:[#allocation4 + $0x420] sm:$0xff]  ;;  %v989_v8 = vpack.c.bf16 %v202_v1, %v196_v63 }
  0x45   :  { %976 = vmatprep.subr.bf16.mxu1 %v975_v28  ;;  %v209_v4 = vld [vmem:[#allocation4 + $0x438] sm:$0xff]  ;;  %v927_v9 = vpack.c.bf16 %v213_v3, %v207_v2  ;;  %v212_v10 = vld [vmem:[#allocation4 + $0x450] sm:$0xff]  ;;  %v214_v12 = vld [vmem:[#allocation4 + $0x460] sm:$0xff] }
  0x46   :  { %v208_v11 = vld [vmem:[#allocation4 + $0x430] sm:$0xff]  ;;  %v991_v13 = vpack.c.bf16 %v215_v5, %v209_v4  ;;  %v219_v14 = vld [vmem:[#allocation4 + $0x488] sm:$0xff]  ;;  %v225_v15 = vld [vmem:[#allocation4 + $0x4b8] sm:$0xff]  ;;  %v929_v19 = vpack.c.bf16 %v212_v10, %v206_v7 }
  0x47   :  { %914 = vmatpush1.bf16.msra.mxu0 %v913_v34  ;;  %v1211_v16 = vld [vmem:[#allocation2 + $0x8] sm:$0xff]  ;;  %v221_v17 = vld [vmem:[#allocation4 + $0x498] sm:$0xff]  ;;  %v993_v20 = vpack.c.bf16 %v214_v12, %v208_v11  ;;  %v931_v21 = vpack.c.bf16 %v225_v15, %v219_v14  ;;  %v218_v22 = vld [vmem:[#allocation4 + $0x480] sm:$0xff] }
  0x48   :  { %978 = vmatpush1.bf16.msra.mxu1 %v977_v35  ;;  %916 = vmatprep.subr.bf16.mxu0 %v915_v36  ;;  %v227_v18 = vld [vmem:[#allocation4 + $0x4c8] sm:$0xff]  ;;  %v224_v23 = vld [vmem:[#allocation4 + $0x4b0] sm:$0xff]  ;;  %v226_v26 = vld [vmem:[#allocation4 + $0x4c0] sm:$0xff] }
  0x49   :  { %980 = vmatprep.subr.bf16.mxu1 %v979_v40  ;;  %362 = vmatprep.mubr.f32.mxu0 %v1211_v16  ;;  %v220_v24 = vld [vmem:[#allocation4 + $0x490] sm:$0xff]  ;;  %v995_v25 = vpack.c.bf16 %v227_v18, %v221_v17  ;;  %v231_v27 = vld [vmem:[#allocation4 + $0x4e8] sm:$0xff]  ;;  %v237_v28 = vld [vmem:[#allocation4 + $0x518] sm:$0xff]  ;;  %v933_v31 = vpack.c.bf16 %v224_v23, %v218_v22 }
  0x4a   :  { %523 = vmatprep.mubr.f32.mxu1 %v1211_v16  ;;  %v233_v29 = vld [vmem:[#allocation4 + $0x4f8] sm:$0xff]  ;;  %v239_v30 = vld [vmem:[#allocation4 + $0x528] sm:$0xff]  ;;  %v997_v32 = vpack.c.bf16 %v226_v26, %v220_v24  ;;  %v935_v33 = vpack.c.bf16 %v237_v28, %v231_v27  ;;  %v230_v34 = vld [vmem:[#allocation4 + $0x4e0] sm:$0xff] }
  0x4b   :  { %918 = vmatpush1.bf16.msra.mxu0 %v917_v46  ;;  %v236_v35 = vld [vmem:[#allocation4 + $0x510] sm:$0xff]  ;;  %v999_v37 = vpack.c.bf16 %v239_v30, %v233_v29  ;;  %v238_v38 = vld [vmem:[#allocation4 + $0x520] sm:$0xff]  ;;  %v243_v39 = vld [vmem:[#allocation4 + $0x548] sm:$0xff] }
  0x4c   :  { %982 = vmatpush1.bf16.msra.mxu1 %v981_v47  ;;  %920 = vmatprep.subr.bf16.mxu0 %v919_v48  ;;  %v232_v36 = vld [vmem:[#allocation4 + $0x4f0] sm:$0xff]  ;;  %v249_v40 = vld [vmem:[#allocation4 + $0x578] sm:$0xff]  ;;  %v251_v42 = vld [vmem:[#allocation4 + $0x588] sm:$0xff]  ;;  %v937_v43 = vpack.c.bf16 %v236_v35, %v230_v34 }
  0x4d   :  { %984 = vmatprep.subr.bf16.mxu1 %v983_v52  ;;  %v245_v41 = vld [vmem:[#allocation4 + $0x558] sm:$0xff]  ;;  %v1001_v44 = vpack.c.bf16 %v238_v38, %v232_v36  ;;  %v939_v45 = vpack.c.bf16 %v249_v40, %v243_v39  ;;  %v242_v46 = vld [vmem:[#allocation4 + $0x540] sm:$0xff]  ;;  %v248_v47 = vld [vmem:[#allocation4 + $0x570] sm:$0xff] }
  0x4e   :  { %v244_v48 = vld [vmem:[#allocation4 + $0x550] sm:$0xff]  ;;  %v1003_v49 = vpack.c.bf16 %v251_v42, %v245_v41  ;;  %v250_v50 = vld [vmem:[#allocation4 + $0x580] sm:$0xff]  ;;  %v255_v51 = vld [vmem:[#allocation4 + $0x5a8] sm:$0xff]  ;;  %v941_v55 = vpack.c.bf16 %v248_v47, %v242_v46 }
  0x4f   :  { %922 = vmatpush1.bf16.msra.mxu0 %v921_v58  ;;  %v261_v52 = vld [vmem:[#allocation4 + $0x5d8] sm:$0xff]  ;;  %v263_v54 = vld [vmem:[#allocation4 + $0x5e8] sm:$0xff]  ;;  %v1005_v56 = vpack.c.bf16 %v250_v50, %v244_v48  ;;  %v254_v58 = vld [vmem:[#allocation4 + $0x5a0] sm:$0xff] }
  0x50   :  { %986 = vmatpush1.bf16.msra.mxu1 %v985_v59  ;;  %924 = vmatprep.subr.bf16.mxu0 %v923_v60  ;;  %v257_v53 = vld [vmem:[#allocation4 + $0x5b8] sm:$0xff]  ;;  %v943_v57 = vpack.c.bf16 %v261_v52, %v255_v51  ;;  %v260_v59 = vld [vmem:[#allocation4 + $0x5d0] sm:$0xff]  ;;  %v262_v62 = vld [vmem:[#allocation4 + $0x5e0] sm:$0xff] }
  0x51   :  { %988 = vmatprep.subr.bf16.mxu1 %v987_v0  ;;  %v256_v60 = vld [vmem:[#allocation4 + $0x5b0] sm:$0xff]  ;;  %v1007_v61 = vpack.c.bf16 %v263_v54, %v257_v53  ;;  %v79_v63 = vld [vmem:[#allocation4 + $0x28] sm:$0xff]  ;;  %v85_v0 = vld [vmem:[#allocation4 + $0x58] sm:$0xff]  ;;  %v945_v1 = vpack.c.bf16 %v260_v59, %v254_v58 }
  0x52   :  { %v1009_v2 = vpack.c.bf16 %v262_v62, %v256_v60  ;;  %v1011_v3 = vpack.c.bf16 %v85_v0, %v79_v63  ;;  %v78_v4 = vld [vmem:[#allocation4 + $0x20] sm:$0xff]  ;;  %v84_v5 = vld [vmem:[#allocation4 + $0x50] sm:$0xff]  ;;  %v97_v7 = vld [vmem:[#allocation4 + $0xb8] sm:$0xff] }
  0x53   :  { %926 = vmatpush1.bf16.msra.mxu0 %v925_v6  ;;  %v91_v6 = vld [vmem:[#allocation4 + $0x88] sm:$0xff]  ;;  %v90_v10 = vld [vmem:[#allocation4 + $0x80] sm:$0xff]  ;;  %v96_v11 = vld [vmem:[#allocation4 + $0xb0] sm:$0xff] }
  0x54   :  { %990 = vmatpush1.bf16.msra.mxu1 %v989_v8  ;;  %928 = vmatprep.subr.bf16.mxu0 %v927_v9  ;;  %v1215_v8 = vld [vmem:[#allocation2] sm:$0xff]  ;;  %v1013_v9 = vpack.c.bf16 %v84_v5, %v78_v4  ;;  %v1217_v12 = vld [vmem:[#allocation2 + $0x18] sm:$0xff]  ;;  %v103_v14 = vld [vmem:[#allocation4 + $0xe8] sm:$0xff]  ;;  %v1017_v18 = vpack.c.bf16 %v96_v11, %v90_v10 }
  0x55   :  { %992 = vmatprep.subr.bf16.mxu1 %v991_v13  ;;  %v1015_v13 = vpack.c.bf16 %v97_v7, %v91_v6  ;;  %v109_v15 = vld [vmem:[#allocation4 + $0x118] sm:$0xff]  ;;  %v1221_v17 = vld [vmem:[#allocation2 + $0x10] sm:$0xff]  ;;  %v115_v23 = vld [vmem:[#allocation4 + $0x148] sm:$0xff] }
  0x56   :  { %v1019_v22 = vpack.c.bf16 %v109_v15, %v103_v14  ;;  %v121_v24 = vld [vmem:[#allocation4 + $0x178] sm:$0xff]  ;;  %v114_v27 = vld [vmem:[#allocation4 + $0x140] sm:$0xff]  ;;  %v120_v28 = vld [vmem:[#allocation4 + $0x170] sm:$0xff] }
  0x57   :  { %930 = vmatpush1.bf16.msra.mxu0 %v929_v19  ;;  %v102_v19 = vld [vmem:[#allocation4 + $0xe0] sm:$0xff]  ;;  %v1233_v29 = vld [vmem:[#allocation2 + $0x38] sm:$0xff]  ;;  %v1023_v30 = vpack.c.bf16 %v121_v24, %v115_v23  ;;  %v1025_v34 = vpack.c.bf16 %v120_v28, %v114_v27  ;;  %v132_v36 = vld [vmem:[#allocation4 + $0x1d0] sm:$0xff] }
  0x58   :  { %994 = vmatpush1.bf16.msra.mxu1 %v993_v20  ;;  %932 = vmatprep.subr.bf16.mxu0 %v931_v21  ;;  %v108_v20 = vld [vmem:[#allocation4 + $0x110] sm:$0xff]  ;;  %v1225_v21 = vld [vmem:[#allocation2 + $0x28] sm:$0xff]  ;;  %v126_v35 = vld [vmem:[#allocation4 + $0x1a0] sm:$0xff] }
  0x59   :  { %996 = vmatprep.subr.bf16.mxu1 %v995_v25  ;;  %v1229_v25 = vld [vmem:[#allocation2 + $0x20] sm:$0xff]  ;;  %v1021_v26 = vpack.c.bf16 %v108_v20, %v102_v19  ;;  %v139_v39 = vld [vmem:[#allocation4 + $0x208] sm:$0xff]  ;;  %v145_v40 = vld [vmem:[#allocation4 + $0x238] sm:$0xff]  ;;  %v1029_v42 = vpack.c.bf16 %v132_v36, %v126_v35 }
  0x5a   :  { %v1245_v41 = vld [vmem:[#allocation2 + $0x40] sm:$0xff]  ;;  %v1031_v46 = vpack.c.bf16 %v145_v40, %v139_v39  ;;  %v151_v47 = vld [vmem:[#allocation4 + $0x268] sm:$0xff]  ;;  %v157_v48 = vld [vmem:[#allocation4 + $0x298] sm:$0xff] }
  0x5b   :  { %934 = vmatpush1.bf16.msra.mxu0 %v933_v31  ;;  %v127_v31 = vld [vmem:[#allocation4 + $0x1a8] sm:$0xff]  ;;  %v150_v51 = vld [vmem:[#allocation4 + $0x260] sm:$0xff]  ;;  %v156_v52 = vld [vmem:[#allocation4 + $0x290] sm:$0xff]  ;;  %v1035_v54 = vpack.c.bf16 %v157_v48, %v151_v47 }
  0x5c   :  { %998 = vmatpush1.bf16.msra.mxu1 %v997_v32  ;;  %936 = vmatprep.subr.bf16.mxu0 %v935_v33  ;;  %v133_v32 = vld [vmem:[#allocation4 + $0x1d8] sm:$0xff]  ;;  %v1237_v33 = vld [vmem:[#allocation2 + $0x30] sm:$0xff]  ;;  %v1257_v53 = vld [vmem:[#allocation2 + $0x68] sm:$0xff]  ;;  %v1037_v58 = vpack.c.bf16 %v156_v52, %v150_v51 }
  0x5d   :  { %1000 = vmatprep.subr.bf16.mxu1 %v999_v37  ;;  %v1241_v37 = vld [vmem:[#allocation2 + $0x48] sm:$0xff]  ;;  %v1027_v38 = vpack.c.bf16 %v133_v32, %v127_v31  ;;  %v162_v59 = vld [vmem:[#allocation4 + $0x2c0] sm:$0xff]  ;;  %v168_v60 = vld [vmem:[#allocation4 + $0x2f0] sm:$0xff] }
  0x5e   :  { %v175_v63 = vld [vmem:[#allocation4 + $0x328] sm:$0xff]  ;;  %v181_v0 = vld [vmem:[#allocation4 + $0x358] sm:$0xff]  ;;  %v180_v4 = vld [vmem:[#allocation4 + $0x350] sm:$0xff] }
  0x5f   :  { %938 = vmatpush1.bf16.msra.mxu0 %v937_v43  ;;  %v138_v43 = vld [vmem:[#allocation4 + $0x200] sm:$0xff]  ;;  %v1273_v5 = vld [vmem:[#allocation2 + $0x88] sm:$0xff]  ;;  %v1043_v6 = vpack.c.bf16 %v181_v0, %v175_v63  ;;  %v192_v14 = vld [vmem:[#allocation4 + $0x3b0] sm:$0xff] }
  0x60   :  { %1002 = vmatpush1.bf16.msra.mxu1 %v1001_v44  ;;  %940 = vmatprep.subr.bf16.mxu0 %v939_v45  ;;  %v144_v44 = vld [vmem:[#allocation4 + $0x230] sm:$0xff]  ;;  %v1249_v45 = vld [vmem:[#allocation2 + $0x58] sm:$0xff]  ;;  %v187_v7 = vld [vmem:[#allocation4 + $0x388] sm:$0xff] }
  0x61   :  { %1004 = vmatprep.subr.bf16.mxu1 %v1003_v49  ;;  %v1253_v49 = vld [vmem:[#allocation2 + $0x50] sm:$0xff]  ;;  %v1033_v50 = vpack.c.bf16 %v144_v44, %v138_v43  ;;  %v1277_v10 = vld [vmem:[#allocation2 + $0x80] sm:$0xff]  ;;  %v1281_v15 = vld [vmem:[#allocation2 + $0x98] sm:$0xff] }
  0x62   :  { %v199_v19 = vld [vmem:[#allocation4 + $0x3e8] sm:$0xff]  ;;  %v205_v20 = vld [vmem:[#allocation4 + $0x418] sm:$0xff]  ;;  %v198_v24 = vld [vmem:[#allocation4 + $0x3e0] sm:$0xff] }
  0x63   :  { %942 = vmatpush1.bf16.msra.mxu0 %v941_v55  ;;  %v163_v55 = vld [vmem:[#allocation4 + $0x2c8] sm:$0xff]  ;;  %v1051_v28 = vpack.c.bf16 %v205_v20, %v199_v19  ;;  %v217_v31 = vld [vmem:[#allocation4 + $0x478] sm:$0xff]  ;;  %v1293_v32 = vld [vmem:[#allocation2 + $0xa0] sm:$0xff] }
  0x64   :  { %1006 = vmatpush1.bf16.msra.mxu1 %v1005_v56  ;;  %944 = vmatprep.subr.bf16.mxu0 %v943_v57  ;;  %v169_v56 = vld [vmem:[#allocation4 + $0x2f8] sm:$0xff]  ;;  %v1261_v57 = vld [vmem:[#allocation2 + $0x60] sm:$0xff]  ;;  %v1289_v27 = vld [vmem:[#allocation2 + $0xa8] sm:$0xff] }
  0x65   :  { %1008 = vmatprep.subr.bf16.mxu1 %v1007_v61  ;;  %v1265_v61 = vld [vmem:[#allocation2 + $0x78] sm:$0xff]  ;;  %v1039_v62 = vpack.c.bf16 %v169_v56, %v163_v55  ;;  %v210_v35 = vld [vmem:[#allocation4 + $0x440] sm:$0xff]  ;;  %v216_v36 = vld [vmem:[#allocation4 + $0x470] sm:$0xff] }
  0x66   :  { %v223_v40 = vld [vmem:[#allocation4 + $0x4a8] sm:$0xff]  ;;  %v1301_v43 = vld [vmem:[#allocation2 + $0xb0] sm:$0xff]  ;;  %v1057_v44 = vpack.c.bf16 %v216_v36, %v210_v35  ;;  %v241_v52 = vld [vmem:[#allocation4 + $0x538] sm:$0xff] }
  0x67   :  { %946 = vmatpush1.bf16.msra.mxu0 %v945_v1  ;;  %v1269_v1 = vld [vmem:[#allocation2 + $0x70] sm:$0xff]  ;;  %v1305_v48 = vld [vmem:[#allocation2 + $0xc8] sm:$0xff]  ;;  %v234_v56 = vld [vmem:[#allocation4 + $0x500] sm:$0xff] }
  0x68   :  { %1010 = vmatpush1.bf16.msra.mxu1 %v1009_v2  ;;  %1012 = vmatprep.subr.bf16.mxu0 %v1011_v3  ;;  %v1041_v2 = vpack.c.bf16 %v168_v60, %v162_v59  ;;  %v228_v47 = vld [vmem:[#allocation4 + $0x4d0] sm:$0xff]  ;;  %v235_v51 = vld [vmem:[#allocation4 + $0x508] sm:$0xff]  ;;  %v1313_v59 = vld [vmem:[#allocation2 + $0xd8] sm:$0xff] }
  0x69   :  { %1075 = vmatprep.subr.bf16.mxu1 %v1011_v3  ;;  %v174_v3 = vld [vmem:[#allocation4 + $0x320] sm:$0xff]  ;;  %v1063_v60 = vpack.c.bf16 %v241_v52, %v235_v51  ;;  %v253_v63 = vld [vmem:[#allocation4 + $0x598] sm:$0xff]  ;;  %v1317_v0 = vld [vmem:[#allocation2 + $0xd0] sm:$0xff] }
  0x6a   :  { %363 = vmatmul.mubr.f32.vlgmr.msra.gmra.mrb[0].mxu0 %v1215_v8  ;;  %v1045_v11 = vpack.c.bf16 %v180_v4, %v174_v3  ;;  %v246_v3 = vld [vmem:[#allocation4 + $0x560] sm:$0xff]  ;;  %v252_v4 = vld [vmem:[#allocation4 + $0x590] sm:$0xff]  ;;  %v73_v20 = vld [vmem:[#allocation2 + $0xf8] sm:$0xff] }
  0x6b   :  { %524 = vmatmul.mubr.f32.vlgmr.msra.gmra.mrb[0].mxu1 %v1215_v8  ;;  %1014 = vmatpush1.bf16.msra.mxu0 %v1013_v9  ;;  %v264_v19 = vld [vmem:[#allocation4 + $0x5f0] sm:$0xff] }
  0x6c   :  { %1091 = vmatpush1.bf16.msra.mxu1 %v1013_v9  ;;  %368 = vmatprep.mubr.f32.mxu0 %v1217_v12  ;;  %v193_v9 = vld [vmem:[#allocation4 + $0x3b8] sm:$0xff] }
  0x6d   :  { %529 = vmatprep.mubr.f32.mxu1 %v1217_v12  ;;  %1016 = vmatprep.subr.bf16.mxu0 %v1015_v13 }
  0x6e   :  { %369 = vmatmul.mubr.f32.gmra.mrb[2].mxu0 %v1221_v17  ;;  %1076 = vmatprep.subr.bf16.mxu1 %v1015_v13  ;;  %v186_v13 = vld [vmem:[#allocation4 + $0x380] sm:$0xff] }
  0x6f   :  { %530 = vmatmul.mubr.f32.gmra.mrb[2].mxu1 %v1221_v17  ;;  %1018 = vmatpush1.bf16.msra.mxu0 %v1017_v18  ;;  %v1049_v23 = vpack.c.bf16 %v192_v14, %v186_v13  ;;  %v70_v13 = vld [vmem:[#allocation2 + $0xe0] sm:$0xff]  ;;  %v1069_v14 = vpack.c.bf16 %v252_v4, %v246_v3 }
  0x70   :  { %1092 = vmatpush1.bf16.msra.mxu1 %v1017_v18  ;;  %374 = vmatprep.mubr.f32.mxu0 %v1225_v21  ;;  %v1047_v18 = vpack.c.bf16 %v193_v9, %v187_v7  ;;  %v259_v9 = vld [vmem:[#allocation4 + $0x5c8] sm:$0xff] }
  0x71   :  { %535 = vmatprep.mubr.f32.mxu1 %v1225_v21  ;;  %1020 = vmatprep.subr.bf16.mxu0 %v1019_v22 }
  0x72   :  { %375 = vmatmul.mubr.f32.gmra.mrb[4].mxu0 %v1229_v25  ;;  %1077 = vmatprep.subr.bf16.mxu1 %v1019_v22  ;;  %v1285_v22 = vld [vmem:[#allocation2 + $0x90] sm:$0xff] }
  0x73   :  { %536 = vmatmul.mubr.f32.gmra.mrb[4].mxu1 %v1229_v25  ;;  %1022 = vmatpush1.bf16.msra.mxu0 %v1021_v26 }
  0x74   :  { %1093 = vmatpush1.bf16.msra.mxu1 %v1021_v26  ;;  %380 = vmatprep.mubr.f32.mxu0 %v1233_v29  ;;  %v204_v26 = vld [vmem:[#allocation4 + $0x410] sm:$0xff] }
  0x75   :  { %541 = vmatprep.mubr.f32.mxu1 %v1233_v29  ;;  %1024 = vmatprep.subr.bf16.mxu0 %v1023_v30 }
  0x76   :  { %381 = vmatmul.mubr.f32.gmra.mrb[6].mxu0 %v1237_v33  ;;  %1078 = vmatprep.subr.bf16.mxu1 %v1023_v30  ;;  %v211_v30 = vld [vmem:[#allocation4 + $0x448] sm:$0xff] }
  0x77   :  { %542 = vmatmul.mubr.f32.gmra.mrb[6].mxu1 %v1237_v33  ;;  %1026 = vmatpush1.bf16.msra.mxu0 %v1025_v34  ;;  %v1055_v39 = vpack.c.bf16 %v217_v31, %v211_v30 }
  0x78   :  { %1094 = vmatpush1.bf16.msra.mxu1 %v1025_v34  ;;  %386 = vmatprep.mubr.f32.mxu0 %v1241_v37  ;;  %v1053_v34 = vpack.c.bf16 %v204_v26, %v198_v24  ;;  %v72_v24 = vld [vmem:[#allocation2 + $0xf0] sm:$0xff] }
  0x79   :  { %547 = vmatprep.mubr.f32.mxu1 %v1241_v37  ;;  %1028 = vmatprep.subr.bf16.mxu0 %v1027_v38 }
  0x7a   :  { %387 = vmatmul.mubr.f32.gmra.mrb[8].mxu0 %v1245_v41  ;;  %1079 = vmatprep.subr.bf16.mxu1 %v1027_v38  ;;  %v1297_v38 = vld [vmem:[#allocation2 + $0xb8] sm:$0xff] }
  0x7b   :  { %548 = vmatmul.mubr.f32.gmra.mrb[8].mxu1 %v1245_v41  ;;  %1030 = vmatpush1.bf16.msra.mxu0 %v1029_v42 }
  0x7c   :  { %1095 = vmatpush1.bf16.msra.mxu1 %v1029_v42  ;;  %392 = vmatprep.mubr.f32.mxu0 %v1249_v45  ;;  %v229_v42 = vld [vmem:[#allocation4 + $0x4d8] sm:$0xff] }
  0x7d   :  { %553 = vmatprep.mubr.f32.mxu1 %v1249_v45  ;;  %1032 = vmatprep.subr.bf16.mxu0 %v1031_v46 }
  0x7e   :  { %393 = vmatmul.mubr.f32.gmra.mrb[10].mxu0 %v1253_v49  ;;  %1080 = vmatprep.subr.bf16.mxu1 %v1031_v46  ;;  %v222_v46 = vld [vmem:[#allocation4 + $0x4a0] sm:$0xff] }
  0x7f   :  { %554 = vmatmul.mubr.f32.gmra.mrb[10].mxu1 %v1253_v49  ;;  %1034 = vmatpush1.bf16.msra.mxu0 %v1033_v50  ;;  %v1061_v55 = vpack.c.bf16 %v228_v47, %v222_v46 }
  0x80   :  { %1096 = vmatpush1.bf16.msra.mxu1 %v1033_v50  ;;  %398 = vmatprep.mubr.f32.mxu0 %v1257_v53  ;;  %v1059_v50 = vpack.c.bf16 %v229_v42, %v223_v40 }
  0x81   :  { %559 = vmatprep.mubr.f32.mxu1 %v1257_v53  ;;  %1036 = vmatprep.subr.bf16.mxu0 %v1035_v54 }
  0x82   :  { %399 = vmatmul.mubr.f32.gmra.mrb[12].mxu0 %v1261_v57  ;;  %1081 = vmatprep.subr.bf16.mxu1 %v1035_v54  ;;  %v1309_v54 = vld [vmem:[#allocation2 + $0xc0] sm:$0xff] }
  0x83   :  { %560 = vmatmul.mubr.f32.gmra.mrb[12].mxu1 %v1261_v57  ;;  %1038 = vmatpush1.bf16.msra.mxu0 %v1037_v58 }
  0x84   :  { %1097 = vmatpush1.bf16.msra.mxu1 %v1037_v58  ;;  %404 = vmatprep.mubr.f32.mxu0 %v1265_v61  ;;  %v240_v58 = vld [vmem:[#allocation4 + $0x530] sm:$0xff] }
  0x85   :  { %565 = vmatprep.mubr.f32.mxu1 %v1265_v61  ;;  %1040 = vmatprep.subr.bf16.mxu0 %v1039_v62 }
  0x86   :  { %405 = vmatmul.mubr.f32.gmra.mrb[14].mxu0 %v1269_v1  ;;  %1082 = vmatprep.subr.bf16.mxu1 %v1039_v62  ;;  %v247_v62 = vld [vmem:[#allocation4 + $0x568] sm:$0xff] }
  0x87   :  { %566 = vmatmul.mubr.f32.gmra.mrb[14].mxu1 %v1269_v1  ;;  %1042 = vmatpush1.bf16.msra.mxu0 %v1041_v2  ;;  %v1067_v7 = vpack.c.bf16 %v253_v63, %v247_v62 }
  0x88   :  { %1098 = vmatpush1.bf16.msra.mxu1 %v1041_v2  ;;  %410 = vmatprep.mubr.f32.mxu0 %v1273_v5  ;;  %v1065_v2 = vpack.c.bf16 %v240_v58, %v234_v56 }
  0x89   :  { %571 = vmatprep.mubr.f32.mxu1 %v1273_v5  ;;  %1044 = vmatprep.subr.bf16.mxu0 %v1043_v6 }
  0x8a   :  { %411 = vmatmul.mubr.f32.gmra.mrb[16].mxu0 %v1277_v10  ;;  %1083 = vmatprep.subr.bf16.mxu1 %v1043_v6  ;;  %v71_v6 = vld [vmem:[#allocation2 + $0xe8] sm:$0xff] }
  0x8b   :  { %572 = vmatmul.mubr.f32.gmra.mrb[16].mxu1 %v1277_v10  ;;  %1046 = vmatpush1.bf16.msra.mxu0 %v1045_v11 }
  0x8c   :  { %1099 = vmatpush1.bf16.msra.mxu1 %v1045_v11  ;;  %416 = vmatprep.mubr.f32.mxu0 %v1281_v15  ;;  %v265_v11 = vld [vmem:[#allocation4 + $0x5f8] sm:$0xff] }
  0x8d   :  { %577 = vmatprep.mubr.f32.mxu1 %v1281_v15  ;;  %1048 = vmatprep.subr.bf16.mxu0 %v1047_v18 }
  0x8e   :  { %417 = vmatmul.mubr.f32.gmra.mrb[18].mxu0 %v1285_v22  ;;  %1084 = vmatprep.subr.bf16.mxu1 %v1047_v18  ;;  %v258_v18 = vld [vmem:[#allocation4 + $0x5c0] sm:$0xff] }
  0x8f   :  { %578 = vmatmul.mubr.f32.gmra.mrb[18].mxu1 %v1285_v22  ;;  %1050 = vmatpush1.bf16.msra.mxu0 %v1049_v23  ;;  %v1073_v26 = vpack.c.bf16 %v264_v19, %v258_v18 }
  0x90   :  { %1100 = vmatpush1.bf16.msra.mxu1 %v1049_v23  ;;  %422 = vmatprep.mubr.f32.mxu0 %v1289_v27  ;;  %v1071_v23 = vpack.c.bf16 %v265_v11, %v259_v9 }
  0x91   :  { %583 = vmatprep.mubr.f32.mxu1 %v1289_v27  ;;  %1052 = vmatprep.subr.bf16.mxu0 %v1051_v28 }
  0x92   :  { %423 = vmatmul.mubr.f32.gmra.mrb[20].mxu0 %v1293_v32  ;;  %1085 = vmatprep.subr.bf16.mxu1 %v1051_v28 }
  0x93   :  { %584 = vmatmul.mubr.f32.gmra.mrb[20].mxu1 %v1293_v32  ;;  %1054 = vmatpush1.bf16.msra.mxu0 %v1053_v34 }
  0x94   :  { %1101 = vmatpush1.bf16.msra.mxu1 %v1053_v34  ;;  %428 = vmatprep.mubr.f32.mxu0 %v1297_v38 }
  0x95   :  { %589 = vmatprep.mubr.f32.mxu1 %v1297_v38  ;;  %1056 = vmatprep.subr.bf16.mxu0 %v1055_v39 }
  0x96   :  { %429 = vmatmul.mubr.f32.gmra.mrb[22].mxu0 %v1301_v43  ;;  %1086 = vmatprep.subr.bf16.mxu1 %v1055_v39 }
  0x97   :  { %590 = vmatmul.mubr.f32.gmra.mrb[22].mxu1 %v1301_v43  ;;  %1058 = vmatpush1.bf16.msra.mxu0 %v1057_v44 }
  0x98   :  { %1102 = vmatpush1.bf16.msra.mxu1 %v1057_v44  ;;  %434 = vmatprep.mubr.f32.mxu0 %v1305_v48 }
  0x99   :  { %595 = vmatprep.mubr.f32.mxu1 %v1305_v48  ;;  %1060 = vmatprep.subr.bf16.mxu0 %v1059_v50 }
  0x9a   :  { %435 = vmatmul.mubr.f32.gmra.mrb[24].mxu0 %v1309_v54  ;;  %1087 = vmatprep.subr.bf16.mxu1 %v1059_v50 }
  0x9b   :  { %596 = vmatmul.mubr.f32.gmra.mrb[24].mxu1 %v1309_v54  ;;  %1062 = vmatpush1.bf16.msra.mxu0 %v1061_v55 }
  0x9c   :  { %1103 = vmatpush1.bf16.msra.mxu1 %v1061_v55  ;;  %440 = vmatprep.mubr.f32.mxu0 %v1313_v59 }
  0x9d   :  { %601 = vmatprep.mubr.f32.mxu1 %v1313_v59  ;;  %1064 = vmatprep.subr.bf16.mxu0 %v1063_v60 }
  0x9e   :  { %441 = vmatmul.mubr.f32.gmra.mrb[26].mxu0 %v1317_v0  ;;  %1088 = vmatprep.subr.bf16.mxu1 %v1063_v60 }
  0x9f   :  { %602 = vmatmul.mubr.f32.gmra.mrb[26].mxu1 %v1317_v0  ;;  %1066 = vmatpush1.bf16.msra.mxu0 %v1065_v2 }
  0xa0   :  { %1104 = vmatpush1.bf16.msra.mxu1 %v1065_v2  ;;  %446 = vmatprep.mubr.f32.mxu0 %v71_v6 }
  0xa1   :  { %607 = vmatprep.mubr.f32.mxu1 %v71_v6  ;;  %1068 = vmatprep.subr.bf16.mxu0 %v1067_v7 }
  0xa2   :  { %447 = vmatmul.mubr.f32.gmra.mrb[28].mxu0 %v70_v13  ;;  %1089 = vmatprep.subr.bf16.mxu1 %v1067_v7 }
  0xa3   :  { %608 = vmatmul.mubr.f32.gmra.mrb[28].mxu1 %v70_v13  ;;  %1070 = vmatpush1.bf16.msra.mxu0 %v1069_v14 }
  0xa4   :  { %1105 = vmatpush1.bf16.msra.mxu1 %v1069_v14  ;;  %452 = vmatprep.mubr.f32.mxu0 %v73_v20 }
  0xa5   :  { %613 = vmatprep.mubr.f32.mxu1 %v73_v20  ;;  %1072 = vmatprep.subr.bf16.mxu0 %v1071_v23 }
  0xa6   :  { %453 = vmatmul.mubr.f32.gmra.mrb[30].mxu0 %v72_v24  ;;  %1090 = vmatprep.subr.bf16.mxu1 %v1071_v23 }
  0xa7   :  { %614 = vmatmul.mubr.f32.gmra.mrb[30].mxu1 %v72_v24  ;;  %1074 = vmatpush1.bf16.msra.mxu0 %v1073_v26 }
  0xa8   :  { %1106 = vmatpush1.bf16.msra.mxu1 %v1073_v26  ;;  %684 = vmatprep.mubr.f32.mxu0 %v1211_v16  ;;  %v268_v16 = vlaneseq }
  0xa9   :  { %732 = vmatprep.mubr.f32.mxu1 %v1273_v5 }
  0xaa   :  { %685 = vmatmul.mubr.f32.vlgmr.msra.gmra.mrb[32].mxu0 %v1215_v8  ;;  %v1351_v8 = vshrl.u32 %v268_v16, 7 }
  0xab   :  { %733 = vmatmul.mubr.f32.vlgmr.msra.gmra.mrb[32].mxu1 %v1277_v10  ;;  %690 = vmatprep.mubr.f32.mxu0 %v1217_v12 }
  0xac   :  { %738 = vmatprep.mubr.f32.mxu1 %v1281_v15  ;;  %v270_v12 = vsub.s32 0, %v1351_v8 }
  0xae   :  { %691 = vmatmul.mubr.f32.gmra.mrb[34].mxu0 %v1221_v17  ;;  %v1357_v17 = vld [vmem:[%s1768_s2] sm:$0x3f] }
  0xaf   :  { %739 = vmatmul.mubr.f32.gmra.mrb[34].mxu1 %v1285_v22  ;;  %696 = vmatprep.mubr.f32.mxu0 %v1225_v21  ;;  %v278_v21 = vsub.s32 2, %v1351_v8 }
  0xb0   :  { %744 = vmatprep.mubr.f32.mxu1 %v1289_v27 }
  0xb2   :  { %697 = vmatmul.mubr.f32.gmra.mrb[36].mxu0 %v1229_v25  ;;  %v274_v25 = vsub.s32 1, %v1351_v8 }
  0xb3   :  { %745 = vmatmul.mubr.f32.gmra.mrb[36].mxu1 %v1293_v32  ;;  %702 = vmatprep.mubr.f32.mxu0 %v1233_v29  ;;  %v282_v29 = vsub.s32 3, %v1351_v8 }
  0xb4   :  { %750 = vmatprep.mubr.f32.mxu1 %v1297_v38 }
  0xb6   :  { %703 = vmatmul.mubr.f32.gmra.mrb[38].mxu0 %v1237_v33  ;;  %v1363_v33 = vrot.slane %v1357_v17, %v270_v12 }
  0xb7   :  { %751 = vmatmul.mubr.f32.gmra.mrb[38].mxu1 %v1301_v43  ;;  %708 = vmatprep.mubr.f32.mxu0 %v1241_v37  ;;  %v1366_v37 = vrot.slane %v1357_v17, %v278_v21 }
  0xb8   :  { %756 = vmatprep.mubr.f32.mxu1 %v1305_v48 }
  0xba   :  { %709 = vmatmul.mubr.f32.gmra.mrb[40].mxu0 %v1245_v41  ;;  %v1369_v41 = vrot.slane %v1357_v17, %v274_v25 }
  0xbb   :  { %757 = vmatmul.mubr.f32.gmra.mrb[40].mxu1 %v1309_v54  ;;  %714 = vmatprep.mubr.f32.mxu0 %v1249_v45  ;;  %v1372_v45 = vrot.slane %v1357_v17, %v282_v29 }
  0xbc   :  { %762 = vmatprep.mubr.f32.mxu1 %v1313_v59 }
  0xbe   :  { %715 = vmatmul.mubr.f32.gmra.mrb[42].mxu0 %v1253_v49 }
  0xbf   :  { %763 = vmatmul.mubr.f32.gmra.mrb[42].mxu1 %v1317_v0  ;;  %720 = vmatprep.mubr.f32.mxu0 %v1257_v53 }
  0xc0   :  { %768 = vmatprep.mubr.f32.mxu1 %v71_v6 }
  0xc2   :  { %721 = vmatmul.mubr.f32.gmra.mrb[44].mxu0 %v1261_v57 }
  0xc3   :  { %769 = vmatmul.mubr.f32.gmra.mrb[44].mxu1 %v70_v13  ;;  %726 = vmatprep.mubr.f32.mxu0 %v1265_v61 }
  0xc4   :  { %774 = vmatprep.mubr.f32.mxu1 %v73_v20 }
  0xc6   :  { %727 = vmatmul.mubr.f32.gmra.mrb[46].mxu0 %v1269_v1 }
  0xc7   :  { %775 = vmatmul.mubr.f32.gmra.mrb[46].mxu1 %v72_v24 }
 0x13d   :  { %v364_v49 = vpop.f32.mrb[0].mxu0 }
 0x13e   :  { %v365_v53 = vadd.f32 %v364_v49, %v1363_v33  ;;  %v525_v57 = vpop.f32.mrb[0].mxu1  ;;  %v366_v61 = vpop.f32.mrb[1].mxu0 }
 0x13f   :  { %v526_v1 = vadd.f32 %v525_v57, %v1366_v37  ;;  %v367_v5 = vadd.f32 %v366_v61, %v1369_v41  ;;  %v527_v10 = vpop.f32.mrb[1].mxu1 }
 0x140   :  { %781 = vst [vmem:[%s1769_s3] sm:$0xff] %v365_v53  ;;  %v528_v15 = vadd.f32 %v527_v10, %v1372_v45 }
 0x141   :  { %783 = vst [vmem:[%s1769_s3 + $0x10] sm:$0xff] %v526_v1  ;;  %782 = vst [vmem:[%s1769_s3 + $0x8] sm:$0xff] %v367_v5  ;;  %v370_v22 = vpop.f32.mrb[2].mxu0 }
 0x142   :  { %784 = vst [vmem:[%s1769_s3 + $0x18] sm:$0xff] %v528_v15  ;;  %v371_v27 = vadd.f32 %v370_v22, %v1363_v33  ;;  %v531_v28 = vpop.f32.mrb[2].mxu1  ;;  %v372_v30 = vpop.f32.mrb[3].mxu0 }
 0x143   :  { %v532_v31 = vadd.f32 %v531_v28, %v1366_v37  ;;  %v373_v32 = vadd.f32 %v372_v30, %v1369_v41  ;;  %v533_v34 = vpop.f32.mrb[3].mxu1 }
 0x144   :  { %787 = vst [vmem:[%s1769_s3 + $0x30] sm:$0xff] %v371_v27  ;;  %v534_v35 = vadd.f32 %v533_v34, %v1372_v45 }
 0x145   :  { %789 = vst [vmem:[%s1769_s3 + $0x40] sm:$0xff] %v532_v31  ;;  %788 = vst [vmem:[%s1769_s3 + $0x38] sm:$0xff] %v373_v32  ;;  %v376_v36 = vpop.f32.mrb[4].mxu0 }
 0x146   :  { %790 = vst [vmem:[%s1769_s3 + $0x48] sm:$0xff] %v534_v35  ;;  %v377_v38 = vadd.f32 %v376_v36, %v1363_v33  ;;  %v537_v39 = vpop.f32.mrb[4].mxu1  ;;  %v378_v40 = vpop.f32.mrb[5].mxu0 }
 0x147   :  { %v538_v42 = vadd.f32 %v537_v39, %v1366_v37  ;;  %v379_v43 = vadd.f32 %v378_v40, %v1369_v41  ;;  %v539_v44 = vpop.f32.mrb[5].mxu1 }
 0x148   :  { %793 = vst [vmem:[%s1769_s3 + $0x60] sm:$0xff] %v377_v38  ;;  %v540_v46 = vadd.f32 %v539_v44, %v1372_v45 }
 0x149   :  { %795 = vst [vmem:[%s1769_s3 + $0x70] sm:$0xff] %v538_v42  ;;  %794 = vst [vmem:[%s1769_s3 + $0x68] sm:$0xff] %v379_v43  ;;  %v382_v47 = vpop.f32.mrb[6].mxu0 }
 0x14a   :  { %796 = vst [vmem:[%s1769_s3 + $0x78] sm:$0xff] %v540_v46  ;;  %v383_v48 = vadd.f32 %v382_v47, %v1363_v33  ;;  %v543_v50 = vpop.f32.mrb[6].mxu1  ;;  %v384_v51 = vpop.f32.mrb[7].mxu0 }
 0x14b   :  { %v544_v52 = vadd.f32 %v543_v50, %v1366_v37  ;;  %v385_v54 = vadd.f32 %v384_v51, %v1369_v41  ;;  %v545_v55 = vpop.f32.mrb[7].mxu1 }
 0x14c   :  { %799 = vst [vmem:[%s1769_s3 + $0x90] sm:$0xff] %v383_v48  ;;  %v546_v56 = vadd.f32 %v545_v55, %v1372_v45 }
 0x14d   :  { %801 = vst [vmem:[%s1769_s3 + $0xa0] sm:$0xff] %v544_v52  ;;  %800 = vst [vmem:[%s1769_s3 + $0x98] sm:$0xff] %v385_v54  ;;  %v388_v58 = vpop.f32.mrb[8].mxu0 }
 0x14e   :  { %802 = vst [vmem:[%s1769_s3 + $0xa8] sm:$0xff] %v546_v56  ;;  %v389_v59 = vadd.f32 %v388_v58, %v1363_v33  ;;  %v549_v60 = vpop.f32.mrb[8].mxu1  ;;  %v390_v62 = vpop.f32.mrb[9].mxu0 }
 0x14f   :  { %v550_v63 = vadd.f32 %v549_v60, %v1366_v37  ;;  %v391_v0 = vadd.f32 %v390_v62, %v1369_v41  ;;  %v551_v2 = vpop.f32.mrb[9].mxu1 }
 0x150   :  { %805 = vst [vmem:[%s1769_s3 + $0xc0] sm:$0xff] %v389_v59  ;;  %v552_v3 = vadd.f32 %v551_v2, %v1372_v45 }
 0x151   :  { %807 = vst [vmem:[%s1769_s3 + $0xd0] sm:$0xff] %v550_v63  ;;  %806 = vst [vmem:[%s1769_s3 + $0xc8] sm:$0xff] %v391_v0  ;;  %v394_v4 = vpop.f32.mrb[10].mxu0 }
 0x152   :  { %808 = vst [vmem:[%s1769_s3 + $0xd8] sm:$0xff] %v552_v3  ;;  %v395_v6 = vadd.f32 %v394_v4, %v1363_v33  ;;  %v555_v7 = vpop.f32.mrb[10].mxu1  ;;  %v396_v9 = vpop.f32.mrb[11].mxu0 }
 0x153   :  { %v556_v11 = vadd.f32 %v555_v7, %v1366_v37  ;;  %v397_v13 = vadd.f32 %v396_v9, %v1369_v41  ;;  %v557_v14 = vpop.f32.mrb[11].mxu1 }
 0x154   :  { %811 = vst [vmem:[%s1769_s3 + $0xf0] sm:$0xff] %v395_v6  ;;  %v558_v18 = vadd.f32 %v557_v14, %v1372_v45 }
 0x155   :  { %813 = vst [vmem:[%s1769_s3 + $0x100] sm:$0xff] %v556_v11  ;;  %812 = vst [vmem:[%s1769_s3 + $0xf8] sm:$0xff] %v397_v13  ;;  %v400_v19 = vpop.f32.mrb[12].mxu0 }
 0x156   :  { %814 = vst [vmem:[%s1769_s3 + $0x108] sm:$0xff] %v558_v18  ;;  %v401_v20 = vadd.f32 %v400_v19, %v1363_v33  ;;  %v561_v23 = vpop.f32.mrb[12].mxu1  ;;  %v402_v24 = vpop.f32.mrb[13].mxu0 }
 0x157   :  { %v562_v26 = vadd.f32 %v561_v23, %v1366_v37  ;;  %v403_v16 = vadd.f32 %v402_v24, %v1369_v41  ;;  %v563_v12 = vpop.f32.mrb[13].mxu1 }
 0x158   :  { %817 = vst [vmem:[%s1769_s3 + $0x120] sm:$0xff] %v401_v20  ;;  %v564_v21 = vadd.f32 %v563_v12, %v1372_v45 }
 0x159   :  { %819 = vst [vmem:[%s1769_s3 + $0x130] sm:$0xff] %v562_v26  ;;  %818 = vst [vmem:[%s1769_s3 + $0x128] sm:$0xff] %v403_v16  ;;  %v406_v25 = vpop.f32.mrb[14].mxu0 }
 0x15a   :  { %820 = vst [vmem:[%s1769_s3 + $0x138] sm:$0xff] %v564_v21  ;;  %v407_v29 = vadd.f32 %v406_v25, %v1363_v33  ;;  %v567_v49 = vpop.f32.mrb[14].mxu1  ;;  %v408_v53 = vpop.f32.mrb[15].mxu0 }
 0x15b   :  { %v568_v57 = vadd.f32 %v567_v49, %v1366_v37  ;;  %v409_v61 = vadd.f32 %v408_v53, %v1369_v41  ;;  %v569_v1 = vpop.f32.mrb[15].mxu1  ;;  %v286_v49 = vsub.s32 4, %v1351_v8 }
 0x15c   :  { %823 = vst [vmem:[%s1769_s3 + $0x150] sm:$0xff] %v407_v29  ;;  %v570_v5 = vadd.f32 %v569_v1, %v1372_v45  ;;  %v290_v1 = vsub.s32 5, %v1351_v8 }
 0x15d   :  { %825 = vst [vmem:[%s1769_s3 + $0x160] sm:$0xff] %v568_v57  ;;  %824 = vst [vmem:[%s1769_s3 + $0x158] sm:$0xff] %v409_v61  ;;  %v412_v10 = vpop.f32.mrb[16].mxu0 }
 0x15e   :  { %826 = vst [vmem:[%s1769_s3 + $0x168] sm:$0xff] %v570_v5  ;;  %v413_v15 = vadd.f32 %v412_v10, %v1363_v33  ;;  %v573_v22 = vpop.f32.mrb[16].mxu1  ;;  %v414_v27 = vpop.f32.mrb[17].mxu0 }
 0x15f   :  { %v574_v28 = vadd.f32 %v573_v22, %v1366_v37  ;;  %v415_v30 = vadd.f32 %v414_v27, %v1369_v41  ;;  %v575_v31 = vpop.f32.mrb[17].mxu1  ;;  %v1618_v27 = vrot.slane %v1357_v17, %v286_v49 }
 0x160   :  { %829 = vst [vmem:[%s1769_s3 + $0x180] sm:$0xff] %v413_v15  ;;  %v576_v32 = vadd.f32 %v575_v31, %v1372_v45 }
 0x161   :  { %831 = vst [vmem:[%s1769_s3 + $0x190] sm:$0xff] %v574_v28  ;;  %830 = vst [vmem:[%s1769_s3 + $0x188] sm:$0xff] %v415_v30  ;;  %v418_v34 = vpop.f32.mrb[18].mxu0 }
 0x162   :  { %832 = vst [vmem:[%s1769_s3 + $0x198] sm:$0xff] %v576_v32  ;;  %v419_v35 = vadd.f32 %v418_v34, %v1363_v33  ;;  %v579_v36 = vpop.f32.mrb[18].mxu1  ;;  %v420_v38 = vpop.f32.mrb[19].mxu0  ;;  %v1623_v32 = vrot.slane %v1357_v17, %v290_v1 }
 0x163   :  { %v580_v39 = vadd.f32 %v579_v36, %v1366_v37  ;;  %v421_v40 = vadd.f32 %v420_v38, %v1369_v41  ;;  %v581_v42 = vpop.f32.mrb[19].mxu1 }
 0x164   :  { %835 = vst [vmem:[%s1769_s3 + $0x1b0] sm:$0xff] %v419_v35  ;;  %v582_v43 = vadd.f32 %v581_v42, %v1372_v45 }
 0x165   :  { %837 = vst [vmem:[%s1769_s3 + $0x1c0] sm:$0xff] %v580_v39  ;;  %836 = vst [vmem:[%s1769_s3 + $0x1b8] sm:$0xff] %v421_v40  ;;  %v424_v44 = vpop.f32.mrb[20].mxu0 }
 0x166   :  { %838 = vst [vmem:[%s1769_s3 + $0x1c8] sm:$0xff] %v582_v43  ;;  %v425_v46 = vadd.f32 %v424_v44, %v1363_v33  ;;  %v585_v47 = vpop.f32.mrb[20].mxu1  ;;  %v426_v48 = vpop.f32.mrb[21].mxu0 }
 0x167   :  { %v586_v50 = vadd.f32 %v585_v47, %v1366_v37  ;;  %v427_v51 = vadd.f32 %v426_v48, %v1369_v41  ;;  %v587_v52 = vpop.f32.mrb[21].mxu1 }
 0x168   :  { %841 = vst [vmem:[%s1769_s3 + $0x1e0] sm:$0xff] %v425_v46  ;;  %v588_v54 = vadd.f32 %v587_v52, %v1372_v45 }
 0x169   :  { %843 = vst [vmem:[%s1769_s3 + $0x1f0] sm:$0xff] %v586_v50  ;;  %842 = vst [vmem:[%s1769_s3 + $0x1e8] sm:$0xff] %v427_v51  ;;  %v430_v55 = vpop.f32.mrb[22].mxu0 }
 0x16a   :  { %844 = vst [vmem:[%s1769_s3 + $0x1f8] sm:$0xff] %v588_v54  ;;  %v431_v56 = vadd.f32 %v430_v55, %v1363_v33  ;;  %v591_v58 = vpop.f32.mrb[22].mxu1  ;;  %v432_v59 = vpop.f32.mrb[23].mxu0 }
 0x16b   :  { %v592_v60 = vadd.f32 %v591_v58, %v1366_v37  ;;  %v433_v62 = vadd.f32 %v432_v59, %v1369_v41  ;;  %v593_v63 = vpop.f32.mrb[23].mxu1 }
 0x16c   :  { %847 = vst [vmem:[%s1769_s3 + $0x210] sm:$0xff] %v431_v56  ;;  %v594_v0 = vadd.f32 %v593_v63, %v1372_v45 }
 0x16d   :  { %849 = vst [vmem:[%s1769_s3 + $0x220] sm:$0xff] %v592_v60  ;;  %848 = vst [vmem:[%s1769_s3 + $0x218] sm:$0xff] %v433_v62  ;;  %v436_v2 = vpop.f32.mrb[24].mxu0 }
 0x16e   :  { %850 = vst [vmem:[%s1769_s3 + $0x228] sm:$0xff] %v594_v0  ;;  %v437_v3 = vadd.f32 %v436_v2, %v1363_v33  ;;  %v597_v4 = vpop.f32.mrb[24].mxu1  ;;  %v438_v6 = vpop.f32.mrb[25].mxu0 }
 0x16f   :  { %v598_v7 = vadd.f32 %v597_v4, %v1366_v37  ;;  %v439_v9 = vadd.f32 %v438_v6, %v1369_v41  ;;  %v599_v11 = vpop.f32.mrb[25].mxu1 }
 0x170   :  { %853 = vst [vmem:[%s1769_s3 + $0x240] sm:$0xff] %v437_v3  ;;  %v600_v13 = vadd.f32 %v599_v11, %v1372_v45 }
 0x171   :  { %855 = vst [vmem:[%s1769_s3 + $0x250] sm:$0xff] %v598_v7  ;;  %854 = vst [vmem:[%s1769_s3 + $0x248] sm:$0xff] %v439_v9  ;;  %v442_v14 = vpop.f32.mrb[26].mxu0 }
 0x172   :  { %856 = vst [vmem:[%s1769_s3 + $0x258] sm:$0xff] %v600_v13  ;;  %v443_v18 = vadd.f32 %v442_v14, %v1363_v33  ;;  %v603_v19 = vpop.f32.mrb[26].mxu1  ;;  %v444_v20 = vpop.f32.mrb[27].mxu0 }
 0x173   :  { %v604_v23 = vadd.f32 %v603_v19, %v1366_v37  ;;  %v445_v24 = vadd.f32 %v444_v20, %v1369_v41  ;;  %v605_v26 = vpop.f32.mrb[27].mxu1 }
 0x174   :  { %859 = vst [vmem:[%s1769_s3 + $0x270] sm:$0xff] %v443_v18  ;;  %v606_v16 = vadd.f32 %v605_v26, %v1372_v45 }
 0x175   :  { %861 = vst [vmem:[%s1769_s3 + $0x280] sm:$0xff] %v604_v23  ;;  %860 = vst [vmem:[%s1769_s3 + $0x278] sm:$0xff] %v445_v24  ;;  %v448_v12 = vpop.f32.mrb[28].mxu0 }
 0x176   :  { %862 = vst [vmem:[%s1769_s3 + $0x288] sm:$0xff] %v606_v16  ;;  %v449_v21 = vadd.f32 %v448_v12, %v1363_v33  ;;  %v609_v25 = vpop.f32.mrb[28].mxu1  ;;  %v450_v29 = vpop.f32.mrb[29].mxu0 }
 0x177   :  { %v610_v53 = vadd.f32 %v609_v25, %v1366_v37  ;;  %v451_v57 = vadd.f32 %v450_v29, %v1369_v41  ;;  %v611_v61 = vpop.f32.mrb[29].mxu1 }
 0x178   :  { %865 = vst [vmem:[%s1769_s3 + $0x2a0] sm:$0xff] %v449_v21  ;;  %v612_v5 = vadd.f32 %v611_v61, %v1372_v45 }
 0x179   :  { %867 = vst [vmem:[%s1769_s3 + $0x2b0] sm:$0xff] %v610_v53  ;;  %866 = vst [vmem:[%s1769_s3 + $0x2a8] sm:$0xff] %v451_v57  ;;  %v454_v10 = vpop.f32.mrb[30].mxu0 }
 0x17a   :  { %868 = vst [vmem:[%s1769_s3 + $0x2b8] sm:$0xff] %v612_v5  ;;  %v455_v8 = vadd.f32 %v454_v10, %v1363_v33  ;;  %v615_v15 = vpop.f32.mrb[30].mxu1  ;;  %v456_v22 = vpop.f32.mrb[31].mxu0 }
 0x17b   :  { %v616_v28 = vadd.f32 %v615_v15, %v1366_v37  ;;  %v457_v30 = vadd.f32 %v456_v22, %v1369_v41  ;;  %v617_v31 = vpop.f32.mrb[31].mxu1 }
 0x17c   :  { %871 = vst [vmem:[%s1769_s3 + $0x2d0] sm:$0xff] %v455_v8  ;;  %v618_v34 = vadd.f32 %v617_v31, %v1372_v45 }
 0x17d   :  { %873 = vst [vmem:[%s1769_s3 + $0x2e0] sm:$0xff] %v616_v28  ;;  %872 = vst [vmem:[%s1769_s3 + $0x2d8] sm:$0xff] %v457_v30  ;;  %v686_v33 = vpop.f32.mrb[32].mxu0 }
 0x17e   :  { %874 = vst [vmem:[%s1769_s3 + $0x2e8] sm:$0xff] %v618_v34  ;;  %v687_v17 = vadd.f32 %v686_v33, %v1618_v27  ;;  %v734_v37 = vpop.f32.mrb[32].mxu1  ;;  %v688_v41 = vpop.f32.mrb[33].mxu0 }
 0x17f   :  { %v735_v35 = vadd.f32 %v734_v37, %v1618_v27  ;;  %v689_v45 = vadd.f32 %v688_v41, %v1623_v32  ;;  %v736_v36 = vpop.f32.mrb[33].mxu1 }
 0x180   :  { %785 = vst [vmem:[%s1769_s3 + $0x20] sm:$0xff] %v687_v17  ;;  %v737_v38 = vadd.f32 %v736_v36, %v1623_v32 }
 0x181   :  { %833 = vst [vmem:[%s1769_s3 + $0x1a0] sm:$0xff] %v735_v35  ;;  %786 = vst [vmem:[%s1769_s3 + $0x28] sm:$0xff] %v689_v45  ;;  %v692_v39 = vpop.f32.mrb[34].mxu0 }
 0x182   :  { %834 = vst [vmem:[%s1769_s3 + $0x1a8] sm:$0xff] %v737_v38  ;;  %v693_v40 = vadd.f32 %v692_v39, %v1618_v27  ;;  %v740_v42 = vpop.f32.mrb[34].mxu1  ;;  %v694_v43 = vpop.f32.mrb[35].mxu0 }
 0x183   :  { %v741_v44 = vadd.f32 %v740_v42, %v1618_v27  ;;  %v695_v46 = vadd.f32 %v694_v43, %v1623_v32  ;;  %v742_v47 = vpop.f32.mrb[35].mxu1 }
 0x184   :  { %791 = vst [vmem:[%s1769_s3 + $0x50] sm:$0xff] %v693_v40  ;;  %v743_v48 = vadd.f32 %v742_v47, %v1623_v32 }
 0x185   :  { %839 = vst [vmem:[%s1769_s3 + $0x1d0] sm:$0xff] %v741_v44  ;;  %792 = vst [vmem:[%s1769_s3 + $0x58] sm:$0xff] %v695_v46  ;;  %v698_v50 = vpop.f32.mrb[36].mxu0 }
 0x186   :  { %840 = vst [vmem:[%s1769_s3 + $0x1d8] sm:$0xff] %v743_v48  ;;  %v699_v51 = vadd.f32 %v698_v50, %v1618_v27  ;;  %v746_v52 = vpop.f32.mrb[36].mxu1  ;;  %v700_v54 = vpop.f32.mrb[37].mxu0 }
 0x187   :  { %v747_v55 = vadd.f32 %v746_v52, %v1618_v27  ;;  %v701_v56 = vadd.f32 %v700_v54, %v1623_v32  ;;  %v748_v58 = vpop.f32.mrb[37].mxu1 }
 0x188   :  { %797 = vst [vmem:[%s1769_s3 + $0x80] sm:$0xff] %v699_v51  ;;  %v749_v59 = vadd.f32 %v748_v58, %v1623_v32 }
 0x189   :  { %845 = vst [vmem:[%s1769_s3 + $0x200] sm:$0xff] %v747_v55  ;;  %798 = vst [vmem:[%s1769_s3 + $0x88] sm:$0xff] %v701_v56  ;;  %v704_v60 = vpop.f32.mrb[38].mxu0 }
 0x18a   :  { %846 = vst [vmem:[%s1769_s3 + $0x208] sm:$0xff] %v749_v59  ;;  %v705_v62 = vadd.f32 %v704_v60, %v1618_v27  ;;  %v752_v63 = vpop.f32.mrb[38].mxu1  ;;  %v706_v0 = vpop.f32.mrb[39].mxu0 }
 0x18b   :  { %v753_v2 = vadd.f32 %v752_v63, %v1618_v27  ;;  %v707_v3 = vadd.f32 %v706_v0, %v1623_v32  ;;  %v754_v4 = vpop.f32.mrb[39].mxu1 }
 0x18c   :  { %803 = vst [vmem:[%s1769_s3 + $0xb0] sm:$0xff] %v705_v62  ;;  %v755_v6 = vadd.f32 %v754_v4, %v1623_v32 }
 0x18d   :  { %851 = vst [vmem:[%s1769_s3 + $0x230] sm:$0xff] %v753_v2  ;;  %804 = vst [vmem:[%s1769_s3 + $0xb8] sm:$0xff] %v707_v3  ;;  %v710_v7 = vpop.f32.mrb[40].mxu0 }
 0x18e   :  { %852 = vst [vmem:[%s1769_s3 + $0x238] sm:$0xff] %v755_v6  ;;  %v711_v9 = vadd.f32 %v710_v7, %v1618_v27  ;;  %v758_v11 = vpop.f32.mrb[40].mxu1  ;;  %v712_v13 = vpop.f32.mrb[41].mxu0 }
 0x18f   :  { %v759_v14 = vadd.f32 %v758_v11, %v1618_v27  ;;  %v713_v18 = vadd.f32 %v712_v13, %v1623_v32  ;;  %v760_v19 = vpop.f32.mrb[41].mxu1 }
 0x190   :  { %809 = vst [vmem:[%s1769_s3 + $0xe0] sm:$0xff] %v711_v9  ;;  %v761_v20 = vadd.f32 %v760_v19, %v1623_v32 }
 0x191   :  { %857 = vst [vmem:[%s1769_s3 + $0x260] sm:$0xff] %v759_v14  ;;  %810 = vst [vmem:[%s1769_s3 + $0xe8] sm:$0xff] %v713_v18  ;;  %v716_v23 = vpop.f32.mrb[42].mxu0 }
 0x192   :  { %858 = vst [vmem:[%s1769_s3 + $0x268] sm:$0xff] %v761_v20  ;;  %v717_v24 = vadd.f32 %v716_v23, %v1618_v27  ;;  %v764_v26 = vpop.f32.mrb[42].mxu1  ;;  %v718_v16 = vpop.f32.mrb[43].mxu0 }
 0x193   :  { %v765_v12 = vadd.f32 %v764_v26, %v1618_v27  ;;  %v719_v21 = vadd.f32 %v718_v16, %v1623_v32  ;;  %v766_v25 = vpop.f32.mrb[43].mxu1 }
 0x194   :  { %815 = vst [vmem:[%s1769_s3 + $0x110] sm:$0xff] %v717_v24  ;;  %v767_v29 = vadd.f32 %v766_v25, %v1623_v32 }
 0x195   :  { %863 = vst [vmem:[%s1769_s3 + $0x290] sm:$0xff] %v765_v12  ;;  %816 = vst [vmem:[%s1769_s3 + $0x118] sm:$0xff] %v719_v21  ;;  %v722_v49 = vpop.f32.mrb[44].mxu0 }
 0x196   :  { %864 = vst [vmem:[%s1769_s3 + $0x298] sm:$0xff] %v767_v29  ;;  %v723_v53 = vadd.f32 %v722_v49, %v1618_v27  ;;  %v770_v57 = vpop.f32.mrb[44].mxu1  ;;  %v724_v61 = vpop.f32.mrb[45].mxu0 }
 0x197   :  { %v771_v1 = vadd.f32 %v770_v57, %v1618_v27  ;;  %v725_v5 = vadd.f32 %v724_v61, %v1623_v32  ;;  %v772_v10 = vpop.f32.mrb[45].mxu1 }
 0x198   :  { %821 = vst [vmem:[%s1769_s3 + $0x140] sm:$0xff] %v723_v53  ;;  %v773_v8 = vadd.f32 %v772_v10, %v1623_v32 }
 0x199   :  { %869 = vst [vmem:[%s1769_s3 + $0x2c0] sm:$0xff] %v771_v1  ;;  %822 = vst [vmem:[%s1769_s3 + $0x148] sm:$0xff] %v725_v5  ;;  %v728_v15 = vpop.f32.mrb[46].mxu0 }
 0x19a   :  { %870 = vst [vmem:[%s1769_s3 + $0x2c8] sm:$0xff] %v773_v8  ;;  %v729_v22 = vadd.f32 %v728_v15, %v1618_v27  ;;  %v776_v28 = vpop.f32.mrb[46].mxu1  ;;  %v730_v30 = vpop.f32.mrb[47].mxu0 }
 0x19b   :  { %v777_v31 = vadd.f32 %v776_v28, %v1618_v27  ;;  %v731_v34 = vadd.f32 %v730_v30, %v1623_v32  ;;  %v778_v33 = vpop.f32.mrb[47].mxu1 }
 0x19c   :  { %827 = vst [vmem:[%s1769_s3 + $0x170] sm:$0xff] %v729_v22  ;;  %v779_v17 = vadd.f32 %v778_v33, %v1623_v32 }
 0x19d   :  { %875 = vst [vmem:[%s1769_s3 + $0x2f0] sm:$0xff] %v777_v31  ;;  %828 = vst [vmem:[%s1769_s3 + $0x178] sm:$0xff] %v731_v34 }
 0x19e   :  { %876 = vst [vmem:[%s1769_s3 + $0x2f8] sm:$0xff] %v779_v17 }
 0x19f   :  { %881 = vsyncpa [#allocation3], 1 }
 0x1a0   :  { %882 = vsyncpa [#allocation5], 1 }

// kernel: clip_attention_forward.4
= control target key start
LH: loop header
LB: loop body
LE: loop exit
PB: predicated region body
PF: predicated region fallthrough
CT: control target
= control target key end

     0   :  { %s6507_s6 = smov 0   ;;  %s6509_s7 = smov 0   ;;  %s8793_s0 = inlined_call_operand.vmem [shape: f32[2,64,3,256], index: 0, kind: input, shape index: {}]   ;;  %s8794_s1 = inlined_call_operand.vmem [shape: f32[2,64,256], index: 1, kind: output, shape index: {}]  }
   0x1   :  { %s6511_s8 = smov 0   ;;  %s6513_s9 = smov 0  }
   0x2   :  { %s6515_s10 = smov 0   ;;  %s6517_s11 = smov 0  }
   0x3   :  { %s6519_s12 = smov 0  }
   0x4 LB: > { %s20_s13 = sadd.s32 1, %s6483_s10  ;;  %s23_s14 = sadd.s32 1, %s6487_s11  ;;  %s6491_s12 = sphi %s6519_s12, %s11_s12   ;;  %s6487_s11 = sphi %s6517_s11, %s8980_s11   ;;  %s6483_s10 = sphi %s6515_s10, %s8979_s10   ;;  %s6479_s9 = sphi %s6513_s9, %s8978_s9   ;;  %s6475_s8 = sphi %s6511_s8, %s8977_s8   ;;  %s6471_s7 = sphi %s6509_s7, %s8976_s7   ;;  %s6467_s6 = sphi %s6507_s6, %s8975_s6  }
   0x5   : > { %p21_p0 = scmp.ge.s32.totalorder %s20_s13, 2  ;;  %s5978_s15 = sadd.s32 4294967295, %s6491_s12  }
   0x6   : > { %p39_p1 = scmp.ne.s32.totalorder %s6471_s7, %s6467_s6  ;;  %p40_p2 = scmp.eq.s32.totalorder %s6491_s12, 0 }
   0x7   : > { %s8982_s13 = smov (%p21_p0, %s20_s13), 0  ;;  %s8984_s14 = smov (!%p21_p0, %s23_s14), %s6487_s11 }
   0x8   : > { %p25_p3 = scmp.ge.s32.totalorder %s8984_s14, 2  ;;  %p71_p4 = scmp.eq.s32.totalorder %s5978_s15, 3 }
   0x9   : > { %s28_s16 = ssub.s32 %s6483_s10, %s8982_s13  ;;  %p41_p5 = por %p40_p2, %p39_p1 }
   0xa   : > { %s8986_s14 = smov (%p25_p3, %s8984_s14), 0  ;;  %p6555_p6 = por %p71_p4, %p39_p1 }
   0xb   : > { %s27_s18 = ssub.s32 %s6487_s11, %s8986_s14  ;;  %s32_s20 = sadd.s32 1, %s6471_s7 }
   0xc   : > { %s29_s19 = sor.u32 %s28_s16, %s27_s18  ;;  %p5981_p8 = scmp.ge.s32.totalorder %s6491_s12, 4 }
   0xd   : > { %p30_p7 = scmp.eq.s32.totalorder %s29_s19, 0 }
   0xe   : > { %93 = sbr.rel (%p5981_p8) target bundleno = 69 (0x45), region = 16 }
   0xf   : > { %s6563_s21 = scalar_select %p30_p7, %s6471_s7, %s32_s20  }
  0x15   : > { %96 = sbr.rel (!%p41_p5) target bundleno = 69 (0x45), region = 20  ;;  %s98_s22 = sand.u32 (%p41_p5), 1, %s6471_s7  }
  0x16   : > { %s5983_s23 = sshll.u32 (%p41_p5), %s6487_s11, 7  ;;  %s5982_s24 = sshll.u32 (%p41_p5), %s98_s22, 8 }
  0x17   : > { %s102_s25 = sadd.s32 (%p41_p5), %s6483_s10, %s5983_s23  ;;  %s6577_s30 = scalar_lea.vmem (%p41_p5), [#allocation2], %s5982_s24 }
  0x18   : > { %s5984_s26 = sshll.u32 (%p41_p5), %s102_s25, 2 }
  0x19   : > { %s6572_s29 = scalar_lea.vmem (%p41_p5), %s8793_s0, %s5984_s26 }
  0x1a   : > { %v120_v0 = vld [vmem:[%s6572_s29] sm:$0xf] (%p41_p5)  ;;  %v122_v1 = vld [vmem:[%s6572_s29 + $0x8] sm:$0xf] (%p41_p5)  ;;  %v124_v2 = vld [vmem:[%s6572_s29 + $0x10] sm:$0xf] (%p41_p5) }
  0x1b   : > { %121 = vst [vmem:[%s6577_s30] sm:$0xf] (%p41_p5), %v120_v0  ;;  %123 = vst [vmem:[%s6577_s30 + $0x4] sm:$0xf] (%p41_p5), %v122_v1  ;;  %v126_v3 = vld [vmem:[%s6572_s29 + $0x18] sm:$0xf] (%p41_p5) }
  0x1c   : > { %125 = vst [vmem:[%s6577_s30 + $0x8] sm:$0xf] %v124_v2  ;;  %v128_v4 = vld [vmem:[%s6572_s29 + $0x20] sm:$0xf]  ;;  %v130_v5 = vld [vmem:[%s6572_s29 + $0x28] sm:$0xf] }
  0x1d   : > { %127 = vst [vmem:[%s6577_s30 + $0xc] sm:$0xf] %v126_v3  ;;  %129 = vst [vmem:[%s6577_s30 + $0x10] sm:$0xf] %v128_v4  ;;  %v132_v6 = vld [vmem:[%s6572_s29 + $0x30] sm:$0xf] }
  0x1e   : > { %131 = vst [vmem:[%s6577_s30 + $0x14] sm:$0xf] %v130_v5  ;;  %v134_v7 = vld [vmem:[%s6572_s29 + $0x38] sm:$0xf]  ;;  %v136_v8 = vld [vmem:[%s6572_s29 + $0x40] sm:$0xf] }
  0x1f   : > { %133 = vst [vmem:[%s6577_s30 + $0x18] sm:$0xf] %v132_v6  ;;  %135 = vst [vmem:[%s6577_s30 + $0x1c] sm:$0xf] %v134_v7  ;;  %v138_v9 = vld [vmem:[%s6572_s29 + $0x48] sm:$0xf] }
  0x20   : > { %137 = vst [vmem:[%s6577_s30 + $0x20] sm:$0xf] %v136_v8  ;;  %v140_v10 = vld [vmem:[%s6572_s29 + $0x50] sm:$0xf]  ;;  %v142_v11 = vld [vmem:[%s6572_s29 + $0x58] sm:$0xf] }
  0x21   : > { %139 = vst [vmem:[%s6577_s30 + $0x24] sm:$0xf] %v138_v9  ;;  %141 = vst [vmem:[%s6577_s30 + $0x28] sm:$0xf] %v140_v10  ;;  %v144_v12 = vld [vmem:[%s6572_s29 + $0x60] sm:$0xf] }
  0x22   : > { %143 = vst [vmem:[%s6577_s30 + $0x2c] sm:$0xf] %v142_v11  ;;  %v146_v13 = vld [vmem:[%s6572_s29 + $0x68] sm:$0xf]  ;;  %v148_v14 = vld [vmem:[%s6572_s29 + $0x70] sm:$0xf] }
  0x23   : > { %145 = vst [vmem:[%s6577_s30 + $0x30] sm:$0xf] %v144_v12  ;;  %147 = vst [vmem:[%s6577_s30 + $0x34] sm:$0xf] %v146_v13  ;;  %v150_v15 = vld [vmem:[%s6572_s29 + $0x78] sm:$0xf] }
  0x24   : > { %149 = vst [vmem:[%s6577_s30 + $0x38] sm:$0xf] %v148_v14  ;;  %v152_v16 = vld [vmem:[%s6572_s29 + $0x80] sm:$0xf]  ;;  %v154_v17 = vld [vmem:[%s6572_s29 + $0x88] sm:$0xf] }
  0x25   : > { %151 = vst [vmem:[%s6577_s30 + $0x3c] sm:$0xf] %v150_v15  ;;  %153 = vst [vmem:[%s6577_s30 + $0x40] sm:$0xf] %v152_v16  ;;  %v156_v18 = vld [vmem:[%s6572_s29 + $0x90] sm:$0xf] }
  0x26   : > { %155 = vst [vmem:[%s6577_s30 + $0x44] sm:$0xf] %v154_v17  ;;  %v158_v19 = vld [vmem:[%s6572_s29 + $0x98] sm:$0xf]  ;;  %v160_v20 = vld [vmem:[%s6572_s29 + $0xa0] sm:$0xf] }
  0x27   : > { %157 = vst [vmem:[%s6577_s30 + $0x48] sm:$0xf] %v156_v18  ;;  %159 = vst [vmem:[%s6577_s30 + $0x4c] sm:$0xf] %v158_v19  ;;  %v162_v21 = vld [vmem:[%s6572_s29 + $0xa8] sm:$0xf] }
  0x28   : > { %161 = vst [vmem:[%s6577_s30 + $0x50] sm:$0xf] %v160_v20  ;;  %v164_v22 = vld [vmem:[%s6572_s29 + $0xb0] sm:$0xf]  ;;  %v166_v23 = vld [vmem:[%s6572_s29 + $0xb8] sm:$0xf] }
  0x29   : > { %163 = vst [vmem:[%s6577_s30 + $0x54] sm:$0xf] %v162_v21  ;;  %165 = vst [vmem:[%s6577_s30 + $0x58] sm:$0xf] %v164_v22  ;;  %v168_v24 = vld [vmem:[%s6572_s29 + $0xc0] sm:$0xf] }
  0x2a   : > { %167 = vst [vmem:[%s6577_s30 + $0x5c] sm:$0xf] %v166_v23  ;;  %v170_v25 = vld [vmem:[%s6572_s29 + $0xc8] sm:$0xf]  ;;  %v172_v26 = vld [vmem:[%s6572_s29 + $0xd0] sm:$0xf] }
  0x2b   : > { %169 = vst [vmem:[%s6577_s30 + $0x60] sm:$0xf] %v168_v24  ;;  %171 = vst [vmem:[%s6577_s30 + $0x64] sm:$0xf] %v170_v25  ;;  %v174_v27 = vld [vmem:[%s6572_s29 + $0xd8] sm:$0xf] }
  0x2c   : > { %173 = vst [vmem:[%s6577_s30 + $0x68] sm:$0xf] %v172_v26  ;;  %v176_v28 = vld [vmem:[%s6572_s29 + $0xe0] sm:$0xf]  ;;  %v178_v29 = vld [vmem:[%s6572_s29 + $0xe8] sm:$0xf] }
  0x2d   : > { %175 = vst [vmem:[%s6577_s30 + $0x6c] sm:$0xf] %v174_v27  ;;  %177 = vst [vmem:[%s6577_s30 + $0x70] sm:$0xf] %v176_v28  ;;  %v180_v30 = vld [vmem:[%s6572_s29 + $0xf0] sm:$0xf] }
  0x2e   : > { %179 = vst [vmem:[%s6577_s30 + $0x74] sm:$0xf] %v178_v29  ;;  %v182_v31 = vld [vmem:[%s6572_s29 + $0xf8] sm:$0xf]  ;;  %v184_v32 = vld [vmem:[%s6572_s29 + $0x100] sm:$0xf] }
  0x2f   : > { %181 = vst [vmem:[%s6577_s30 + $0x78] sm:$0xf] %v180_v30  ;;  %183 = vst [vmem:[%s6577_s30 + $0x7c] sm:$0xf] %v182_v31  ;;  %v186_v33 = vld [vmem:[%s6572_s29 + $0x108] sm:$0xf] }
  0x30   : > { %185 = vst [vmem:[%s6577_s30 + $0x80] sm:$0xf] %v184_v32  ;;  %v188_v34 = vld [vmem:[%s6572_s29 + $0x110] sm:$0xf]  ;;  %v190_v35 = vld [vmem:[%s6572_s29 + $0x118] sm:$0xf] }
  0x31   : > { %187 = vst [vmem:[%s6577_s30 + $0x84] sm:$0xf] %v186_v33  ;;  %189 = vst [vmem:[%s6577_s30 + $0x88] sm:$0xf] %v188_v34  ;;  %v192_v36 = vld [vmem:[%s6572_s29 + $0x120] sm:$0xf] }
  0x32   : > { %191 = vst [vmem:[%s6577_s30 + $0x8c] sm:$0xf] %v190_v35  ;;  %v194_v37 = vld [vmem:[%s6572_s29 + $0x128] sm:$0xf]  ;;  %v196_v38 = vld [vmem:[%s6572_s29 + $0x130] sm:$0xf] }
  0x33   : > { %193 = vst [vmem:[%s6577_s30 + $0x90] sm:$0xf] %v192_v36  ;;  %195 = vst [vmem:[%s6577_s30 + $0x94] sm:$0xf] %v194_v37  ;;  %v198_v39 = vld [vmem:[%s6572_s29 + $0x138] sm:$0xf] }
  0x34   : > { %197 = vst [vmem:[%s6577_s30 + $0x98] sm:$0xf] %v196_v38  ;;  %v200_v40 = vld [vmem:[%s6572_s29 + $0x140] sm:$0xf]  ;;  %v202_v41 = vld [vmem:[%s6572_s29 + $0x148] sm:$0xf] }
  0x35   : > { %199 = vst [vmem:[%s6577_s30 + $0x9c] sm:$0xf] %v198_v39  ;;  %201 = vst [vmem:[%s6577_s30 + $0xa0] sm:$0xf] %v200_v40  ;;  %v204_v42 = vld [vmem:[%s6572_s29 + $0x150] sm:$0xf] }
  0x36   : > { %203 = vst [vmem:[%s6577_s30 + $0xa4] sm:$0xf] %v202_v41  ;;  %v206_v43 = vld [vmem:[%s6572_s29 + $0x158] sm:$0xf]  ;;  %v208_v44 = vld [vmem:[%s6572_s29 + $0x160] sm:$0xf] }
  0x37   : > { %205 = vst [vmem:[%s6577_s30 + $0xa8] sm:$0xf] %v204_v42  ;;  %207 = vst [vmem:[%s6577_s30 + $0xac] sm:$0xf] %v206_v43  ;;  %v210_v45 = vld [vmem:[%s6572_s29 + $0x168] sm:$0xf] }
  0x38   : > { %209 = vst [vmem:[%s6577_s30 + $0xb0] sm:$0xf] %v208_v44  ;;  %v212_v46 = vld [vmem:[%s6572_s29 + $0x170] sm:$0xf]  ;;  %v214_v47 = vld [vmem:[%s6572_s29 + $0x178] sm:$0xf] }
  0x39   : > { %211 = vst [vmem:[%s6577_s30 + $0xb4] sm:$0xf] %v210_v45  ;;  %213 = vst [vmem:[%s6577_s30 + $0xb8] sm:$0xf] %v212_v46  ;;  %v216_v48 = vld [vmem:[%s6572_s29 + $0x180] sm:$0xf] }
  0x3a   : > { %215 = vst [vmem:[%s6577_s30 + $0xbc] sm:$0xf] %v214_v47  ;;  %v218_v49 = vld [vmem:[%s6572_s29 + $0x188] sm:$0xf]  ;;  %v220_v50 = vld [vmem:[%s6572_s29 + $0x190] sm:$0xf] }
  0x3b   : > { %217 = vst [vmem:[%s6577_s30 + $0xc0] sm:$0xf] %v216_v48  ;;  %219 = vst [vmem:[%s6577_s30 + $0xc4] sm:$0xf] %v218_v49  ;;  %v222_v51 = vld [vmem:[%s6572_s29 + $0x198] sm:$0xf] }
  0x3c   : > { %221 = vst [vmem:[%s6577_s30 + $0xc8] sm:$0xf] %v220_v50  ;;  %v224_v52 = vld [vmem:[%s6572_s29 + $0x1a0] sm:$0xf]  ;;  %v226_v53 = vld [vmem:[%s6572_s29 + $0x1a8] sm:$0xf] }
  0x3d   : > { %223 = vst [vmem:[%s6577_s30 + $0xcc] sm:$0xf] %v222_v51  ;;  %225 = vst [vmem:[%s6577_s30 + $0xd0] sm:$0xf] %v224_v52  ;;  %v228_v54 = vld [vmem:[%s6572_s29 + $0x1b0] sm:$0xf] }
  0x3e   : > { %227 = vst [vmem:[%s6577_s30 + $0xd4] sm:$0xf] %v226_v53  ;;  %v230_v55 = vld [vmem:[%s6572_s29 + $0x1b8] sm:$0xf]  ;;  %v232_v56 = vld [vmem:[%s6572_s29 + $0x1c0] sm:$0xf] }
  0x3f   : > { %229 = vst [vmem:[%s6577_s30 + $0xd8] sm:$0xf] %v228_v54  ;;  %231 = vst [vmem:[%s6577_s30 + $0xdc] sm:$0xf] %v230_v55  ;;  %v234_v57 = vld [vmem:[%s6572_s29 + $0x1c8] sm:$0xf] }
  0x40   : > { %233 = vst [vmem:[%s6577_s30 + $0xe0] sm:$0xf] %v232_v56  ;;  %v236_v58 = vld [vmem:[%s6572_s29 + $0x1d0] sm:$0xf]  ;;  %v238_v59 = vld [vmem:[%s6572_s29 + $0x1d8] sm:$0xf] }
  0x41   : > { %235 = vst [vmem:[%s6577_s30 + $0xe4] sm:$0xf] %v234_v57  ;;  %237 = vst [vmem:[%s6577_s30 + $0xe8] sm:$0xf] %v236_v58  ;;  %v240_v60 = vld [vmem:[%s6572_s29 + $0x1e0] sm:$0xf] }
  0x42   : > { %239 = vst [vmem:[%s6577_s30 + $0xec] sm:$0xf] %v238_v59  ;;  %v242_v61 = vld [vmem:[%s6572_s29 + $0x1e8] sm:$0xf]  ;;  %v244_v62 = vld [vmem:[%s6572_s29 + $0x1f0] sm:$0xf] }
  0x43   : > { %241 = vst [vmem:[%s6577_s30 + $0xf0] sm:$0xf] %v240_v60  ;;  %243 = vst [vmem:[%s6577_s30 + $0xf4] sm:$0xf] %v242_v61  ;;  %v246_v63 = vld [vmem:[%s6572_s29 + $0x1f8] sm:$0xf] }
  0x44   : > { %245 = vst [vmem:[%s6577_s30 + $0xf8] sm:$0xf] %v244_v62  ;;  %247 = vst [vmem:[%s6577_s30 + $0xfc] sm:$0xf] %v246_v63 }
  0x45 PF: > { %p5985_p9 = scmp.ge.s32.totalorder %s6491_s12, 1  ;;  %p397_p10 = scmp.lt.s32.totalorder %s6491_s12, 5 }
  0x47   : > { %p398_p11 = pnand %p5985_p9, %p397_p10 }
  0x49   : > { %401 = sbr.rel (%p398_p11) target bundleno = 1309 (0x51d), region = 61 }
  0x50   : > { %s404_s2 = sand.u32 1, %s6467_s6   ;;  %s6493_s5 = smov 64   ;;  %vm4118_vm0 = vcmask 523264  }
  0x51   : > { %s5986_s3 = sshll.u32 %s404_s2, 8  ;;  %vm7171_vm1 = vmpackc.low %vm4118_vm0, %vm4118_vm0  ;;  %s5987_s15 = sshll.u32 %s404_s2, 6 }
  0x52   : > { %s6709_s4 = scalar_lea.vmem [#allocation2], %s5986_s3  ;;  %s8725_s16 = scalar_lea.vmem [#allocation3], %s5987_s15 }
  0x53   : > { %v6712_v0 = vld [vmem:[%s6709_s4 + $0x9] sm:$0x1]  ;;  %v6715_v1 = vld [vmem:[%s6709_s4 + $0x1] sm:$0x1]  ;;  %v6722_v2 = vld [vmem:[%s6709_s4 + $0xd] sm:$0x1] }
  0x54   : > { %1786 = vrot.lane.b32.xlu1 %v6712_v0, %s6493_s5  ;;  %1782 = vrot.lane.b32.xlu0 %v6715_v1, %s6493_s5  ;;  %v6725_v3 = vld [vmem:[%s6709_s4 + $0x5] sm:$0x1]  ;;  %v6732_v4 = vld [vmem:[%s6709_s4 + $0x15] sm:$0x1]  ;;  %s6053_s6 = sshll.u32 (%p6555_p6), %s6479_s9, 4 }
  0x55   : > { %v6735_v5 = vld [vmem:[%s6709_s4 + $0x11] sm:$0x1]  ;;  %v6742_v6 = vld [vmem:[%s6709_s4 + $0x1d] sm:$0x1]  ;;  %v6745_v7 = vld [vmem:[%s6709_s4 + $0x19] sm:$0x1]  ;;  %s5843_s18 = sadd.s32 (%p6555_p6), %s6475_s8, %s6053_s6 }
  0x56   : > { %v6752_v8 = vld [vmem:[%s6709_s4 + $0x25] sm:$0x1]  ;;  %v6755_v9 = vld [vmem:[%s6709_s4 + $0x21] sm:$0x1]  ;;  %v6762_v10 = vld [vmem:[%s6709_s4 + $0x2d] sm:$0x1] }
  0x57   : > { %v6765_v11 = vld [vmem:[%s6709_s4 + $0x29] sm:$0x1]  ;;  %v6772_v12 = vld [vmem:[%s6709_s4 + $0x35] sm:$0x1]  ;;  %v6775_v13 = vld [vmem:[%s6709_s4 + $0x31] sm:$0x1] }
  0x58   : > { %1788 = vrot.lane.b32.xlu1 %v6722_v2, %s6493_s5  ;;  %1784 = vrot.lane.b32.xlu0 %v6725_v3, %s6493_s5  ;;  %v6782_v14 = vld [vmem:[%s6709_s4 + $0x3d] sm:$0x1]  ;;  %v6785_v15 = vld [vmem:[%s6709_s4 + $0x39] sm:$0x1]  ;;  %s6054_s17 = sshll.u32 (%p6555_p6), %s5843_s18, 3 }
  0x59   : > { %v6792_v16 = vld [vmem:[%s6709_s4 + $0x45] sm:$0x1]  ;;  %v6795_v17 = vld [vmem:[%s6709_s4 + $0x41] sm:$0x1]  ;;  %v6802_v18 = vld [vmem:[%s6709_s4 + $0x4d] sm:$0x1]  ;;  %s5845_s22 = scalar_lea.vmem (%p6555_p6), %s8794_s1, %s6054_s17 }
  0x5a   : > { %v6805_v19 = vld [vmem:[%s6709_s4 + $0x49] sm:$0x1]  ;;  %v6812_v20 = vld [vmem:[%s6709_s4 + $0x55] sm:$0x1]  ;;  %v6815_v21 = vld [vmem:[%s6709_s4 + $0x51] sm:$0x1] }
  0x5b   : > { %v6822_v22 = vld [vmem:[%s6709_s4 + $0x5d] sm:$0x1]  ;;  %v6825_v23 = vld [vmem:[%s6709_s4 + $0x59] sm:$0x1]  ;;  %v6832_v24 = vld [vmem:[%s6709_s4 + $0x65] sm:$0x1] }
  0x5c   : > { %1792 = vrot.lane.b32.xlu1 %v6732_v4, %s6493_s5  ;;  %1790 = vrot.lane.b32.xlu0 %v6735_v5, %s6493_s5  ;;  %v6835_v25 = vld [vmem:[%s6709_s4 + $0x61] sm:$0x1]  ;;  %v6842_v26 = vld [vmem:[%s6709_s4 + $0x6d] sm:$0x1] }
  0x5d   : > { %v6845_v27 = vld [vmem:[%s6709_s4 + $0x69] sm:$0x1]  ;;  %v6852_v28 = vld [vmem:[%s6709_s4 + $0x75] sm:$0x1]  ;;  %v6855_v29 = vld [vmem:[%s6709_s4 + $0x71] sm:$0x1] }
  0x5e   : > { %v6862_v30 = vld [vmem:[%s6709_s4 + $0x7d] sm:$0x1]  ;;  %v6865_v31 = vld [vmem:[%s6709_s4 + $0x79] sm:$0x1]  ;;  %v6872_v32 = vld [vmem:[%s6709_s4 + $0x85] sm:$0x1] }
  0x5f   : > { %v6875_v33 = vld [vmem:[%s6709_s4 + $0x81] sm:$0x1]  ;;  %v6882_v34 = vld [vmem:[%s6709_s4 + $0x8d] sm:$0x1]  ;;  %v6885_v35 = vld [vmem:[%s6709_s4 + $0x89] sm:$0x1] }
  0x60   : > { %1796 = vrot.lane.b32.xlu1 %v6742_v6, %s6493_s5  ;;  %1794 = vrot.lane.b32.xlu0 %v6745_v7, %s6493_s5  ;;  %v6892_v36 = vld [vmem:[%s6709_s4 + $0x95] sm:$0x1]  ;;  %v6895_v37 = vld [vmem:[%s6709_s4 + $0x91] sm:$0x1] }
  0x61   : > { %v6902_v38 = vld [vmem:[%s6709_s4 + $0x9d] sm:$0x1]  ;;  %v6905_v39 = vld [vmem:[%s6709_s4 + $0x99] sm:$0x1]  ;;  %v6912_v40 = vld [vmem:[%s6709_s4 + $0xa5] sm:$0x1] }
  0x62   : > { %8854 = vst [vmem:[#allocation4_spill] sm:$0xff] %v6912_v40  ;;  %v6915_v41 = vld [vmem:[%s6709_s4 + $0xa1] sm:$0x1]  ;;  %v6922_v42 = vld [vmem:[%s6709_s4 + $0xad] sm:$0x1] }
  0x63   : > { %8855 = vst [vmem:[#allocation5_spill] sm:$0xff] %v6915_v41  ;;  %v6925_v43 = vld [vmem:[%s6709_s4 + $0xa9] sm:$0x1]  ;;  %v6932_v44 = vld [vmem:[%s6709_s4 + $0xb5] sm:$0x1] }
  0x64   : > { %1800 = vrot.lane.b32.xlu1 %v6752_v8, %s6493_s5  ;;  %1798 = vrot.lane.b32.xlu0 %v6755_v9, %s6493_s5  ;;  %8856 = vst [vmem:[#allocation6_spill] sm:$0xff] %v6932_v44  ;;  %v6935_v45 = vld [vmem:[%s6709_s4 + $0xb1] sm:$0x1]  ;;  %v6942_v46 = vld [vmem:[%s6709_s4 + $0xbd] sm:$0x1] }
  0x65   : > { %8857 = vst [vmem:[#allocation7_spill] sm:$0xff] %v6935_v45  ;;  %8858 = vst [vmem:[#allocation8_spill] sm:$0xff] %v6942_v46  ;;  %v6945_v47 = vld [vmem:[%s6709_s4 + $0xb9] sm:$0x1]  ;;  %v6952_v48 = vld [vmem:[%s6709_s4 + $0xc5] sm:$0x1] }
  0x66   : > { %8859 = vst [vmem:[#allocation9_spill] sm:$0xff] %v6945_v47  ;;  %8860 = vst [vmem:[#allocation10_spill] sm:$0xff] %v6952_v48  ;;  %v6955_v49 = vld [vmem:[%s6709_s4 + $0xc1] sm:$0x1]  ;;  %v6962_v50 = vld [vmem:[%s6709_s4 + $0xcd] sm:$0x1] }
  0x67   : > { %8861 = vst [vmem:[#allocation11_spill] sm:$0xff] %v6955_v49  ;;  %8862 = vst [vmem:[#allocation12_spill] sm:$0xff] %v6962_v50  ;;  %v6965_v51 = vld [vmem:[%s6709_s4 + $0xc9] sm:$0x1]  ;;  %v6972_v52 = vld [vmem:[%s6709_s4 + $0xd5] sm:$0x1] }
  0x68   : > { %1804 = vrot.lane.b32.xlu1 %v6762_v10, %s6493_s5  ;;  %1802 = vrot.lane.b32.xlu0 %v6765_v11, %s6493_s5  ;;  %8863 = vst [vmem:[#allocation13_spill] sm:$0xff] %v6965_v51  ;;  %8864 = vst [vmem:[#allocation14_spill] sm:$0xff] %v6972_v52  ;;  %v6975_v53 = vld [vmem:[%s6709_s4 + $0xd1] sm:$0x1]  ;;  %v6982_v54 = vld [vmem:[%s6709_s4 + $0xdd] sm:$0x1] }
  0x69   : > { %8865 = vst [vmem:[#allocation15_spill] sm:$0xff] %v6975_v53  ;;  %8866 = vst [vmem:[#allocation16_spill] sm:$0xff] %v6982_v54  ;;  %v6985_v55 = vld [vmem:[%s6709_s4 + $0xd9] sm:$0x1]  ;;  %v6992_v56 = vld [vmem:[%s6709_s4 + $0xe5] sm:$0x1] }
  0x6a   : > { %8867 = vst [vmem:[#allocation17_spill] sm:$0xff] %v6985_v55  ;;  %8868 = vst [vmem:[#allocation18_spill] sm:$0xff] %v6992_v56  ;;  %v6995_v57 = vld [vmem:[%s6709_s4 + $0xe1] sm:$0x1]  ;;  %v7002_v58 = vld [vmem:[%s6709_s4 + $0xed] sm:$0x1] }
  0x6b   : > { %8869 = vst [vmem:[#allocation19_spill] sm:$0xff] %v6995_v57  ;;  %8870 = vst [vmem:[#allocation20_spill] sm:$0xff] %v7002_v58  ;;  %v7005_v59 = vld [vmem:[%s6709_s4 + $0xe9] sm:$0x1]  ;;  %v7016_v62 = vld [vmem:[%s6709_s4 + $0xf5] sm:$0x1] }
  0x6c   : > { %1808 = vrot.lane.b32.xlu1 %v6772_v12, %s6493_s5  ;;  %1806 = vrot.lane.b32.xlu0 %v6775_v13, %s6493_s5  ;;  %8871 = vst [vmem:[#allocation21_spill] sm:$0xff] %v7005_v59  ;;  %8872 = vst [vmem:[#allocation22_spill] sm:$0xff] %v7016_v62  ;;  %v7019_v63 = vld [vmem:[%s6709_s4 + $0xf1] sm:$0x1] }
  0x6d   : > { %8873 = vst [vmem:[#allocation23_spill] sm:$0xff] %v7019_v63 }
  0x70   : > { %1812 = vrot.lane.b32.xlu1 %v6782_v14, %s6493_s5  ;;  %1810 = vrot.lane.b32.xlu0 %v6785_v15, %s6493_s5 }
  0x74   : > { %1816 = vrot.lane.b32.xlu1 %v6792_v16, %s6493_s5  ;;  %1814 = vrot.lane.b32.xlu0 %v6795_v17, %s6493_s5 }
  0x78   : > { %1820 = vrot.lane.b32.xlu1 %v6802_v18, %s6493_s5  ;;  %1818 = vrot.lane.b32.xlu0 %v6805_v19, %s6493_s5 }
  0x7c   : > { %1824 = vrot.lane.b32.xlu1 %v6812_v20, %s6493_s5  ;;  %1822 = vrot.lane.b32.xlu0 %v6815_v21, %s6493_s5 }
  0x80   : > { %1828 = vrot.lane.b32.xlu1 %v6822_v22, %s6493_s5  ;;  %1826 = vrot.lane.b32.xlu0 %v6825_v23, %s6493_s5 }
  0x84   : > { %1832 = vrot.lane.b32.xlu1 %v6832_v24, %s6493_s5  ;;  %1830 = vrot.lane.b32.xlu0 %v6835_v25, %s6493_s5 }
  0x88   : > { %1836 = vrot.lane.b32.xlu1 %v6842_v26, %s6493_s5  ;;  %1834 = vrot.lane.b32.xlu0 %v6845_v27, %s6493_s5 }
  0x8c   : > { %1840 = vrot.lane.b32.xlu1 %v6852_v28, %s6493_s5  ;;  %1838 = vrot.lane.b32.xlu0 %v6855_v29, %s6493_s5 }
  0x90   : > { %1844 = vrot.lane.b32.xlu1 %v6862_v30, %s6493_s5  ;;  %1842 = vrot.lane.b32.xlu0 %v6865_v31, %s6493_s5 }
  0x94   : > { %1848 = vrot.lane.b32.xlu1 %v6872_v32, %s6493_s5  ;;  %1846 = vrot.lane.b32.xlu0 %v6875_v33, %s6493_s5 }
  0x98   : > { %1852 = vrot.lane.b32.xlu1 %v6882_v34, %s6493_s5  ;;  %1850 = vrot.lane.b32.xlu0 %v6885_v35, %s6493_s5 }
  0x9c   : > { %1856 = vrot.lane.b32.xlu1 %v6892_v36, %s6493_s5  ;;  %1854 = vrot.lane.b32.xlu0 %v6895_v37, %s6493_s5 }
  0xa0   : > { %1860 = vrot.lane.b32.xlu1 %v6902_v38, %s6493_s5  ;;  %1858 = vrot.lane.b32.xlu0 %v6905_v39, %s6493_s5 }
  0xa4   : > { %1864 = vrot.lane.b32.xlu1 %v6912_v40, %s6493_s5  ;;  %1862 = vrot.lane.b32.xlu0 %v6915_v41, %s6493_s5  ;;  %v7064_v40 = vld [vmem:[%s6709_s4 + $0x14] sm:$0x1] }
  0xa8   : > { %1868 = vrot.lane.b32.xlu1 %v6922_v42, %s6493_s5  ;;  %1866 = vrot.lane.b32.xlu0 %v6925_v43, %s6493_s5 }
  0xac   : > { %1872 = vrot.lane.b32.xlu1 %v6932_v44, %s6493_s5  ;;  %1870 = vrot.lane.b32.xlu0 %v6935_v45, %s6493_s5 }
  0xb0   : > { %1876 = vrot.lane.b32.xlu1 %v6942_v46, %s6493_s5  ;;  %1874 = vrot.lane.b32.xlu0 %v6945_v47, %s6493_s5 }
  0xb4   : > { %1880 = vrot.lane.b32.xlu1 %v6952_v48, %s6493_s5  ;;  %1878 = vrot.lane.b32.xlu0 %v6955_v49, %s6493_s5  ;;  %v7026_v49 = vld [vmem:[%s6709_s4 + $0xfd] sm:$0x1] }
  0xb5   : > { %8874 = vst [vmem:[#allocation24_spill] sm:$0xff] %v7026_v49 }
  0xb8   : > { %1884 = vrot.lane.b32.xlu1 %v6962_v50, %s6493_s5  ;;  %1882 = vrot.lane.b32.xlu0 %v6965_v51, %s6493_s5 }
  0xbc   : > { %1888 = vrot.lane.b32.xlu1 %v6972_v52, %s6493_s5  ;;  %1886 = vrot.lane.b32.xlu0 %v6975_v53, %s6493_s5  ;;  %v6494_v53 = vmov 1934713408   ;;  %v683_v52 = vlaneseq }
  0xbd   : > { %v681_v51 = vunpack.c.l.s4 %v6494_v53  ;;  %v7046_v53 = vld [vmem:[%s6709_s4 + $0xc] sm:$0x1] }
  0xbe   : > { %v684_v47 = vshrl.u32 %v683_v52, 7 }
  0xc0   : > { %1892 = vrot.lane.b32.xlu1 %v6982_v54, %s6493_s5  ;;  %1890 = vrot.lane.b32.xlu0 %v6985_v55, %s6493_s5  ;;  %v682_v54 = vunpack.c.0.s8 %v681_v51 }
  0xc2   : > { %v7054_v52 = vsub.s32 %v682_v54, %v684_v47 }
  0xc4   : > { %1896 = vrot.lane.b32.xlu1 %v6992_v56, %s6493_s5  ;;  %1894 = vrot.lane.b32.xlu0 %v6995_v57, %s6493_s5 }
  0xc6   : > { %v7007_v60 = vpop.permute.xlu1 %1786  ;;  %v7009_v61 = vpop.permute.xlu0 %1782 }
  0xc8   : > { %1900 = vrot.lane.b32.xlu1 %v7002_v58, %s6493_s5  ;;  %1898 = vrot.lane.b32.xlu0 %v7005_v59, %s6493_s5  ;;  %v7029_v58 = vld [vmem:[%s6709_s4 + $0xf9] sm:$0x1] }
  0xc9   : > { %8875 = vst [vmem:[#allocation25_spill] sm:$0xff] %v7029_v58 }
  0xca   : > { %v1789_v57 = vpop.permute.xlu1 %1788  ;;  %v1785_v56 = vpop.permute.xlu0 %1784 }
  0xcc   : > { %1904 = vrot.lane.b32.xlu1 %v7016_v62, %s6493_s5  ;;  %1902 = vrot.lane.b32.xlu0 %v7019_v63, %s6493_s5  ;;  %v7036_v62 = vld [vmem:[%s6709_s4 + $0x4] sm:$0x1]  ;;  %v7039_v63 = vld [vmem:[%s6709_s4] sm:$0x1] }
  0xcd   : > { %8876 = vst [vmem:[#allocation26_spill] sm:$0xff] %v7036_v62  ;;  %8877 = vst [vmem:[#allocation27_spill] sm:$0xff] %v7039_v63 }
  0xce   : > { %v1793_v59 = vpop.permute.xlu1 %1792  ;;  %v1791_v48 = vpop.permute.xlu0 %1790 }
  0xd0   : > { %1908 = vrot.lane.b32.xlu1 %v7026_v49, %s6493_s5  ;;  %1906 = vrot.lane.b32.xlu0 %v7029_v58, %s6493_s5  ;;  %v7049_v49 = vld [vmem:[%s6709_s4 + $0x8] sm:$0x1]  ;;  %v1938_v58 = vcombine.low %v6722_v2, %v1789_v57  ;;  %v1956_v2 = vcombine.low %v6732_v4, %v1793_v59  ;;  %v1947_v57 = vcombine.low %v6735_v5, %v1791_v48 }
  0xd2   : > { %v1797_v50 = vpop.permute.xlu1 %1796  ;;  %v1795_v55 = vpop.permute.xlu0 %1794 }
  0xd3   : > { %v1974_v44 = vcombine.low %v6742_v6, %v1797_v50  ;;  %v1965_v51 = vcombine.low %v6745_v7, %v1795_v55  ;;  %v7067_v6 = vld [vmem:[%s6709_s4 + $0x10] sm:$0x1]  ;;  %v1929_v7 = vcombine.low %v6712_v0, %v7007_v60  ;;  %v1945_v50 = vrot.slane %v1938_v58, %v7054_v52 }
  0xd4   : > { %552 = vrot.lane.b32.xlu1 %v7036_v62, %s6493_s5  ;;  %550 = vrot.lane.b32.xlu0 %v7039_v63, %s6493_s5  ;;  %v1920_v62 = vcombine.low %v6725_v3, %v1785_v56  ;;  %v6495_v63 = vmov 1983009808   ;;  %v1911_v3 = vcombine.low %v6715_v1, %v7009_v61  ;;  %v1954_v60 = vrot.slane %v1947_v57, %v7054_v52 }
  0xd5   : > { %v1256_v41 = vunpack.c.l.s4 %v6495_v63  ;;  %v1981_v4 = vrot.slane %v1974_v44, %v7054_v52  ;;  %v1972_v5 = vrot.slane %v1965_v51, %v7054_v52  ;;  %v1963_v44 = vrot.slane %v1956_v2, %v7054_v52 }
  0xd6   : > { %v1801_v46 = vpop.permute.xlu1 %1800  ;;  %v1799_v45 = vpop.permute.xlu0 %1798  ;;  %v1927_v59 = vrot.slane %v1920_v62, %v7054_v52  ;;  %v1936_v61 = vrot.slane %v1929_v7, %v7054_v52 }
  0xd7   : > { %v1992_v0 = vcombine.low %v6752_v8, %v1801_v46  ;;  %v1983_v1 = vcombine.low %v6755_v9, %v1799_v45  ;;  %v1257_v58 = vunpack.c.0.s8 %v1256_v41  ;;  %v1918_v8 = vrot.slane %v1911_v3, %v7054_v52 }
  0xd8   : > { %556 = vrot.lane.b32.xlu1 %v7046_v53, %s6493_s5  ;;  %554 = vrot.lane.b32.xlu0 %v7049_v49, %s6493_s5  ;;  %v2510_v62 = vcombine.low %v1963_v44, %v1981_v4  ;;  %v2502_v63 = vcombine.low %v1954_v60, %v1972_v5  ;;  %v2494_v51 = vcombine.low %v1927_v59, %v1945_v50  ;;  %v7111_v4 = vld [vmem:[%s6709_s4 + $0x20] sm:$0x1] }
  0xd9   : > { %v1999_v2 = vrot.slane %v1992_v0, %v7054_v52  ;;  %v1990_v57 = vrot.slane %v1983_v1, %v7054_v52  ;;  %v7103_v7 = vsub.s32 %v1257_v58, %v684_v47  ;;  %v2486_v50 = vcombine.low %v1918_v8, %v1936_v61 }
  0xda   : > { %v1805_v54 = vpop.permute.xlu1 %1804  ;;  %v1803_v55 = vpop.permute.xlu0 %1802 }
  0xdb   : > { %v2010_v48 = vcombine.low %v6762_v10, %v1805_v54  ;;  %v2001_v56 = vcombine.low %v6765_v11, %v1803_v55  ;;  %v7088_v10 = vld [vmem:[%s6709_s4 + $0x1c] sm:$0x1]  ;;  %v7091_v11 = vld [vmem:[%s6709_s4 + $0x18] sm:$0x1]  ;;  %v7108_v55 = vld [vmem:[%s6709_s4 + $0x24] sm:$0x1]  ;;  %v2517_v0 = vrot.slane %v2510_v62, %v7103_v7  ;;  %v2509_v47 = vrot.slane %v2502_v63, %v7103_v7 }
  0xdc   : > { %560 = vrot.lane.b32.xlu1 %v7064_v40, %s6493_s5  ;;  %558 = vrot.lane.b32.xlu0 %v7067_v6, %s6493_s5 }
  0xdd   : > { %v2017_v9 = vrot.slane %v2010_v48, %v7054_v52  ;;  %v2008_v45 = vrot.slane %v2001_v56, %v7054_v52 }
  0xde   : > { %v1809_v46 = vpop.permute.xlu1 %1808  ;;  %v1807_v41 = vpop.permute.xlu0 %1806 }
  0xdf   : > { %v2028_v3 = vcombine.low %v6772_v12, %v1809_v46  ;;  %v2019_v54 = vcombine.low %v6775_v13, %v1807_v41  ;;  %v2544_v5 = vcombine.low %v1999_v2, %v2017_v9  ;;  %v2536_v48 = vcombine.low %v1990_v57, %v2008_v45 }
  0xe0   : > { %564 = vrot.lane.b32.xlu1 %v7088_v10, %s6493_s5  ;;  %562 = vrot.lane.b32.xlu0 %v7091_v11, %s6493_s5  ;;  %v2501_v13 = vrot.slane %v2494_v51, %v7103_v7  ;;  %v2493_v41 = vrot.slane %v2486_v50, %v7103_v7  ;;  %v2526_v51 = vcombine.low %v2509_v47, %v2517_v0  ;;  %v7157_v47 = vld [vmem:[%s6709_s4 + $0x3c] sm:$0x1] }
  0xe1   : > { %v2035_v58 = vrot.slane %v2028_v3, %v7054_v52  ;;  %v2026_v44 = vrot.slane %v2019_v54, %v7054_v52  ;;  %v2551_v8 = vrot.slane %v2544_v5, %v7103_v7  ;;  %v2543_v9 = vrot.slane %v2536_v48, %v7103_v7  ;;  %v7146_v3 = vld [vmem:[%s6709_s4 + $0x34] sm:$0x1]  ;;  %v7149_v54 = vld [vmem:[%s6709_s4 + $0x30] sm:$0x1] }
  0xe2   : > { %v1813_v56 = vpop.permute.xlu1 %1812  ;;  %v1811_v59 = vpop.permute.xlu0 %1810  ;;  %v2518_v50 = vcombine.low %v2493_v41, %v2501_v13 }
  0xe3   : > { %v2046_v1 = vcombine.low %v6782_v14, %v1813_v56  ;;  %v2037_v12 = vcombine.low %v6785_v15, %v1811_v59  ;;  %v7127_v14 = vld [vmem:[%s6709_s4 + $0x2c] sm:$0x1]  ;;  %v7130_v15 = vld [vmem:[%s6709_s4 + $0x28] sm:$0x1]  ;;  %v2568_v56 = vcombine.low %v2543_v9, %v2551_v8  ;;  %v2533_v59 = vrot.slane %v2526_v51, %v7054_v52 }
  0xe4   : > { %568 = vrot.lane.b32.xlu1 %v7108_v55, %s6493_s5  ;;  %566 = vrot.lane.b32.xlu0 %v7111_v4, %s6493_s5 }
  0xe5   : > { %v2053_v60 = vrot.slane %v2046_v1, %v7054_v52  ;;  %v2044_v61 = vrot.slane %v2037_v12, %v7054_v52  ;;  %v7160_v1 = vld [vmem:[%s6709_s4 + $0x38] sm:$0x1]  ;;  %v2525_v12 = vrot.slane %v2518_v50, %v7054_v52  ;;  %v7176_v50 = vld [vmem:[%s6709_s4 + $0x44] sm:$0x1] }
  0xe6   : > { %v7134_v45 = vpop.permute.xlu1 %1816  ;;  %v7136_v46 = vpop.permute.xlu0 %1814 }
  0xe7   : > { %v2560_v62 = vcombine.low %v2035_v58, %v2053_v60  ;;  %v2552_v63 = vcombine.low %v2026_v44, %v2044_v61  ;;  %v2575_v60 = vrot.slane %v2568_v56, %v7054_v52  ;;  %v2534_v61 = vcombine.low %v2525_v12, %v2533_v59  ;;  %v7179_v56 = vld [vmem:[%s6709_s4 + $0x40] sm:$0x1] }
  0xe8   : > { %572 = vrot.lane.b32.xlu1 %v7127_v14, %s6493_s5  ;;  %570 = vrot.lane.b32.xlu0 %v7130_v15, %s6493_s5  ;;  %v2535_v9 = vcombine.high %v2525_v12, %v2533_v59 }
  0xe9   : > { %v2567_v2 = vrot.slane %v2560_v62, %v7103_v7  ;;  %v2559_v57 = vrot.slane %v2552_v63, %v7103_v7  ;;  %v7625_v62 = vld [vmem:[%s6709_s4 + $0xa] sm:$0x1] }
  0xea   : > { %v1821_v5 = vpop.permute.xlu1 %1820  ;;  %v1819_v48 = vpop.permute.xlu0 %1818 }
  0xeb   : > { %v2576_v0 = vcombine.low %v2559_v57, %v2567_v2  ;;  %v2082_v12 = vcombine.low %v6802_v18, %v1821_v5 }
  0xec   : > { %576 = vrot.lane.b32.xlu1 %v7146_v3, %s6493_s5  ;;  %574 = vrot.lane.b32.xlu0 %v7149_v54, %s6493_s5 }
  0xed   : > { %v2583_v13 = vrot.slane %v2576_v0, %v7054_v52 }
  0xee   : > { %v1825_v58 = vpop.permute.xlu1 %1824  ;;  %v1823_v44 = vpop.permute.xlu0 %1822 }
  0xef   : > { %v2584_v8 = vcombine.low %v2575_v60, %v2583_v13  ;;  %v2585_v41 = vcombine.high %v2575_v60, %v2583_v13  ;;  %v7195_v13 = vld [vmem:[%s6709_s4 + $0x4c] sm:$0x1]  ;;  %v7198_v60 = vld [vmem:[%s6709_s4 + $0x48] sm:$0x1] }
  0xf0   : > { %580 = vrot.lane.b32.xlu1 %v7157_v47, %s6493_s5  ;;  %578 = vrot.lane.b32.xlu0 %v7160_v1, %s6493_s5 }
  0xf1   : > { %v6233_v2 = vpack.c.bf16 %v2584_v8, %v2534_v61  ;;  %v6257_v57 = vpack.c.bf16 %v2585_v41, %v2535_v9  ;;  %v2064_v9 = vcombine.low %v6792_v16, %v7134_v45  ;;  %v2073_v41 = vcombine.low %v6805_v19, %v1819_v48 }
  0xf2   : > { %v1829_v63 = vpop.permute.xlu1 %1828  ;;  %v1827_v51 = vpop.permute.xlu0 %1826 }
  0xf3   : > { %6235 = vmatprep.subr.msk.bf16.mxu0 %vm7171_vm1, %v6233_v2  ;;  %6259 = vmatprep.subr.msk.bf16.mxu1 %vm7171_vm1, %v6257_v57  ;;  %v2118_v61 = vcombine.low %v6822_v22, %v1829_v63  ;;  %v2109_v8 = vcombine.low %v6825_v23, %v1827_v51  ;;  %v2055_v22 = vcombine.low %v6795_v17, %v7136_v46 }
  0xf4   : > { %6238 = vmatpush3.bf16.xpose.msk.msra.mxu0 %vm7171_vm1, %v6233_v2  ;;  %6262 = vmatpush3.bf16.xpose.msk.msra.mxu1 %vm7171_vm1, %v6257_v57  ;;  %v2100_v2 = vcombine.low %v6812_v20, %v1825_v58  ;;  %v2091_v57 = vcombine.low %v6815_v21, %v1823_v44  ;;  %v2089_v23 = vrot.slane %v2082_v12, %v7054_v52  ;;  %v7217_v20 = vld [vmem:[%s6709_s4 + $0x54] sm:$0x1]  ;;  %v7220_v21 = vld [vmem:[%s6709_s4 + $0x50] sm:$0x1]  ;;  %v7238_v12 = vld [vmem:[%s6709_s4 + $0x5c] sm:$0x1] }
  0xf5   : > { %584 = vrot.lane.b32.xlu1 %v7176_v50, %s6493_s5  ;;  %582 = vrot.lane.b32.xlu0 %v7179_v56, %s6493_s5  ;;  %v2125_v45 = vrot.slane %v2118_v61, %v7054_v52  ;;  %v2116_v48 = vrot.slane %v2109_v8, %v7054_v52  ;;  %v2071_v46 = vrot.slane %v2064_v9, %v7054_v52  ;;  %v7241_v61 = vld [vmem:[%s6709_s4 + $0x58] sm:$0x1] }
  0xf6   : > { %v1833_v59 = vpop.permute.xlu1 %1832  ;;  %v1831_v0 = vpop.permute.xlu0 %1830  ;;  %v2098_v44 = vrot.slane %v2091_v57, %v7054_v52 }
  0xf7   : > { %v2136_v58 = vcombine.low %v6832_v24, %v1833_v59  ;;  %v2127_v17 = vcombine.low %v6835_v25, %v1831_v0  ;;  %v2062_v59 = vrot.slane %v2055_v22, %v7054_v52  ;;  %v2594_v0 = vcombine.low %v2071_v46, %v2089_v23 }
  0xf8   : > { %v2602_v9 = vcombine.low %v2098_v44, %v2116_v48 }
  0xf9   : > { %588 = vrot.lane.b32.xlu1 %v7195_v13, %s6493_s5  ;;  %586 = vrot.lane.b32.xlu0 %v7198_v60, %s6493_s5 }
  0xfa   : > { %v1837_v18 = vpop.permute.xlu1 %1836  ;;  %v1835_v5 = vpop.permute.xlu0 %1834  ;;  %v2609_v46 = vrot.slane %v2602_v9, %v7103_v7  ;;  %v7281_v9 = vld [vmem:[%s6709_s4 + $0x68] sm:$0x1] }
  0xfb   : > { %v2154_v16 = vcombine.low %v6842_v26, %v1837_v18  ;;  %v2145_v19 = vcombine.low %v6845_v27, %v1835_v5  ;;  %v2080_v26 = vrot.slane %v2073_v41, %v7054_v52  ;;  %v2107_v27 = vrot.slane %v2100_v2, %v7054_v52 }
  0xfc   : > { %v2143_v41 = vrot.slane %v2136_v58, %v7054_v52  ;;  %v2134_v2 = vrot.slane %v2127_v17, %v7054_v52  ;;  %v7254_v58 = vld [vmem:[%s6709_s4 + $0x64] sm:$0x1] }
  0xfd   : > { %v2161_v63 = vrot.slane %v2154_v16, %v7054_v52  ;;  %v2152_v51 = vrot.slane %v2145_v19, %v7054_v52  ;;  %592 = vrot.lane.b32.xlu1 %v7217_v20, %s6493_s5  ;;  %590 = vrot.lane.b32.xlu0 %v7220_v21, %s6493_s5  ;;  %v2610_v8 = vcombine.low %v2107_v27, %v2125_v45 }
  0xfe   : > { %v1841_v24 = vpop.permute.xlu1 %1840  ;;  %v1839_v25 = vpop.permute.xlu0 %1838  ;;  %v2586_v5 = vcombine.low %v2062_v59, %v2080_v26 }
  0xff   : > { %v2172_v57 = vcombine.low %v6852_v28, %v1841_v24  ;;  %v2163_v18 = vcombine.low %v6855_v29, %v1839_v25  ;;  %v2644_v16 = vcombine.low %v2143_v41, %v2161_v63  ;;  %v2636_v22 = vcombine.low %v2134_v2, %v2152_v51  ;;  %v7257_v28 = vld [vmem:[%s6709_s4 + $0x60] sm:$0x1] }
 0x100   : > { %v2601_v29 = vrot.slane %v2594_v0, %v7103_v7  ;;  %v2617_v17 = vrot.slane %v2610_v8, %v7103_v7  ;;  %v2593_v44 = vrot.slane %v2586_v5, %v7103_v7  ;;  %v7278_v8 = vld [vmem:[%s6709_s4 + $0x6c] sm:$0x1] }
 0x101   : > { %596 = vrot.lane.b32.xlu1 %v7238_v12, %s6493_s5  ;;  %594 = vrot.lane.b32.xlu0 %v7241_v61, %s6493_s5  ;;  %v2179_v26 = vrot.slane %v2172_v57, %v7054_v52  ;;  %v2170_v27 = vrot.slane %v2163_v18, %v7054_v52  ;;  %v2651_v63 = vrot.slane %v2644_v16, %v7103_v7 }
 0x102   : > { %v1845_v23 = vpop.permute.xlu1 %1844  ;;  %v1843_v19 = vpop.permute.xlu0 %1842  ;;  %v2643_v51 = vrot.slane %v2636_v22, %v7103_v7  ;;  %v2626_v41 = vcombine.low %v2609_v46, %v2617_v17  ;;  %v2618_v18 = vcombine.low %v2593_v44, %v2601_v29 }
 0x103   : > { %v2190_v45 = vcombine.low %v6862_v30, %v1845_v23  ;;  %v2181_v48 = vcombine.low %v6865_v31, %v1843_v19  ;;  %v7290_v19 = vld [vmem:[%s6709_s4 + $0x74] sm:$0x1] }
 0x104   : > { %v2668_v5 = vcombine.low %v2643_v51, %v2651_v63 }
 0x105   : > { %v2197_v30 = vrot.slane %v2190_v45, %v7054_v52  ;;  %v2188_v31 = vrot.slane %v2181_v48, %v7054_v52  ;;  %600 = vrot.lane.b32.xlu1 %v7254_v58, %s6493_s5  ;;  %598 = vrot.lane.b32.xlu0 %v7257_v28, %s6493_s5  ;;  %v7293_v45 = vld [vmem:[%s6709_s4 + $0x70] sm:$0x1]  ;;  %v2633_v48 = vrot.slane %v2626_v41, %v7054_v52 }
 0x106   : > { %v7273_v24 = vpop.permute.xlu1 %1848  ;;  %v7275_v25 = vpop.permute.xlu0 %1846 }
 0x107   : > { %v2660_v59 = vcombine.low %v2179_v26, %v2197_v30  ;;  %v2652_v0 = vcombine.low %v2170_v27, %v2188_v31  ;;  %v2625_v26 = vrot.slane %v2618_v18, %v7054_v52  ;;  %v2675_v27 = vrot.slane %v2668_v5, %v7054_v52  ;;  %v7304_v30 = vld [vmem:[%s6709_s4 + $0x7c] sm:$0x1]  ;;  %v7307_v31 = vld [vmem:[%s6709_s4 + $0x78] sm:$0x1]  ;;  %v7314_v18 = vld [vmem:[%s6709_s4 + $0x84] sm:$0x1] }
 0x108   : > { %v7317_v5 = vld [vmem:[%s6709_s4 + $0x80] sm:$0x1] }
 0x109   : > { %v2667_v2 = vrot.slane %v2660_v59, %v7103_v7  ;;  %v2659_v57 = vrot.slane %v2652_v0, %v7103_v7  ;;  %604 = vrot.lane.b32.xlu1 %v7278_v8, %s6493_s5  ;;  %602 = vrot.lane.b32.xlu0 %v7281_v9, %s6493_s5  ;;  %v2634_v44 = vcombine.low %v2625_v26, %v2633_v48 }
 0x10a   : > { %v1853_v16 = vpop.permute.xlu1 %1852  ;;  %v1851_v22 = vpop.permute.xlu0 %1850  ;;  %v2635_v51 = vcombine.high %v2625_v26, %v2633_v48  ;;  %v7333_v26 = vld [vmem:[%s6709_s4 + $0x8c] sm:$0x1] }
 0x10b   : > { %v2676_v23 = vcombine.low %v2659_v57, %v2667_v2 }
 0x10d   : > { %v2683_v29 = vrot.slane %v2676_v23, %v7054_v52  ;;  %608 = vrot.lane.b32.xlu1 %v7290_v19, %s6493_s5  ;;  %606 = vrot.lane.b32.xlu0 %v7293_v45, %s6493_s5 }
 0x10e   : > { %v1857_v17 = vpop.permute.xlu1 %1856  ;;  %v1855_v46 = vpop.permute.xlu0 %1854 }
 0x10f   : > { %v2684_v63 = vcombine.low %v2675_v27, %v2683_v29  ;;  %v2685_v59 = vcombine.high %v2675_v27, %v2683_v29  ;;  %v2226_v29 = vcombine.low %v6882_v34, %v1853_v16  ;;  %v7336_v27 = vld [vmem:[%s6709_s4 + $0x88] sm:$0x1] }
 0x110   : > { %8880 = vst [vmem:[#allocation28_spill] sm:$0xff] %v7336_v27 }
 0x111   : > { %612 = vrot.lane.b32.xlu1 %v7304_v30, %s6493_s5  ;;  %610 = vrot.lane.b32.xlu0 %v7307_v31, %s6493_s5  ;;  %v6239_v2 = vpack.c.bf16 %v2684_v63, %v2634_v44  ;;  %v6263_v57 = vpack.c.bf16 %v2685_v59, %v2635_v51  ;;  %v2208_v51 = vcombine.low %v6872_v32, %v7273_v24 }
 0x112   : > { %v1861_v0 = vpop.permute.xlu1 %1860  ;;  %v1859_v41 = vpop.permute.xlu0 %1858  ;;  %v2217_v59 = vcombine.low %v6885_v35, %v1851_v22 }
 0x113   : > { %6241 = vmatprep.subr.msk.bf16.mxu0 %vm7171_vm1, %v6239_v2  ;;  %6265 = vmatprep.subr.msk.bf16.mxu1 %vm7171_vm1, %v6263_v57  ;;  %v2262_v44 = vcombine.low %v6902_v38, %v1861_v0  ;;  %v2253_v63 = vcombine.low %v6905_v39, %v1859_v41  ;;  %v2199_v38 = vcombine.low %v6875_v33, %v7275_v25  ;;  %v8884_v0 = vld [vmem:[#allocation5_spill] sm:$0xff] }
 0x114   : > { %6244 = vmatpush3.bf16.xpose.msk.msra.mxu0 %vm7171_vm1, %v6239_v2  ;;  %6268 = vmatpush3.bf16.xpose.msk.msra.mxu1 %vm7171_vm1, %v6263_v57  ;;  %v2244_v2 = vcombine.low %v6892_v36, %v1857_v17  ;;  %v2235_v57 = vcombine.low %v6895_v37, %v1855_v46  ;;  %v2233_v39 = vrot.slane %v2226_v29, %v7054_v52  ;;  %v7355_v36 = vld [vmem:[%s6709_s4 + $0x94] sm:$0x1]  ;;  %v7358_v37 = vld [vmem:[%s6709_s4 + $0x90] sm:$0x1]  ;;  %v8883_v17 = vld [vmem:[#allocation4_spill] sm:$0xff] }
 0x115   : > { %616 = vrot.lane.b32.xlu1 %v7314_v18, %s6493_s5  ;;  %614 = vrot.lane.b32.xlu0 %v7317_v5, %s6493_s5  ;;  %8881 = vst [vmem:[#allocation29_spill] sm:$0xff] %v7355_v36  ;;  %8882 = vst [vmem:[#allocation30_spill] sm:$0xff] %v7358_v37  ;;  %v2269_v24 = vrot.slane %v2262_v44, %v7054_v52  ;;  %v2260_v22 = vrot.slane %v2253_v63, %v7054_v52  ;;  %v7376_v63 = vld [vmem:[%s6709_s4 + $0x9c] sm:$0x1] }
 0x116   : > { %v1865_v23 = vpop.permute.xlu1 %1864  ;;  %v1863_v48 = vpop.permute.xlu0 %1862  ;;  %v2215_v25 = vrot.slane %v2208_v51, %v7054_v52  ;;  %v2242_v41 = vrot.slane %v2235_v57, %v7054_v52  ;;  %8885 = vst [vmem:[#allocation4_spill] sm:$0xff] %v7376_v63  ;;  %v7379_v51 = vld [vmem:[%s6709_s4 + $0x98] sm:$0x1] }
 0x117   : > { %v2280_v46 = vcombine.low %v8883_v17, %v1865_v23  ;;  %v2271_v33 = vcombine.low %v8884_v0, %v1863_v48  ;;  %v2206_v23 = vrot.slane %v2199_v38, %v7054_v52  ;;  %8886 = vst [vmem:[#allocation5_spill] sm:$0xff] %v7379_v51  ;;  %v8888_v0 = vld [vmem:[#allocation7_spill] sm:$0xff] }
 0x118   : > { %v2694_v48 = vcombine.low %v2215_v25, %v2233_v39 }
 0x119   : > { %620 = vrot.lane.b32.xlu1 %v7333_v26, %s6493_s5  ;;  %618 = vrot.lane.b32.xlu0 %v7336_v27, %s6493_s5  ;;  %v2287_v57 = vrot.slane %v2280_v46, %v7054_v52  ;;  %v8890_v46 = vld [vmem:[#allocation9_spill] sm:$0xff] }
 0x11a   : > { %v1869_v34 = vpop.permute.xlu1 %1868  ;;  %v1867_v16 = vpop.permute.xlu0 %1866 }
 0x11b   : > { %v2298_v32 = vcombine.low %v6922_v42, %v1869_v34  ;;  %v2289_v35 = vcombine.low %v6925_v43, %v1867_v16  ;;  %v2224_v42 = vrot.slane %v2217_v59, %v7054_v52  ;;  %v2251_v43 = vrot.slane %v2244_v2, %v7054_v52 }
 0x11c   : > { %v2702_v2 = vcombine.low %v2242_v41, %v2260_v22  ;;  %v7395_v41 = vld [vmem:[%s6709_s4 + $0xa0] sm:$0x1] }
 0x11d   : > { %v2305_v29 = vrot.slane %v2298_v32, %v7054_v52  ;;  %v2296_v44 = vrot.slane %v2289_v35, %v7054_v52  ;;  %624 = vrot.lane.b32.xlu1 %v7355_v36, %s6493_s5  ;;  %622 = vrot.lane.b32.xlu0 %v7358_v37, %s6493_s5  ;;  %v2710_v59 = vcombine.low %v2251_v43, %v2269_v24  ;;  %v8887_v35 = vld [vmem:[#allocation6_spill] sm:$0xff]  ;;  %v8889_v24 = vld [vmem:[#allocation8_spill] sm:$0xff] }
 0x11e   : > { %v1873_v34 = vpop.permute.xlu1 %1872  ;;  %v1871_v16 = vpop.permute.xlu0 %1870  ;;  %v2278_v32 = vrot.slane %v2271_v33, %v7054_v52  ;;  %v2686_v37 = vcombine.low %v2206_v23, %v2224_v42  ;;  %v7392_v33 = vld [vmem:[%s6709_s4 + $0xa4] sm:$0x1]  ;;  %8892 = vst [vmem:[#allocation7_spill] sm:$0xff] %v7395_v41  ;;  %v2701_v42 = vrot.slane %v2694_v48, %v7103_v7 }
 0x11f   : > { %v2316_v17 = vcombine.low %v8887_v35, %v1873_v34  ;;  %v2307_v36 = vcombine.low %v8888_v0, %v1871_v16  ;;  %v2744_v27 = vcombine.low %v2287_v57, %v2305_v29  ;;  %8891 = vst [vmem:[#allocation6_spill] sm:$0xff] %v7392_v33  ;;  %v2717_v29 = vrot.slane %v2710_v59, %v7103_v7 }
 0x120   : > { %v2736_v38 = vcombine.low %v2278_v32, %v2296_v44  ;;  %v2709_v44 = vrot.slane %v2702_v2, %v7103_v7  ;;  %v2693_v32 = vrot.slane %v2686_v37, %v7103_v7  ;;  %v7419_v37 = vld [vmem:[%s6709_s4 + $0xa8] sm:$0x1] }
 0x121   : > { %628 = vrot.lane.b32.xlu1 %v7376_v63, %s6493_s5  ;;  %626 = vrot.lane.b32.xlu0 %v7379_v51, %s6493_s5  ;;  %v2323_v34 = vrot.slane %v2316_v17, %v7054_v52  ;;  %v2314_v16 = vrot.slane %v2307_v36, %v7054_v52  ;;  %v2751_v35 = vrot.slane %v2744_v27, %v7103_v7  ;;  %v7416_v17 = vld [vmem:[%s6709_s4 + $0xac] sm:$0x1] }
 0x122   : > { %v1877_v39 = vpop.permute.xlu1 %1876  ;;  %v1875_v25 = vpop.permute.xlu0 %1874  ;;  %v2743_v48 = vrot.slane %v2736_v38, %v7103_v7  ;;  %8893 = vst [vmem:[#allocation8_spill] sm:$0xff] %v7416_v17  ;;  %8894 = vst [vmem:[#allocation9_spill] sm:$0xff] %v7419_v37  ;;  %v2726_v27 = vcombine.low %v2709_v44, %v2717_v29  ;;  %v7431_v29 = vld [vmem:[%s6709_s4 + $0xb0] sm:$0x1] }
 0x123   : > { %v2334_v22 = vcombine.low %v8889_v24, %v1877_v39  ;;  %v2325_v43 = vcombine.low %v8890_v46, %v1875_v25  ;;  %v2718_v25 = vcombine.low %v2693_v32, %v2701_v42  ;;  %8896 = vst [vmem:[#allocation32_spill] sm:$0xff] %v7431_v29 }
 0x124   : > { %v2768_v24 = vcombine.low %v2743_v48, %v2751_v35  ;;  %v2733_v44 = vrot.slane %v2726_v27, %v7054_v52  ;;  %v7442_v35 = vld [vmem:[%s6709_s4 + $0xbc] sm:$0x1]  ;;  %v7445_v48 = vld [vmem:[%s6709_s4 + $0xb8] sm:$0x1] }
 0x125   : > { %v2341_v23 = vrot.slane %v2334_v22, %v7054_v52  ;;  %v2332_v57 = vrot.slane %v2325_v43, %v7054_v52  ;;  %632 = vrot.lane.b32.xlu1 %v7392_v33, %s6493_s5  ;;  %630 = vrot.lane.b32.xlu0 %v7395_v41, %s6493_s5  ;;  %8897 = vst [vmem:[#allocation33_spill] sm:$0xff] %v7442_v35  ;;  %8898 = vst [vmem:[#allocation34_spill] sm:$0xff] %v7445_v48  ;;  %v8916_v41 = vld [vmem:[#allocation19_spill] sm:$0xff] }
 0x126   : > { %v7407_v0 = vpop.permute.xlu1 %1880  ;;  %v7409_v59 = vpop.permute.xlu0 %1878  ;;  %v2775_v32 = vrot.slane %v2768_v24, %v7054_v52  ;;  %v7452_v24 = vld [vmem:[%s6709_s4 + $0xc4] sm:$0x1] }
 0x127   : > { %v2760_v36 = vcombine.low %v2323_v34, %v2341_v23  ;;  %v2752_v2 = vcombine.low %v2314_v16, %v2332_v57  ;;  %v7428_v34 = vld [vmem:[%s6709_s4 + $0xb4] sm:$0x1]  ;;  %v2725_v57 = vrot.slane %v2718_v25, %v7054_v52  ;;  %8899 = vst [vmem:[#allocation35_spill] sm:$0xff] %v7452_v24 }
 0x128   : > { %8895 = vst [vmem:[#allocation31_spill] sm:$0xff] %v7428_v34 }
 0x129   : > { %v2767_v38 = vrot.slane %v2760_v36, %v7103_v7  ;;  %v2759_v39 = vrot.slane %v2752_v2, %v7103_v7  ;;  %636 = vrot.lane.b32.xlu1 %v7416_v17, %s6493_s5  ;;  %634 = vrot.lane.b32.xlu0 %v7419_v37, %s6493_s5  ;;  %v2734_v36 = vcombine.low %v2725_v57, %v2733_v44  ;;  %v8910_v17 = vld [vmem:[#allocation11_spill] sm:$0xff] }
 0x12a   : > { %v1885_v22 = vpop.permute.xlu1 %1884  ;;  %v1883_v46 = vpop.permute.xlu0 %1882  ;;  %v2735_v27 = vcombine.high %v2725_v57, %v2733_v44  ;;  %v8901_v44 = vld [vmem:[#allocation16_spill] sm:$0xff]  ;;  %v8902_v57 = vld [vmem:[#allocation17_spill] sm:$0xff] }
 0x12b   : > { %v2776_v43 = vcombine.low %v2759_v39, %v2767_v38 }
 0x12d   : > { %v2783_v42 = vrot.slane %v2776_v43, %v7054_v52  ;;  %640 = vrot.lane.b32.xlu1 %v7428_v34, %s6493_s5  ;;  %638 = vrot.lane.b32.xlu0 %v7431_v29, %s6493_s5  ;;  %v7455_v29 = vld [vmem:[%s6709_s4 + $0xc0] sm:$0x1]  ;;  %v8909_v34 = vld [vmem:[#allocation10_spill] sm:$0xff] }
 0x12e   : > { %v1889_v16 = vpop.permute.xlu1 %1888  ;;  %v1887_v23 = vpop.permute.xlu0 %1886  ;;  %8900 = vst [vmem:[#allocation36_spill] sm:$0xff] %v7455_v29 }
 0x12f   : > { %v2784_v2 = vcombine.low %v2775_v32, %v2783_v42  ;;  %v2785_v38 = vcombine.high %v2775_v32, %v2783_v42 }
 0x131   : > { %v6245_v43 = vpack.c.bf16 %v2784_v2, %v2734_v36  ;;  %v6269_v37 = vpack.c.bf16 %v2785_v38, %v2735_v27  ;;  %644 = vrot.lane.b32.xlu1 %v7442_v35, %s6493_s5  ;;  %642 = vrot.lane.b32.xlu0 %v7445_v48, %s6493_s5  ;;  %v8903_v27 = vld [vmem:[#allocation12_spill] sm:$0xff]  ;;  %v8904_v48 = vld [vmem:[#allocation14_spill] sm:$0xff] }
 0x132   : > { %v1893_v39 = vpop.permute.xlu1 %1892  ;;  %v1891_v25 = vpop.permute.xlu0 %1890  ;;  %v2370_v38 = vcombine.low %v8903_v27, %v1885_v22 }
 0x133   : > { %6247 = vmatprep.subr.msk.bf16.mxu0 %vm7171_vm1, %v6245_v43  ;;  %6271 = vmatprep.subr.msk.bf16.mxu1 %vm7171_vm1, %v6269_v37  ;;  %v2406_v42 = vcombine.low %v8901_v44, %v1893_v39  ;;  %v2397_v32 = vcombine.low %v8902_v57, %v1891_v25  ;;  %v2388_v39 = vcombine.low %v8904_v48, %v1889_v16  ;;  %v7474_v44 = vld [vmem:[%s6709_s4 + $0xcc] sm:$0x1]  ;;  %v8908_v57 = vld [vmem:[#allocation15_spill] sm:$0xff] }
 0x134   : > { %6250 = vmatpush3.bf16.xpose.msk.msra.mxu0 %vm7171_vm1, %v6245_v43  ;;  %6274 = vmatpush3.bf16.xpose.msk.msra.mxu1 %vm7171_vm1, %v6269_v37  ;;  %8905 = vst [vmem:[#allocation16_spill] sm:$0xff] %v7474_v44  ;;  %v7477_v43 = vld [vmem:[%s6709_s4 + $0xc8] sm:$0x1]  ;;  %v2379_v35 = vcombine.low %v8908_v57, %v1887_v23 }
 0x135   : > { %648 = vrot.lane.b32.xlu1 %v7452_v24, %s6493_s5  ;;  %646 = vrot.lane.b32.xlu0 %v7455_v29, %s6493_s5  ;;  %8906 = vst [vmem:[#allocation17_spill] sm:$0xff] %v7477_v43  ;;  %v8907_v37 = vld [vmem:[#allocation13_spill] sm:$0xff]  ;;  %v2352_v24 = vcombine.low %v8909_v34, %v7407_v0  ;;  %v2343_v29 = vcombine.low %v8910_v17, %v7409_v59  ;;  %v8911_v0 = vld [vmem:[#allocation20_spill] sm:$0xff]  ;;  %v7496_v17 = vld [vmem:[%s6709_s4 + $0xd4] sm:$0x1] }
 0x136   : > { %v1897_v36 = vpop.permute.xlu1 %1896  ;;  %v1895_v2 = vpop.permute.xlu0 %1894  ;;  %v2361_v25 = vcombine.low %v8907_v37, %v1883_v46  ;;  %v2413_v22 = vrot.slane %v2406_v42, %v7054_v52  ;;  %v2404_v16 = vrot.slane %v2397_v32, %v7054_v52  ;;  %v2377_v46 = vrot.slane %v2370_v38, %v7054_v52  ;;  %v8912_v37 = vld [vmem:[#allocation21_spill] sm:$0xff]  ;;  %8913 = vst [vmem:[#allocation12_spill] sm:$0xff] %v7496_v17  ;;  %v7499_v42 = vld [vmem:[%s6709_s4 + $0xd0] sm:$0x1] }
 0x137   : > { %v2395_v23 = vrot.slane %v2388_v39, %v7054_v52  ;;  %8914 = vst [vmem:[#allocation14_spill] sm:$0xff] %v7499_v42  ;;  %v2386_v57 = vrot.slane %v2379_v35, %v7054_v52  ;;  %v2415_v38 = vcombine.low %v8916_v41, %v1895_v2  ;;  %v2359_v39 = vrot.slane %v2352_v24, %v7054_v52  ;;  %v7514_v35 = vld [vmem:[%s6709_s4 + $0xdc] sm:$0x1]  ;;  %v7517_v41 = vld [vmem:[%s6709_s4 + $0xd8] sm:$0x1] }
 0x138   : > { %v2368_v32 = vrot.slane %v2361_v25, %v7054_v52  ;;  %v8917_v25 = vld [vmem:[#allocation22_spill] sm:$0xff] }
 0x139   : > { %652 = vrot.lane.b32.xlu1 %v7474_v44, %s6493_s5  ;;  %650 = vrot.lane.b32.xlu0 %v7477_v43, %s6493_s5  ;;  %v8915_v44 = vld [vmem:[#allocation18_spill] sm:$0xff]  ;;  %v2794_v24 = vcombine.low %v2359_v39, %v2377_v46  ;;  %v2422_v2 = vrot.slane %v2415_v38, %v7054_v52  ;;  %v7532_v39 = vld [vmem:[%s6709_s4 + $0xe4] sm:$0x1] }
 0x13a   : > { %v1901_v48 = vpop.permute.xlu1 %1900  ;;  %v1899_v27 = vpop.permute.xlu0 %1898  ;;  %v2424_v43 = vcombine.low %v8915_v44, %v1897_v36 }
 0x13b   : > { %v2442_v34 = vcombine.low %v8911_v0, %v1901_v48  ;;  %v2433_v59 = vcombine.low %v8912_v37, %v1899_v27  ;;  %v2350_v48 = vrot.slane %v2343_v29, %v7054_v52  ;;  %v2810_v0 = vcombine.low %v2395_v23, %v2413_v22 }
 0x13c   : > { %v2802_v27 = vcombine.low %v2386_v57, %v2404_v16  ;;  %v2431_v36 = vrot.slane %v2424_v43, %v7054_v52  ;;  %v8918_v16 = vld [vmem:[#allocation23_spill] sm:$0xff]  ;;  %v8919_v43 = vld [vmem:[#allocation24_spill] sm:$0xff] }
 0x13d   : > { %v2449_v37 = vrot.slane %v2442_v34, %v7054_v52  ;;  %v2440_v33 = vrot.slane %v2433_v59, %v7054_v52  ;;  %656 = vrot.lane.b32.xlu1 %v7496_v17, %s6493_s5  ;;  %654 = vrot.lane.b32.xlu0 %v7499_v42, %s6493_s5  ;;  %v2786_v29 = vcombine.low %v2350_v48, %v2368_v32  ;;  %v8920_v32 = vld [vmem:[#allocation25_spill] sm:$0xff] }
 0x13e   : > { %v1905_v51 = vpop.permute.xlu1 %1904  ;;  %v1903_v63 = vpop.permute.xlu0 %1902  ;;  %v2817_v44 = vrot.slane %v2810_v0, %v7103_v7  ;;  %v2809_v34 = vrot.slane %v2802_v27, %v7103_v7 }
 0x13f   : > { %v2460_v22 = vcombine.low %v8917_v25, %v1905_v51  ;;  %v2451_v23 = vcombine.low %v8918_v16, %v1903_v63  ;;  %v2844_v59 = vcombine.low %v2431_v36, %v2449_v37  ;;  %v2836_v57 = vcombine.low %v2422_v2, %v2440_v33  ;;  %v7535_v51 = vld [vmem:[%s6709_s4 + $0xe0] sm:$0x1]  ;;  %v7553_v16 = vld [vmem:[%s6709_s4 + $0xe8] sm:$0x1] }
 0x140   : > { %v2801_v63 = vrot.slane %v2794_v24, %v7103_v7  ;;  %v2793_v33 = vrot.slane %v2786_v29, %v7103_v7  ;;  %v2826_v37 = vcombine.low %v2809_v34, %v2817_v44 }
 0x141   : > { %660 = vrot.lane.b32.xlu1 %v7514_v35, %s6493_s5  ;;  %658 = vrot.lane.b32.xlu0 %v7517_v41, %s6493_s5  ;;  %v2467_v48 = vrot.slane %v2460_v22, %v7054_v52  ;;  %v2458_v0 = vrot.slane %v2451_v23, %v7054_v52  ;;  %v2843_v36 = vrot.slane %v2836_v57, %v7103_v7  ;;  %v7550_v22 = vld [vmem:[%s6709_s4 + $0xec] sm:$0x1] }
 0x142   : > { %v1909_v42 = vpop.permute.xlu1 %1908  ;;  %v1907_v17 = vpop.permute.xlu0 %1906  ;;  %v2818_v44 = vcombine.low %v2793_v33, %v2801_v63 }
 0x143   : > { %v2478_v46 = vcombine.low %v8919_v43, %v1909_v42  ;;  %v2469_v38 = vcombine.low %v8920_v32, %v1907_v17  ;;  %v2851_v17 = vrot.slane %v2844_v59, %v7103_v7 }
 0x145   : > { %v2485_v27 = vrot.slane %v2478_v46, %v7054_v52  ;;  %v2476_v42 = vrot.slane %v2469_v38, %v7054_v52  ;;  %664 = vrot.lane.b32.xlu1 %v7532_v39, %s6493_s5  ;;  %662 = vrot.lane.b32.xlu0 %v7535_v51, %s6493_s5  ;;  %v2868_v59 = vcombine.low %v2843_v36, %v2851_v17  ;;  %v8921_v38 = vld [vmem:[#allocation26_spill] sm:$0xff] }
 0x146   : > { %v553_v2 = vpop.permute.xlu1 %552  ;;  %v551_v25 = vpop.permute.xlu0 %550  ;;  %v2833_v46 = vrot.slane %v2826_v37, %v7054_v52  ;;  %v2825_v36 = vrot.slane %v2818_v44, %v7054_v52  ;;  %v7586_v44 = vld [vmem:[%s6709_s4 + $0xf8] sm:$0x1] }
 0x147   : > { %v2860_v24 = vcombine.low %v2467_v48, %v2485_v27  ;;  %v2852_v29 = vcombine.low %v2458_v0, %v2476_v42  ;;  %v688_v48 = vcombine.low %v8921_v38, %v553_v2  ;;  %v7566_v0 = vld [vmem:[%s6709_s4 + $0xf4] sm:$0x1]  ;;  %v7569_v27 = vld [vmem:[%s6709_s4 + $0xf0] sm:$0x1]  ;;  %v8924_v42 = vld [vmem:[#allocation27_spill] sm:$0xff] }
 0x148   : > { %8922 = vst [vmem:[#allocation13_spill] sm:$0xff] %v7566_v0  ;;  %8923 = vst [vmem:[#allocation15_spill] sm:$0xff] %v7569_v27  ;;  %v679_v37 = vcombine.low %v8924_v42, %v551_v25 }
 0x149   : > { %v2867_v23 = vrot.slane %v2860_v24, %v7103_v7  ;;  %v2859_v34 = vrot.slane %v2852_v29, %v7103_v7  ;;  %668 = vrot.lane.b32.xlu1 %v7550_v22, %s6493_s5  ;;  %666 = vrot.lane.b32.xlu0 %v7553_v16, %s6493_s5  ;;  %v695_v25 = vrot.slane %v688_v48, %v7054_v52 }
 0x14a   : > { %v557_v57 = vpop.permute.xlu1 %556  ;;  %v555_v43 = vpop.permute.xlu0 %554 }
 0x14b   : > { %v2876_v32 = vcombine.low %v2859_v34, %v2867_v23  ;;  %v706_v63 = vcombine.low %v7046_v53, %v557_v57  ;;  %v697_v33 = vcombine.low %v7049_v49, %v555_v43  ;;  %v2875_v49 = vrot.slane %v2868_v59, %v7054_v52  ;;  %v7583_v57 = vld [vmem:[%s6709_s4 + $0xfc] sm:$0x1] }
 0x14c   : > { %v2834_v23 = vcombine.low %v2825_v36, %v2833_v46  ;;  %v2835_v34 = vcombine.high %v2825_v36, %v2833_v46  ;;  %v686_v43 = vrot.slane %v679_v37, %v7054_v52  ;;  %v7598_v36 = vld [vmem:[%s6709_s4 + $0x6] sm:$0x1] }
 0x14d   : > { %v713_v17 = vrot.slane %v706_v63, %v7054_v52  ;;  %v2883_v24 = vrot.slane %v2876_v32, %v7054_v52  ;;  %v704_v2 = vrot.slane %v697_v33, %v7054_v52  ;;  %672 = vrot.lane.b32.xlu1 %v7566_v0, %s6493_s5  ;;  %670 = vrot.lane.b32.xlu0 %v7569_v27, %s6493_s5 }
 0x14e   : > { %v561_v29 = vpop.permute.xlu1 %560  ;;  %v559_v53 = vpop.permute.xlu0 %558 }
 0x14f   : > { %v724_v59 = vcombine.low %v7064_v40, %v561_v29  ;;  %v2884_v32 = vcombine.low %v2875_v49, %v2883_v24  ;;  %v2885_v38 = vcombine.high %v2875_v49, %v2883_v24  ;;  %v1262_v63 = vcombine.low %v695_v25, %v713_v17  ;;  %v7601_v17 = vld [vmem:[%s6709_s4 + $0x2] sm:$0x1] }
 0x150   : > { %v715_v33 = vcombine.low %v7067_v6, %v559_v53  ;;  %v1254_v42 = vcombine.low %v686_v43, %v704_v2 }
 0x151   : > { %v6251_v0 = vpack.c.bf16 %v2884_v32, %v2834_v23  ;;  %v6275_v46 = vpack.c.bf16 %v2885_v38, %v2835_v34  ;;  %676 = vrot.lane.b32.xlu1 %v7583_v57, %s6493_s5  ;;  %674 = vrot.lane.b32.xlu0 %v7586_v44, %s6493_s5  ;;  %v731_v6 = vrot.slane %v724_v59, %v7054_v52 }
 0x152   : > { %v565_v27 = vpop.permute.xlu1 %564  ;;  %v563_v48 = vpop.permute.xlu0 %562  ;;  %v722_v24 = vrot.slane %v715_v33, %v7054_v52  ;;  %v1261_v29 = vrot.slane %v1254_v42, %v7103_v7  ;;  %v1269_v53 = vrot.slane %v1262_v63, %v7103_v7 }
 0x153   : > { %v742_v37 = vcombine.low %v7088_v10, %v565_v27  ;;  %v733_v40 = vcombine.low %v7091_v11, %v563_v48  ;;  %6253 = vmatprep.subr.msk.bf16.mxu0 %vm7171_vm1, %v6251_v0  ;;  %6277 = vmatprep.subr.msk.bf16.mxu1 %vm7171_vm1, %v6275_v46 }
 0x154   : > { %6256 = vmatpush3.bf16.xpose.msk.msra.mxu0 %vm7171_vm1, %v6251_v0  ;;  %6280 = vmatpush3.bf16.xpose.msk.msra.mxu1 %vm7171_vm1, %v6275_v46  ;;  %v7622_v0 = vld [vmem:[%s6709_s4 + $0xe] sm:$0x1]  ;;  %v1286_v63 = vcombine.low %v1261_v29, %v1269_v53  ;;  %v7638_v46 = vld [vmem:[%s6709_s4 + $0x16] sm:$0x1]  ;;  %v7654_v53 = vld [vmem:[%s6709_s4 + $0x1e] sm:$0x1] }
 0x155   : > { %v749_v10 = vrot.slane %v742_v37, %v7054_v52  ;;  %v740_v11 = vrot.slane %v733_v40, %v7054_v52  ;;  %3016 = vrot.lane.b32.xlu1 %v7598_v36, %s6493_s5  ;;  %3014 = vrot.lane.b32.xlu0 %v7601_v17, %s6493_s5 }
 0x156   : > { %v569_v27 = vpop.permute.xlu1 %568  ;;  %v567_v2 = vpop.permute.xlu0 %566 }
 0x157   : > { %v1278_v49 = vcombine.low %v731_v6, %v749_v10  ;;  %v1270_v25 = vcombine.low %v722_v24, %v740_v11  ;;  %v760_v43 = vcombine.low %v7108_v55, %v569_v27  ;;  %v751_v59 = vcombine.low %v7111_v4, %v567_v2  ;;  %v7641_v55 = vld [vmem:[%s6709_s4 + $0x12] sm:$0x1] }
 0x159   : > { %v1277_v23 = vrot.slane %v1270_v25, %v7103_v7  ;;  %v1285_v34 = vrot.slane %v1278_v49, %v7103_v7  ;;  %3020 = vrot.lane.b32.xlu1 %v7622_v0, %s6493_s5  ;;  %3018 = vrot.lane.b32.xlu0 %v7625_v62, %s6493_s5  ;;  %v767_v6 = vrot.slane %v760_v43, %v7054_v52  ;;  %v7657_v49 = vld [vmem:[%s6709_s4 + $0x1a] sm:$0x1] }
 0x15a   : > { %v573_v32 = vpop.permute.xlu1 %572  ;;  %v571_v38 = vpop.permute.xlu0 %570  ;;  %v758_v24 = vrot.slane %v751_v59, %v7054_v52 }
 0x15b   : > { %v778_v33 = vcombine.low %v7127_v14, %v573_v32  ;;  %v769_v42 = vcombine.low %v7130_v15, %v571_v38  ;;  %v1294_v48 = vcombine.low %v1277_v23, %v1285_v34  ;;  %v1293_v15 = vrot.slane %v1286_v63, %v7054_v52  ;;  %v7672_v38 = vld [vmem:[%s6709_s4 + $0x26] sm:$0x1]  ;;  %v7675_v63 = vld [vmem:[%s6709_s4 + $0x22] sm:$0x1] }
 0x15d   : > { %v785_v4 = vrot.slane %v778_v33, %v7054_v52  ;;  %v776_v37 = vrot.slane %v769_v42, %v7054_v52  ;;  %v1301_v40 = vrot.slane %v1294_v48, %v7054_v52  ;;  %3024 = vrot.lane.b32.xlu1 %v7638_v46, %s6493_s5  ;;  %3022 = vrot.lane.b32.xlu0 %v7641_v55, %s6493_s5 }
 0x15e   : > { %v577_v14 = vpop.permute.xlu1 %576  ;;  %v575_v10 = vpop.permute.xlu0 %574 }
 0x15f   : > { %v1312_v11 = vcombine.low %v767_v6, %v785_v4  ;;  %v1304_v27 = vcombine.low %v758_v24, %v776_v37  ;;  %v1302_v2 = vcombine.low %v1293_v15, %v1301_v40  ;;  %v1303_v29 = vcombine.high %v1293_v15, %v1301_v40  ;;  %v7686_v6 = vld [vmem:[%s6709_s4 + $0x2e] sm:$0x1]  ;;  %v7689_v24 = vld [vmem:[%s6709_s4 + $0x2a] sm:$0x1] }
 0x160   : > { %v796_v25 = vcombine.low %v7146_v3, %v577_v14  ;;  %v787_v23 = vcombine.low %v7149_v54, %v575_v10 }
 0x161   : > { %6137 = vmatprep.mubr.msk.f32.mxu0 %vm4118_vm0, %v1302_v2  ;;  %6165 = vmatprep.mubr.msk.f32.mxu1 %vm4118_vm0, %v1303_v29  ;;  %v1319_v3 = vrot.slane %v1312_v11, %v7103_v7  ;;  %v1311_v54 = vrot.slane %v1304_v27, %v7103_v7  ;;  %v7698_v29 = vld [vmem:[%s6709_s4 + $0x36] sm:$0x1] }
 0x162   : > { %v581_v34 = vpop.permute.xlu1 %580  ;;  %v579_v43 = vpop.permute.xlu0 %578  ;;  %3028 = vrot.lane.b32.xlu1 %v7654_v53, %s6493_s5  ;;  %3026 = vrot.lane.b32.xlu0 %v7657_v49, %s6493_s5 }
 0x163   : > { %v814_v59 = vcombine.low %v7157_v47, %v581_v34  ;;  %v805_v32 = vcombine.low %v7160_v1, %v579_v43  ;;  %v803_v47 = vrot.slane %v796_v25, %v7054_v52  ;;  %v794_v1 = vrot.slane %v787_v23, %v7054_v52 }
 0x164   : > { %v1336_v14 = vcombine.low %v1311_v54, %v1319_v3 }
 0x165   : > { %v821_v33 = vrot.slane %v814_v59, %v7054_v52  ;;  %v812_v42 = vrot.slane %v805_v32, %v7054_v52  ;;  %v7705_v59 = vld [vmem:[%s6709_s4 + $0x32] sm:$0x1] }
 0x166   : > { %3032 = vrot.lane.b32.xlu1 %v7672_v38, %s6493_s5  ;;  %3030 = vrot.lane.b32.xlu0 %v7675_v63, %s6493_s5  ;;  %v1343_v34 = vrot.slane %v1336_v14, %v7054_v52 }
 0x167   : > { %v1328_v48 = vcombine.low %v803_v47, %v821_v33  ;;  %v1320_v4 = vcombine.low %v794_v1, %v812_v42  ;;  %v585_v37 = vpop.permute.xlu1 %584  ;;  %v583_v40 = vpop.permute.xlu0 %582  ;;  %v7714_v42 = vld [vmem:[%s6709_s4 + $0x3e] sm:$0x1] }
 0x168   : > { %v832_v32 = vcombine.low %v7176_v50, %v585_v37  ;;  %v823_v3 = vcombine.low %v7179_v56, %v583_v40  ;;  %v7720_v50 = vld [vmem:[%s6709_s4 + $0x3a] sm:$0x1] }
 0x169   : > { %v1335_v10 = vrot.slane %v1328_v48, %v7103_v7  ;;  %v1327_v15 = vrot.slane %v1320_v4, %v7103_v7 }
 0x16a   : > { %3036 = vrot.lane.b32.xlu1 %v7686_v6, %s6493_s5  ;;  %3034 = vrot.lane.b32.xlu0 %v7689_v24, %s6493_s5  ;;  %v839_v56 = vrot.slane %v832_v32, %v7054_v52  ;;  %v830_v48 = vrot.slane %v823_v3, %v7054_v52  ;;  %v7748_v3 = vld [vmem:[%s6709_s4 + $0x4a] sm:$0x1] }
 0x16b   : > { %v1344_v11 = vcombine.low %v1327_v15, %v1335_v10  ;;  %v589_v27 = vpop.permute.xlu1 %588  ;;  %v587_v2 = vpop.permute.xlu0 %586 }
 0x16c   : > { %v850_v25 = vcombine.low %v7195_v13, %v589_v27  ;;  %v841_v23 = vcombine.low %v7198_v60, %v587_v2  ;;  %v7737_v2 = vld [vmem:[%s6709_s4 + $0x46] sm:$0x1] }
 0x16d   : > { %v1351_v43 = vrot.slane %v1344_v11, %v7054_v52  ;;  %v7730_v11 = vld [vmem:[%s6709_s4 + $0x42] sm:$0x1] }
 0x16e   : > { %3040 = vrot.lane.b32.xlu1 %v7698_v29, %s6493_s5  ;;  %v857_v13 = vrot.slane %v850_v25, %v7054_v52  ;;  %v848_v60 = vrot.slane %v841_v23, %v7054_v52  ;;  %3038 = vrot.lane.b32.xlu0 %v7705_v59, %s6493_s5 }
 0x16f   : > { %v1352_v54 = vcombine.low %v1343_v34, %v1351_v43  ;;  %v1353_v47 = vcombine.high %v1343_v34, %v1351_v43  ;;  %v593_v1 = vpop.permute.xlu1 %592  ;;  %v591_v33 = vpop.permute.xlu0 %590 }
 0x170   : > { %v868_v4 = vcombine.low %v7217_v20, %v593_v1  ;;  %v859_v37 = vcombine.low %v7220_v21, %v591_v33  ;;  %v1362_v40 = vcombine.low %v839_v56, %v857_v13  ;;  %v1354_v14 = vcombine.low %v830_v48, %v848_v60  ;;  %v7753_v13 = vld [vmem:[%s6709_s4 + $0x52] sm:$0x1] }
 0x171   : > { %6138 = vmatmul.mubr.msk.f32.vlgmr.msra.gmra.mrb[0].mxu0 %vm4118_vm0, %v1352_v54  ;;  %6166 = vmatmul.mubr.msk.f32.vlgmr.msra.gmra.mrb[0].mxu1 %vm4118_vm0, %v1353_v47 }
 0x172   : > { %3044 = vrot.lane.b32.xlu1 %v7714_v42, %s6493_s5  ;;  %3042 = vrot.lane.b32.xlu0 %v7720_v50, %s6493_s5  ;;  %v875_v21 = vrot.slane %v868_v4, %v7054_v52  ;;  %v866_v25 = vrot.slane %v859_v37, %v7054_v52  ;;  %v1369_v43 = vrot.slane %v1362_v40, %v7103_v7  ;;  %v7762_v40 = vld [vmem:[%s6709_s4 + $0x4e] sm:$0x1] }
 0x173   : > { %v597_v10 = vpop.permute.xlu1 %596  ;;  %v595_v15 = vpop.permute.xlu0 %594 }
 0x174   : > { %v886_v27 = vcombine.low %v7238_v12, %v597_v10  ;;  %v877_v20 = vcombine.low %v7241_v61, %v595_v15  ;;  %v1361_v12 = vrot.slane %v1354_v14, %v7103_v7 }
 0x176   : > { %v893_v23 = vrot.slane %v886_v27, %v7054_v52  ;;  %v884_v34 = vrot.slane %v877_v20, %v7054_v52  ;;  %3046 = vrot.lane.b32.xlu1 %v7730_v11, %s6493_s5  ;;  %3048 = vrot.lane.b32.xlu0 %v7737_v2, %s6493_s5  ;;  %v1386_v33 = vcombine.low %v1361_v12, %v1369_v43  ;;  %v7769_v27 = vld [vmem:[%s6709_s4 + $0x5a] sm:$0x1] }
 0x177   : > { %v601_v32 = vpop.permute.xlu1 %600  ;;  %v599_v61 = vpop.permute.xlu0 %598 }
 0x178   : > { %v1378_v54 = vcombine.low %v875_v21, %v893_v23  ;;  %v1370_v47 = vcombine.low %v866_v25, %v884_v34  ;;  %v904_v56 = vcombine.low %v7254_v58, %v601_v32  ;;  %v895_v48 = vcombine.low %v7257_v28, %v599_v61  ;;  %v7780_v34 = vld [vmem:[%s6709_s4 + $0x56] sm:$0x1] }
 0x17a   : > { %v1385_v60 = vrot.slane %v1378_v54, %v7103_v7  ;;  %v1377_v1 = vrot.slane %v1370_v47, %v7103_v7  ;;  %3050 = vrot.lane.b32.xlu1 %v7748_v3, %s6493_s5  ;;  %3054 = vrot.lane.b32.xlu0 %v7753_v13, %s6493_s5  ;;  %v911_v21 = vrot.slane %v904_v56, %v7054_v52  ;;  %v7785_v54 = vld [vmem:[%s6709_s4 + $0x62] sm:$0x1]  ;;  %v7794_v56 = vld [vmem:[%s6709_s4 + $0x5e] sm:$0x1] }
 0x17b   : > { %v605_v4 = vpop.permute.xlu1 %604  ;;  %v603_v37 = vpop.permute.xlu0 %602  ;;  %v902_v25 = vrot.slane %v895_v48, %v7054_v52 }
 0x17c   : > { %v1394_v14 = vcombine.low %v1377_v1, %v1385_v60  ;;  %v922_v10 = vcombine.low %v7278_v8, %v605_v4  ;;  %v913_v15 = vcombine.low %v7281_v9, %v603_v37  ;;  %v1393_v9 = vrot.slane %v1386_v33, %v7054_v52  ;;  %v7803_v37 = vld [vmem:[%s6709_s4 + $0x6a] sm:$0x1] }
 0x17e   : > { %v929_v58 = vrot.slane %v922_v10, %v7054_v52  ;;  %v920_v28 = vrot.slane %v913_v15, %v7054_v52  ;;  %v1401_v20 = vrot.slane %v1394_v14, %v7054_v52  ;;  %3052 = vrot.lane.b32.xlu1 %v7762_v40, %s6493_s5  ;;  %3058 = vrot.lane.b32.xlu0 %v7769_v27, %s6493_s5 }
 0x17f   : > { %v609_v23 = vpop.permute.xlu1 %608  ;;  %v607_v8 = vpop.permute.xlu0 %606 }
 0x180   : > { %v1412_v43 = vcombine.low %v911_v21, %v929_v58  ;;  %v1404_v12 = vcombine.low %v902_v25, %v920_v28  ;;  %v1402_v32 = vcombine.low %v1393_v9, %v1401_v20  ;;  %v1403_v61 = vcombine.high %v1393_v9, %v1401_v20  ;;  %v7812_v28 = vld [vmem:[%s6709_s4 + $0x66] sm:$0x1] }
 0x181   : > { %v940_v47 = vcombine.low %v7290_v19, %v609_v23  ;;  %v931_v60 = vcombine.low %v7293_v45, %v607_v8  ;;  %v7819_v8 = vld [vmem:[%s6709_s4 + $0x72] sm:$0x1] }
 0x182   : > { %3056 = vrot.lane.b32.xlu1 %v7780_v34, %s6493_s5  ;;  %6140 = vmatprep.mubr.msk.f32.mxu0 %vm4118_vm0, %v1402_v32  ;;  %v1419_v19 = vrot.slane %v1412_v43, %v7103_v7  ;;  %v1411_v45 = vrot.slane %v1404_v12, %v7103_v7  ;;  %8925 = vst [vmem:[#allocation10_spill] sm:$0xff] %v7819_v8 }
 0x183   : > { %6168 = vmatprep.mubr.msk.f32.mxu1 %vm4118_vm0, %v1403_v61  ;;  %v613_v1 = vpop.permute.xlu1 %612  ;;  %v611_v33 = vpop.permute.xlu0 %610  ;;  %3062 = vrot.lane.b32.xlu0 %v7785_v54, %s6493_s5  ;;  %v947_v14 = vrot.slane %v940_v47, %v7054_v52  ;;  %v938_v10 = vrot.slane %v931_v60, %v7054_v52  ;;  %v7826_v47 = vld [vmem:[%s6709_s4 + $0x6e] sm:$0x1] }
 0x184   : > { %v958_v48 = vcombine.low %v7304_v30, %v613_v1  ;;  %v949_v4 = vcombine.low %v7307_v31, %v611_v33  ;;  %v1436_v9 = vcombine.low %v1411_v45, %v1419_v19  ;;  %v8926_v1 = vld [vmem:[#allocation28_spill] sm:$0xff] }
 0x186   : > { %v965_v15 = vrot.slane %v958_v48, %v7054_v52  ;;  %v956_v30 = vrot.slane %v949_v4, %v7054_v52  ;;  %3060 = vrot.lane.b32.xlu1 %v7794_v56, %s6493_s5  ;;  %v7835_v4 = vld [vmem:[%s6709_s4 + $0x7a] sm:$0x1]  ;;  %v1443_v19 = vrot.slane %v1436_v9, %v7054_v52  ;;  %v8929_v9 = vld [vmem:[#allocation30_spill] sm:$0xff] }
 0x187   : > { %v617_v31 = vpop.permute.xlu1 %616  ;;  %v615_v58 = vpop.permute.xlu0 %614  ;;  %3066 = vrot.lane.b32.xlu0 %v7803_v37, %s6493_s5  ;;  %8927 = vst [vmem:[#allocation11_spill] sm:$0xff] %v7835_v4 }
 0x188   : > { %v1428_v20 = vcombine.low %v947_v14, %v965_v15  ;;  %v1420_v21 = vcombine.low %v938_v10, %v956_v30  ;;  %v976_v25 = vcombine.low %v7314_v18, %v617_v31  ;;  %v967_v23 = vcombine.low %v7317_v5, %v615_v58  ;;  %v7844_v58 = vld [vmem:[%s6709_s4 + $0x76] sm:$0x1] }
 0x18a   : > { %v1435_v43 = vrot.slane %v1428_v20, %v7103_v7  ;;  %v1427_v12 = vrot.slane %v1420_v21, %v7103_v7  ;;  %3064 = vrot.lane.b32.xlu1 %v7812_v28, %s6493_s5  ;;  %v983_v33 = vrot.slane %v976_v25, %v7054_v52  ;;  %v974_v48 = vrot.slane %v967_v23, %v7054_v52  ;;  %v8928_v25 = vld [vmem:[#allocation29_spill] sm:$0xff] }
 0x18b   : > { %v621_v32 = vpop.permute.xlu1 %620  ;;  %v619_v61 = vpop.permute.xlu0 %618  ;;  %3070 = vrot.lane.b32.xlu0 %v7819_v8, %s6493_s5 }
 0x18c   : > { %v1444_v60 = vcombine.low %v1427_v12, %v1435_v43  ;;  %v994_v18 = vcombine.low %v7333_v26, %v621_v32  ;;  %v985_v5 = vcombine.low %v8926_v1, %v619_v61 }
 0x18e   : > { %v1451_v45 = vrot.slane %v1444_v60, %v7054_v52  ;;  %v1001_v14 = vrot.slane %v994_v18, %v7054_v52  ;;  %v992_v10 = vrot.slane %v985_v5, %v7054_v52  ;;  %3068 = vrot.lane.b32.xlu1 %v7826_v47, %s6493_s5  ;;  %v8930_v18 = vld [vmem:[#allocation4_spill] sm:$0xff]  ;;  %v8931_v5 = vld [vmem:[#allocation5_spill] sm:$0xff] }
 0x18f   : > { %v625_v26 = vpop.permute.xlu1 %624  ;;  %v623_v15 = vpop.permute.xlu0 %622  ;;  %3074 = vrot.lane.b32.xlu0 %v7835_v4, %s6493_s5  ;;  %v8935_v4 = vld [vmem:[#allocation8_spill] sm:$0xff] }
 0x190   : > { %v1452_v30 = vcombine.low %v1443_v19, %v1451_v45  ;;  %v1453_v31 = vcombine.high %v1443_v19, %v1451_v45  ;;  %v1462_v20 = vcombine.low %v983_v33, %v1001_v14  ;;  %v1454_v21 = vcombine.low %v974_v48, %v992_v10  ;;  %v7859_v48 = vld [vmem:[%s6709_s4 + $0x7e] sm:$0x1] }
 0x191   : > { %v1012_v23 = vcombine.low %v8928_v25, %v625_v26  ;;  %v1003_v43 = vcombine.low %v8929_v9, %v623_v15  ;;  %8932 = vst [vmem:[#allocation20_spill] sm:$0xff] %v7859_v48  ;;  %v8933_v25 = vld [vmem:[#allocation6_spill] sm:$0xff]  ;;  %v8934_v9 = vld [vmem:[#allocation7_spill] sm:$0xff] }
 0x192   : > { %6141 = vmatmul.mubr.msk.f32.gmra.mrb[2].mxu0 %vm4118_vm0, %v1452_v30  ;;  %6169 = vmatmul.mubr.msk.f32.gmra.mrb[2].mxu1 %vm4118_vm0, %v1453_v31  ;;  %v1469_v19 = vrot.slane %v1462_v20, %v7103_v7  ;;  %v1461_v45 = vrot.slane %v1454_v21, %v7103_v7 }
 0x193   : > { %v629_v12 = vpop.permute.xlu1 %628  ;;  %v627_v32 = vpop.permute.xlu0 %626  ;;  %3072 = vrot.lane.b32.xlu1 %v7844_v58, %s6493_s5  ;;  %v1019_v61 = vrot.slane %v1012_v23, %v7054_v52  ;;  %v1010_v60 = vrot.slane %v1003_v43, %v7054_v52 }
 0x194   : > { %v1030_v1 = vcombine.low %v8930_v18, %v629_v12  ;;  %v1021_v33 = vcombine.low %v8931_v5, %v627_v32  ;;  %v1486_v12 = vcombine.low %v1461_v45, %v1469_v19 }
 0x196   : > { %v1037_v14 = vrot.slane %v1030_v1, %v7054_v52  ;;  %v1028_v10 = vrot.slane %v1021_v33, %v7054_v52 }
 0x197   : > { %v633_v26 = vpop.permute.xlu1 %632  ;;  %v631_v15 = vpop.permute.xlu0 %630  ;;  %3076 = vrot.lane.b32.xlu1 %v7859_v48, %s6493_s5 }
 0x198   : > { %v1478_v30 = vcombine.low %v1019_v61, %v1037_v14  ;;  %v1470_v31 = vcombine.low %v1010_v60, %v1028_v10  ;;  %v1048_v23 = vcombine.low %v8933_v25, %v633_v26  ;;  %v1039_v43 = vcombine.low %v8934_v9, %v631_v15  ;;  %v8936_v61 = vld [vmem:[#allocation9_spill] sm:$0xff]  ;;  %v8937_v25 = vld [vmem:[#allocation31_spill] sm:$0xff]  ;;  %v8938_v9 = vld [vmem:[#allocation32_spill] sm:$0xff] }
 0x199   : > { %v1493_v14 = vrot.slane %v1486_v12, %v7054_v52 }
 0x19a   : > { %v1485_v20 = vrot.slane %v1478_v30, %v7103_v7  ;;  %v1477_v21 = vrot.slane %v1470_v31, %v7103_v7  ;;  %v1055_v32 = vrot.slane %v1048_v23, %v7054_v52  ;;  %v1046_v33 = vrot.slane %v1039_v43, %v7054_v52 }
 0x19b   : > { %v637_v18 = vpop.permute.xlu1 %636  ;;  %v635_v1 = vpop.permute.xlu0 %634 }
 0x19c   : > { %v1494_v5 = vcombine.low %v1477_v21, %v1485_v20  ;;  %v1066_v48 = vcombine.low %v8935_v4, %v637_v18  ;;  %v1057_v60 = vcombine.low %v8936_v61, %v635_v1  ;;  %v8940_v61 = vld [vmem:[#allocation34_spill] sm:$0xff] }
 0x19e   : > { %v1073_v10 = vrot.slane %v1066_v48, %v7054_v52  ;;  %v1064_v19 = vrot.slane %v1057_v60, %v7054_v52  ;;  %v1501_v45 = vrot.slane %v1494_v5, %v7054_v52  ;;  %v8939_v5 = vld [vmem:[#allocation33_spill] sm:$0xff] }
 0x19f   : > { %v641_v26 = vpop.permute.xlu1 %640  ;;  %v639_v15 = vpop.permute.xlu0 %638 }
 0x1a0   : > { %v1512_v30 = vcombine.low %v1055_v32, %v1073_v10  ;;  %v1504_v31 = vcombine.low %v1046_v33, %v1064_v19  ;;  %v1084_v23 = vcombine.low %v8937_v25, %v641_v26  ;;  %v1075_v43 = vcombine.low %v8938_v9, %v639_v15  ;;  %v8942_v9 = vld [vmem:[#allocation36_spill] sm:$0xff] }
 0x1a1   : > { %v1502_v20 = vcombine.low %v1493_v14, %v1501_v45  ;;  %v1503_v4 = vcombine.high %v1493_v14, %v1501_v45 }
 0x1a2   : > { %v1519_v21 = vrot.slane %v1512_v30, %v7103_v7  ;;  %v1511_v12 = vrot.slane %v1504_v31, %v7103_v7  ;;  %v1091_v1 = vrot.slane %v1084_v23, %v7054_v52  ;;  %v1082_v32 = vrot.slane %v1075_v43, %v7054_v52  ;;  %v8941_v31 = vld [vmem:[#allocation35_spill] sm:$0xff] }
 0x1a3   : > { %v645_v18 = vpop.permute.xlu1 %644  ;;  %6143 = vmatprep.mubr.msk.f32.mxu0 %vm4118_vm0, %v1502_v20  ;;  %6171 = vmatprep.mubr.msk.f32.mxu1 %vm4118_vm0, %v1503_v4  ;;  %v643_v48 = vpop.permute.xlu0 %642 }
 0x1a4   : > { %v1102_v33 = vcombine.low %v8939_v5, %v645_v18  ;;  %v1093_v60 = vcombine.low %v8940_v61, %v643_v48  ;;  %v1536_v26 = vcombine.low %v1511_v12, %v1519_v21 }
 0x1a6   : > { %v1109_v14 = vrot.slane %v1102_v33, %v7054_v52  ;;  %v1100_v10 = vrot.slane %v1093_v60, %v7054_v52  ;;  %v1543_v5 = vrot.slane %v1536_v26, %v7054_v52  ;;  %v8943_v33 = vld [vmem:[#allocation16_spill] sm:$0xff]  ;;  %v8944_v60 = vld [vmem:[#allocation17_spill] sm:$0xff] }
 0x1a7   : > { %v649_v19 = vpop.permute.xlu1 %648  ;;  %v647_v45 = vpop.permute.xlu0 %646 }
 0x1a8   : > { %v1528_v15 = vcombine.low %v1091_v1, %v1109_v14  ;;  %v1520_v30 = vcombine.low %v1082_v32, %v1100_v10  ;;  %v1120_v25 = vcombine.low %v8941_v31, %v649_v19  ;;  %v1111_v20 = vcombine.low %v8942_v9, %v647_v45  ;;  %v8945_v31 = vld [vmem:[#allocation12_spill] sm:$0xff] }
 0x1aa   : > { %v1535_v23 = vrot.slane %v1528_v15, %v7103_v7  ;;  %v1527_v43 = vrot.slane %v1520_v30, %v7103_v7  ;;  %v1127_v21 = vrot.slane %v1120_v25, %v7054_v52  ;;  %v1118_v12 = vrot.slane %v1111_v20, %v7054_v52 }
 0x1ab   : > { %v653_v4 = vpop.permute.xlu1 %652  ;;  %v651_v18 = vpop.permute.xlu0 %650 }
 0x1ac   : > { %v1544_v48 = vcombine.low %v1527_v43, %v1535_v23  ;;  %v1138_v61 = vcombine.low %v8943_v33, %v653_v4  ;;  %v1129_v8 = vcombine.low %v8944_v60, %v651_v18  ;;  %v8946_v23 = vld [vmem:[#allocation14_spill] sm:$0xff] }
 0x1ae   : > { %v1551_v1 = vrot.slane %v1544_v48, %v7054_v52  ;;  %v1145_v32 = vrot.slane %v1138_v61, %v7054_v52  ;;  %v1136_v14 = vrot.slane %v1129_v8, %v7054_v52 }
 0x1af   : > { %v657_v10 = vpop.permute.xlu1 %656  ;;  %v655_v19 = vpop.permute.xlu0 %654 }
 0x1b0   : > { %v1552_v45 = vcombine.low %v1543_v5, %v1551_v1  ;;  %v1553_v15 = vcombine.high %v1543_v5, %v1551_v1  ;;  %v1562_v30 = vcombine.low %v1127_v21, %v1145_v32  ;;  %v1554_v26 = vcombine.low %v1118_v12, %v1136_v14 }
 0x1b1   : > { %v1156_v9 = vcombine.low %v8945_v31, %v657_v10  ;;  %v1147_v43 = vcombine.low %v8946_v23, %v655_v19 }
 0x1b2   : > { %6144 = vmatmul.mubr.msk.f32.gmra.mrb[4].mxu0 %vm4118_vm0, %v1552_v45  ;;  %6172 = vmatmul.mubr.msk.f32.gmra.mrb[4].mxu1 %vm4118_vm0, %v1553_v15  ;;  %v1569_v5 = vrot.slane %v1562_v30, %v7103_v7  ;;  %v1561_v33 = vrot.slane %v1554_v26, %v7103_v7 }
 0x1b3   : > { %v661_v25 = vpop.permute.xlu1 %660  ;;  %v659_v20 = vpop.permute.xlu0 %658  ;;  %v1163_v4 = vrot.slane %v1156_v9, %v7054_v52  ;;  %v1154_v8 = vrot.slane %v1147_v43, %v7054_v52 }
 0x1b4   : > { %v1174_v18 = vcombine.low %v7514_v35, %v661_v25  ;;  %v1165_v48 = vcombine.low %v7517_v41, %v659_v20  ;;  %v1586_v19 = vcombine.low %v1561_v33, %v1569_v5  ;;  %v8948_v33 = vld [vmem:[#allocation15_spill] sm:$0xff] }
 0x1b6   : > { %v1181_v61 = vrot.slane %v1174_v18, %v7054_v52  ;;  %v1172_v60 = vrot.slane %v1165_v48, %v7054_v52  ;;  %v8947_v48 = vld [vmem:[#allocation13_spill] sm:$0xff] }
 0x1b7   : > { %v665_v21 = vpop.permute.xlu1 %664  ;;  %v663_v12 = vpop.permute.xlu0 %662 }
 0x1b8   : > { %v1578_v1 = vcombine.low %v1163_v4, %v1181_v61  ;;  %v1570_v32 = vcombine.low %v1154_v8, %v1172_v60  ;;  %v1192_v14 = vcombine.low %v7532_v39, %v665_v21  ;;  %v1183_v10 = vcombine.low %v7535_v51, %v663_v12 }
 0x1b9   : > { %v1593_v39 = vrot.slane %v1586_v19, %v7054_v52 }
 0x1ba   : > { %v1585_v35 = vrot.slane %v1578_v1, %v7103_v7  ;;  %v1577_v41 = vrot.slane %v1570_v32, %v7103_v7  ;;  %v1199_v45 = vrot.slane %v1192_v14, %v7054_v52  ;;  %v1190_v31 = vrot.slane %v1183_v10, %v7054_v52 }
 0x1bb   : > { %v669_v15 = vpop.permute.xlu1 %668  ;;  %v667_v30 = vpop.permute.xlu0 %666 }
 0x1bc   : > { %v1594_v26 = vcombine.low %v1577_v41, %v1585_v35  ;;  %v1210_v9 = vcombine.low %v7550_v22, %v669_v15  ;;  %v1201_v23 = vcombine.low %v7553_v16, %v667_v30 }
 0x1be   : > { %v1217_v51 = vrot.slane %v1210_v9, %v7054_v52  ;;  %v1208_v43 = vrot.slane %v1201_v23, %v7054_v52  ;;  %v1601_v25 = vrot.slane %v1594_v26, %v7054_v52 }
 0x1bf   : > { %v673_v20 = vpop.permute.xlu1 %672  ;;  %v671_v4 = vpop.permute.xlu0 %670 }
 0x1c0   : > { %v1612_v8 = vcombine.low %v1199_v45, %v1217_v51  ;;  %v1604_v18 = vcombine.low %v1190_v31, %v1208_v43  ;;  %v1228_v5 = vcombine.low %v8947_v48, %v673_v20  ;;  %v1219_v61 = vcombine.low %v8948_v33, %v671_v4 }
 0x1c1   : > { %v1602_v60 = vcombine.low %v1593_v39, %v1601_v25  ;;  %v1603_v22 = vcombine.high %v1593_v39, %v1601_v25 }
 0x1c2   : > { %v1619_v16 = vrot.slane %v1612_v8, %v7103_v7  ;;  %v1611_v21 = vrot.slane %v1604_v18, %v7103_v7  ;;  %v1235_v32 = vrot.slane %v1228_v5, %v7054_v52  ;;  %v1226_v14 = vrot.slane %v1219_v61, %v7054_v52 }
 0x1c3   : > { %v677_v12 = vpop.permute.xlu1 %676  ;;  %6146 = vmatprep.mubr.msk.f32.mxu0 %vm4118_vm0, %v1602_v60  ;;  %6174 = vmatprep.mubr.msk.f32.mxu1 %vm4118_vm0, %v1603_v22  ;;  %v675_v1 = vpop.permute.xlu0 %674 }
 0x1c4   : > { %v1246_v10 = vcombine.low %v7583_v57, %v677_v12  ;;  %v1237_v19 = vcombine.low %v7586_v44, %v675_v1  ;;  %v1636_v45 = vcombine.low %v1611_v21, %v1619_v16 }
 0x1c6   : > { %v1253_v35 = vrot.slane %v1246_v10, %v7054_v52  ;;  %v1244_v41 = vrot.slane %v1237_v19, %v7054_v52  ;;  %v1643_v23 = vrot.slane %v1636_v45, %v7054_v52 }
 0x1c7   : > { %v3017_v39 = vpop.permute.xlu1 %3016  ;;  %v3015_v25 = vpop.permute.xlu0 %3014 }
 0x1c8   : > { %v1628_v15 = vcombine.low %v1235_v32, %v1253_v35  ;;  %v1620_v30 = vcombine.low %v1226_v14, %v1244_v41  ;;  %v3152_v60 = vcombine.low %v7598_v36, %v3017_v39  ;;  %v3143_v16 = vcombine.low %v7601_v17, %v3015_v25 }
 0x1ca   : > { %v1635_v26 = vrot.slane %v1628_v15, %v7103_v7  ;;  %v1627_v31 = vrot.slane %v1620_v30, %v7103_v7 }
 0x1cb   : > { %v3021_v44 = vpop.permute.xlu1 %3020  ;;  %v3019_v4 = vpop.permute.xlu0 %3018 }
 0x1cc   : > { %v1644_v9 = vcombine.low %v1627_v31, %v1635_v26  ;;  %v3170_v22 = vcombine.low %v7622_v0, %v3021_v44  ;;  %v3161_v12 = vcombine.low %v7625_v62, %v3019_v4  ;;  %v3159_v62 = vrot.slane %v3152_v60, %v7054_v52 }
 0x1ce   : > { %v1651_v51 = vrot.slane %v1644_v9, %v7054_v52 }
 0x1cf   : > { %v3025_v20 = vpop.permute.xlu1 %3024  ;;  %v3023_v18 = vpop.permute.xlu0 %3022 }
 0x1d0   : > { %v1652_v57 = vcombine.low %v1643_v23, %v1651_v51  ;;  %v1653_v43 = vcombine.high %v1643_v23, %v1651_v51  ;;  %v3188_v21 = vcombine.low %v7638_v46, %v3025_v20  ;;  %v3179_v32 = vcombine.low %v7641_v55, %v3023_v18 }
 0x1d1   : > { %v3150_v55 = vrot.slane %v3143_v16, %v7054_v52 }
 0x1d2   : > { %6147 = vmatmul.mubr.msk.f32.gmra.mrb[6].mxu0 %vm4118_vm0, %v1652_v57  ;;  %6175 = vmatmul.mubr.msk.f32.gmra.mrb[6].mxu1 %vm4118_vm0, %v1653_v43  ;;  %v3195_v41 = vrot.slane %v3188_v21, %v7054_v52 }
 0x1d4   : > { %v3029_v8 = vpop.permute.xlu1 %3028  ;;  %v3027_v5 = vpop.permute.xlu0 %3026 }
 0x1d5   : > { %v3206_v1 = vcombine.low %v7654_v53, %v3029_v8  ;;  %v3197_v19 = vcombine.low %v7657_v49, %v3027_v5  ;;  %v3177_v53 = vrot.slane %v3170_v22, %v7054_v52 }
 0x1d7   : > { %v3213_v49 = vrot.slane %v3206_v1, %v7054_v52  ;;  %v3726_v51 = vcombine.low %v3159_v62, %v3177_v53 }
 0x1d8   : > { %v3033_v48 = vpop.permute.xlu1 %3032  ;;  %v3031_v61 = vpop.permute.xlu0 %3030 }
 0x1d9   : > { %v3224_v10 = vcombine.low %v7672_v38, %v3033_v48  ;;  %v3215_v0 = vcombine.low %v7675_v63, %v3031_v61  ;;  %v3168_v38 = vrot.slane %v3161_v12, %v7054_v52  ;;  %v3742_v44 = vcombine.low %v3195_v41, %v3213_v49 }
 0x1db   : > { %v3231_v63 = vrot.slane %v3224_v10, %v7054_v52  ;;  %v3222_v26 = vrot.slane %v3215_v0, %v7054_v52  ;;  %v3718_v43 = vcombine.low %v3150_v55, %v3168_v38  ;;  %v3749_v60 = vrot.slane %v3742_v44, %v7103_v7 }
 0x1dc   : > { %v3037_v33 = vpop.permute.xlu1 %3036  ;;  %v3035_v36 = vpop.permute.xlu0 %3034 }
 0x1dd   : > { %v3242_v35 = vcombine.low %v7686_v6, %v3037_v33  ;;  %v3233_v46 = vcombine.low %v7689_v24, %v3035_v36  ;;  %v3186_v6 = vrot.slane %v3179_v32, %v7054_v52  ;;  %v3725_v61 = vrot.slane %v3718_v43, %v7103_v7 }
 0x1df   : > { %v3249_v24 = vrot.slane %v3242_v35, %v7054_v52  ;;  %v3240_v9 = vrot.slane %v3233_v46, %v7054_v52 }
 0x1e0   : > { %v3041_v14 = vpop.permute.xlu1 %3040  ;;  %v3039_v30 = vpop.permute.xlu0 %3038 }
 0x1e1   : > { %v3260_v17 = vcombine.low %v7698_v29, %v3041_v14  ;;  %v3204_v29 = vrot.slane %v3197_v19, %v7054_v52  ;;  %v3251_v23 = vcombine.low %v7705_v59, %v3039_v30  ;;  %v3776_v20 = vcombine.low %v3231_v63, %v3249_v24 }
 0x1e2   : > { %v3768_v8 = vcombine.low %v3222_v26, %v3240_v9  ;;  %v3733_v59 = vrot.slane %v3726_v51, %v7103_v7 }
 0x1e3   : > { %v3267_v31 = vrot.slane %v3260_v17, %v7054_v52  ;;  %v3734_v25 = vcombine.low %v3186_v6, %v3204_v29  ;;  %v3258_v18 = vrot.slane %v3251_v23, %v7054_v52  ;;  %v3783_v16 = vrot.slane %v3776_v20, %v7103_v7 }
 0x1e4   : > { %v3045_v45 = vpop.permute.xlu1 %3044  ;;  %v3043_v4 = vpop.permute.xlu0 %3042  ;;  %v3775_v21 = vrot.slane %v3768_v8, %v7103_v7  ;;  %v3750_v10 = vcombine.low %v3725_v61, %v3733_v59 }
 0x1e5   : > { %v3278_v15 = vcombine.low %v7714_v42, %v3045_v45  ;;  %v3269_v48 = vcombine.low %v7720_v50, %v3043_v4  ;;  %v3741_v22 = vrot.slane %v3734_v25, %v7103_v7 }
 0x1e6   : > { %v3800_v35 = vcombine.low %v3775_v21, %v3783_v16  ;;  %v3757_v46 = vrot.slane %v3750_v10, %v7054_v52 }
 0x1e7   : > { %v3285_v39 = vrot.slane %v3278_v15, %v7054_v52  ;;  %v3276_v5 = vrot.slane %v3269_v48, %v7054_v52  ;;  %v3758_v19 = vcombine.low %v3741_v22, %v3749_v60 }
 0x1e8   : > { %v3047_v57 = vpop.permute.xlu1 %3046  ;;  %v3049_v14 = vpop.permute.xlu0 %3048  ;;  %v3807_v53 = vrot.slane %v3800_v35, %v7054_v52  ;;  %v8950_v35 = vld [vmem:[#allocation20_spill] sm:$0xff] }
 0x1e9   : > { %v3792_v42 = vcombine.low %v3267_v31, %v3285_v39  ;;  %v3784_v1 = vcombine.low %v3258_v18, %v3276_v5  ;;  %v3765_v62 = vrot.slane %v3758_v19, %v7054_v52  ;;  %v3287_v15 = vcombine.low %v7730_v11, %v3047_v57 }
 0x1ea   : > { %v3296_v31 = vcombine.low %v7737_v2, %v3049_v14 }
 0x1eb   : > { %v3799_v12 = vrot.slane %v3792_v42, %v7103_v7  ;;  %v3791_v50 = vrot.slane %v3784_v1, %v7103_v7  ;;  %v3766_v38 = vcombine.low %v3757_v46, %v3765_v62  ;;  %v3767_v6 = vcombine.high %v3757_v46, %v3765_v62  ;;  %v8951_v62 = vld [vmem:[#allocation11_spill] sm:$0xff] }
 0x1ec   : > { %v3051_v33 = vpop.permute.xlu1 %3050  ;;  %v3055_v17 = vpop.permute.xlu0 %3054  ;;  %v3294_v2 = vrot.slane %v3287_v15, %v7054_v52  ;;  %v3303_v44 = vrot.slane %v3296_v31, %v7054_v52 }
 0x1ed   : > { %v3808_v36 = vcombine.low %v3791_v50, %v3799_v12  ;;  %v3305_v30 = vcombine.low %v7748_v3, %v3051_v33  ;;  %v3323_v39 = vcombine.low %v7753_v13, %v3055_v17  ;;  %v8949_v12 = vld [vmem:[#allocation10_spill] sm:$0xff] }
 0x1ef   : > { %v3815_v55 = vrot.slane %v3808_v36, %v7054_v52 }
 0x1f0   : > { %v3053_v32 = vpop.permute.xlu1 %3052  ;;  %v3059_v63 = vpop.permute.xlu0 %3058 }
 0x1f1   : > { %v3816_v49 = vcombine.low %v3807_v53, %v3815_v55  ;;  %v3817_v45 = vcombine.high %v3807_v53, %v3815_v55  ;;  %v3314_v26 = vcombine.low %v7762_v40, %v3053_v32  ;;  %v3341_v43 = vcombine.low %v7769_v27, %v3059_v63 }
 0x1f2   : > { %v3330_v27 = vrot.slane %v3323_v39, %v7054_v52 }
 0x1f3   : > { %v6281_v29 = vpack.c.bf16 %v3816_v49, %v3766_v38  ;;  %v6297_v24 = vpack.c.bf16 %v3817_v45, %v3767_v6  ;;  %v3321_v57 = vrot.slane %v3314_v26, %v7054_v52  ;;  %v3348_v20 = vrot.slane %v3341_v43, %v7054_v52 }
 0x1f4   : > { %v3057_v0 = vpop.permute.xlu1 %3056 }
 0x1f5   : > { %v3332_v9 = vcombine.low %v7780_v34, %v3057_v0  ;;  %6282 = vmatprep.subr.bf16.mxu0 %v6281_v29  ;;  %6298 = vmatprep.subr.bf16.mxu1 %v6297_v24  ;;  %v3063_v11 = vpop.permute.xlu0 %3062  ;;  %v3312_v34 = vrot.slane %v3305_v30, %v7054_v52  ;;  %v3826_v5 = vcombine.low %v3303_v44, %v3321_v57 }
 0x1f6   : > { %6284 = vmatpush3.bf16.msra.mxu0 %v6281_v29  ;;  %6300 = vmatpush3.bf16.msra.mxu1 %v6297_v24  ;;  %v3359_v40 = vcombine.low %v7785_v54, %v3063_v11  ;;  %v3834_v60 = vcombine.low %v3330_v27, %v3348_v20 }
 0x1f7   : > { %v3339_v13 = vrot.slane %v3332_v9, %v7054_v52  ;;  %v3818_v48 = vcombine.low %v3294_v2, %v3312_v34 }
 0x1f8   : > { %v3061_v41 = vpop.permute.xlu1 %3060  ;;  %v3366_v8 = vrot.slane %v3359_v40, %v7054_v52  ;;  %v3841_v10 = vrot.slane %v3834_v60, %v7103_v7 }
 0x1f9   : > { %v3350_v51 = vcombine.low %v7794_v56, %v3061_v41  ;;  %v3067_v54 = vpop.permute.xlu0 %3066  ;;  %v3825_v50 = vrot.slane %v3818_v48, %v7103_v7  ;;  %v8066_v48 = vld [vmem:[%s6709_s4 + $0x82] sm:$0x1] }
 0x1fa   : > { %v3377_v42 = vcombine.low %v7803_v37, %v3067_v54  ;;  %v3833_v37 = vrot.slane %v3826_v5, %v7103_v7  ;;  %v8071_v5 = vld [vmem:[%s6709_s4 + $0x8a] sm:$0x1] }
 0x1fb   : > { %v3357_v25 = vrot.slane %v3350_v51, %v7054_v52 }
 0x1fc   : > { %v3065_v23 = vpop.permute.xlu1 %3064  ;;  %v3384_v33 = vrot.slane %v3377_v42, %v7054_v52  ;;  %v3850_v38 = vcombine.low %v3825_v50, %v3833_v37  ;;  %v8112_v50 = vld [vmem:[%s6709_s4 + $0x9a] sm:$0x1]  ;;  %v8119_v37 = vld [vmem:[%s6709_s4 + $0xae] sm:$0x1] }
 0x1fd   : > { %v3368_v3 = vcombine.low %v7812_v28, %v3065_v23  ;;  %v3842_v61 = vcombine.low %v3339_v13, %v3357_v25  ;;  %v3071_v16 = vpop.permute.xlu0 %3070 }
 0x1fe   : > { %v3868_v21 = vcombine.low %v3366_v8, %v3384_v33  ;;  %v3395_v1 = vcombine.low %v8949_v12, %v3071_v16  ;;  %v3857_v15 = vrot.slane %v3850_v38, %v7054_v52  ;;  %v8076_v33 = vld [vmem:[%s6709_s4 + $0x8e] sm:$0x1]  ;;  %v8095_v16 = vld [vmem:[%s6709_s4 + $0x9e] sm:$0x1]  ;;  %v8102_v12 = vld [vmem:[%s6709_s4 + $0x92] sm:$0x1] }
 0x1ff   : > { %v3375_v4 = vrot.slane %v3368_v3, %v7054_v52  ;;  %v3849_v14 = vrot.slane %v3842_v61, %v7103_v7  ;;  %v8084_v61 = vld [vmem:[%s6709_s4 + $0x86] sm:$0x1]  ;;  %v8170_v38 = vld [vmem:[%s6709_s4 + $0xc2] sm:$0x1] }
 0x200   : > { %v3069_v56 = vpop.permute.xlu1 %3068  ;;  %v3875_v17 = vrot.slane %v3868_v21, %v7103_v7  ;;  %v3402_v46 = vrot.slane %v3395_v1, %v7054_v52  ;;  %v8109_v1 = vld [vmem:[%s6709_s4 + $0xa6] sm:$0x1] }
 0x201   : > { %v3386_v28 = vcombine.low %v7826_v47, %v3069_v56  ;;  %v3075_v0 = vpop.permute.xlu0 %3074  ;;  %v3858_v49 = vcombine.low %v3841_v10, %v3849_v14  ;;  %v8129_v14 = vld [vmem:[%s6709_s4 + $0xb6] sm:$0x1]  ;;  %v8132_v10 = vld [vmem:[%s6709_s4 + $0xaa] sm:$0x1] }
 0x202   : > { %v3413_v53 = vcombine.low %v8951_v62, %v3075_v0 }
 0x203   : > { %v3393_v18 = vrot.slane %v3386_v28, %v7054_v52  ;;  %v3865_v30 = vrot.slane %v3858_v49, %v7054_v52  ;;  %v8175_v49 = vld [vmem:[%s6709_s4 + $0xca] sm:$0x1] }
 0x204   : > { %v3420_v41 = vrot.slane %v3413_v53, %v7054_v52 }
 0x205   : > { %v3073_v59 = vpop.permute.xlu1 %3072  ;;  %v3876_v47 = vcombine.low %v3375_v4, %v3393_v18  ;;  %v3866_v9 = vcombine.low %v3857_v15, %v3865_v30  ;;  %v3867_v39 = vcombine.high %v3857_v15, %v3865_v30 }
 0x206   : > { %v3404_v22 = vcombine.low %v7844_v58, %v3073_v59  ;;  %v3884_v63 = vcombine.low %v3402_v46, %v3420_v41  ;;  %v8081_v59 = vld [vmem:[%s6709_s4 + $0x96] sm:$0x1] }
 0x207   : > { %v3883_v58 = vrot.slane %v3876_v47, %v7103_v7 }
 0x208   : > { %v3411_v19 = vrot.slane %v3404_v22, %v7054_v52  ;;  %v3891_v24 = vrot.slane %v3884_v63, %v7103_v7 }
 0x209   : > { %v3077_v32 = vpop.permute.xlu1 %3076  ;;  %v3900_v45 = vcombine.low %v3875_v17, %v3883_v58 }
 0x20a   : > { %v3422_v36 = vcombine.low %v8950_v35, %v3077_v32  ;;  %v8122_v32 = vld [vmem:[%s6709_s4 + $0xa2] sm:$0x1]  ;;  %v8142_v35 = vld [vmem:[%s6709_s4 + $0xb2] sm:$0x1] }
 0x20b   : > { %v3907_v31 = vrot.slane %v3900_v45, %v7054_v52  ;;  %v8180_v45 = vld [vmem:[%s6709_s4 + $0xce] sm:$0x1] }
 0x20c   : > { %v3429_v55 = vrot.slane %v3422_v36, %v7054_v52  ;;  %v8149_v36 = vld [vmem:[%s6709_s4 + $0xba] sm:$0x1] }
 0x20e   : > { %v3892_v6 = vcombine.low %v3411_v19, %v3429_v55  ;;  %v8139_v19 = vld [vmem:[%s6709_s4 + $0xbe] sm:$0x1] }
 0x210   : > { %v3899_v29 = vrot.slane %v3892_v6, %v7103_v7 }
 0x212   : > { %v3908_v26 = vcombine.low %v3891_v24, %v3899_v29 }
 0x214   : > { %v3915_v23 = vrot.slane %v3908_v26, %v7054_v52  ;;  %v8190_v26 = vld [vmem:[%s6709_s4 + $0xd6] sm:$0x1] }
 0x216   : > { %v3916_v51 = vcombine.low %v3907_v31, %v3915_v23  ;;  %v3917_v43 = vcombine.high %v3907_v31, %v3915_v23  ;;  %v8193_v31 = vld [vmem:[%s6709_s4 + $0xc6] sm:$0x1] }
 0x218   : > { %v6285_v11 = vpack.c.bf16 %v3916_v51, %v3866_v9  ;;  %v6301_v3 = vpack.c.bf16 %v3917_v43, %v3867_v39  ;;  %v8201_v39 = vld [vmem:[%s6709_s4 + $0xde] sm:$0x1]  ;;  %v8204_v51 = vld [vmem:[%s6709_s4 + $0xd2] sm:$0x1] }
 0x21a   : > { %6286 = vmatprep.subr.bf16.mxu0 %v6285_v11  ;;  %6302 = vmatprep.subr.bf16.mxu1 %v6301_v3 }
 0x21b   : > { %6288 = vmatpush3.bf16.msra.mxu0 %v6285_v11  ;;  %6304 = vmatpush3.bf16.msra.mxu1 %v6301_v3  ;;  %v8211_v11 = vld [vmem:[%s6709_s4 + $0xe6] sm:$0x1]  ;;  %v8214_v3 = vld [vmem:[%s6709_s4 + $0xda] sm:$0x1] }
 0x244   : > { %v8033_v40 = vpop.f32.mrb[0].mxu0  ;;  %v8035_v2 = vpop.f32.mrb[0].mxu1 }
 0x245   : > { %8952 = vst [vmem:[#allocation21_spill] sm:$0xff] %v8035_v2  ;;  %v8037_v34 = vpop.f32.mrb[1].mxu0  ;;  %v4428_v57 = vsel %vm4118_vm0, %v8033_v40, -inf  ;;  %v8041_v44 = vpop.f32.mrb[1].mxu1  ;;  %v4452_v56 = vsel %vm4118_vm0, %v8035_v2, -inf }
 0x246   : > { %4429 = vmax.xlane.f32.xlu0 %v4428_v57  ;;  %v4449_v13 = vsel %vm4118_vm0, %v8041_v44, -inf  ;;  %v4425_v27 = vsel %vm4118_vm0, %v8037_v34, -inf  ;;  %v8223_v57 = vld [vmem:[%s6709_s4 + $0xee] sm:$0x1] }
 0x247   : > { %4450 = vmax.xlane.f32.xlu1 %v4449_v13  ;;  %v8235_v13 = vld [vmem:[%s6709_s4 + $0xf6] sm:$0x1] }
 0x24a   : > { %4453 = vmax.xlane.f32.xlu0 %v4452_v56  ;;  %v8238_v56 = vld [vmem:[%s6709_s4 + $0xea] sm:$0x1] }
 0x24e   : > { %4426 = vmax.xlane.f32.xlu0 %v4425_v27 }
 0x265   : > { %v8049_v25 = vpop.f32.mrb[2].mxu0  ;;  %v8051_v20 = vpop.f32.mrb[2].mxu1 }
 0x266   : > { %v8053_v28 = vpop.f32.mrb[3].mxu0  ;;  %v8055_v54 = vpop.f32.mrb[3].mxu1  ;;  %v4434_v42 = vsel %vm4118_vm0, %v8049_v25, -inf  ;;  %v4458_v18 = vsel %vm4118_vm0, %v8051_v20, -inf }
 0x267   : > { %8953 = vst [vmem:[#allocation18_spill] sm:$0xff] %v8055_v54  ;;  %v4455_v4 = vsel %vm4118_vm0, %v8055_v54, -inf  ;;  %v4431_v8 = vsel %vm4118_vm0, %v8053_v28, -inf }
 0x268   : > { %4456 = vmax.xlane.f32.xlu1 %v4455_v4  ;;  %4432 = vmax.xlane.f32.xlu0 %v4431_v8  ;;  %v8249_v4 = vld [vmem:[%s6709_s4 + $0xfe] sm:$0x1]  ;;  %v8252_v8 = vld [vmem:[%s6709_s4 + $0xf2] sm:$0x1] }
 0x269   : > { %8958 = vst [vmem:[#allocation25_spill] sm:$0xff] %v8249_v4 }
 0x26c   : > { %4435 = vmax.xlane.f32.xlu0 %v4434_v42  ;;  %v8259_v42 = vld [vmem:[%s6709_s4 + $0xfa] sm:$0x1] }
 0x26d   : > { %8959 = vst [vmem:[#allocation26_spill] sm:$0xff] %v8259_v42 }
 0x270   : > { %4459 = vmax.xlane.f32.xlu0 %v4458_v18 }
 0x279   : > { %3078 = vrot.lane.b32.xlu1 %v8066_v48, %s6493_s5 }
 0x27d   : > { %3082 = vrot.lane.b32.xlu1 %v8071_v5, %s6493_s5 }
 0x281   : > { %3084 = vrot.lane.b32.xlu1 %v8076_v33, %s6493_s5 }
 0x285   : > { %3088 = vrot.lane.b32.xlu1 %v8081_v59, %s6493_s5  ;;  %v8088_v60 = vpop.f32.mrb[4].mxu0  ;;  %v8090_v22 = vpop.f32.mrb[4].mxu1 }
 0x286   : > { %8954 = vst [vmem:[#allocation19_spill] sm:$0xff] %v8090_v22  ;;  %3080 = vrot.lane.b32.xlu0 %v8084_v61, %s6493_s5  ;;  %v8097_v47 = vpop.f32.mrb[5].mxu0  ;;  %v8099_v21 = vpop.f32.mrb[5].mxu1  ;;  %v4440_v55 = vsel %vm4118_vm0, %v8088_v60, -inf  ;;  %v4464_v41 = vsel %vm4118_vm0, %v8090_v22, -inf }
 0x287   : > { %8955 = vst [vmem:[#allocation22_spill] sm:$0xff] %v8099_v21  ;;  %v4461_v62 = vsel %vm4118_vm0, %v8099_v21, -inf  ;;  %v4437_v53 = vsel %vm4118_vm0, %v8097_v47, -inf }
 0x289   : > { %3092 = vrot.lane.b32.xlu1 %v8095_v16, %s6493_s5 }
 0x28a   : > { %3086 = vrot.lane.b32.xlu0 %v8102_v12, %s6493_s5 }
 0x28d   : > { %3096 = vrot.lane.b32.xlu1 %v8109_v1, %s6493_s5 }
 0x28e   : > { %3090 = vrot.lane.b32.xlu0 %v8112_v50, %s6493_s5 }
 0x291   : > { %3100 = vrot.lane.b32.xlu1 %v8119_v37, %s6493_s5 }
 0x292   : > { %3094 = vrot.lane.b32.xlu0 %v8122_v32, %s6493_s5 }
 0x295   : > { %3104 = vrot.lane.b32.xlu1 %v8129_v14, %s6493_s5 }
 0x296   : > { %3098 = vrot.lane.b32.xlu0 %v8132_v10, %s6493_s5 }
 0x299   : > { %3108 = vrot.lane.b32.xlu1 %v8139_v19, %s6493_s5 }
 0x29a   : > { %3102 = vrot.lane.b32.xlu0 %v8142_v35, %s6493_s5 }
 0x29e   : > { %3106 = vrot.lane.b32.xlu0 %v8149_v36, %s6493_s5 }
 0x2a5   : > { %v8153_v0 = vpop.f32.mrb[6].mxu0  ;;  %v8155_v58 = vpop.f32.mrb[6].mxu1 }
 0x2a6   : > { %v8157_v17 = vpop.f32.mrb[7].mxu0  ;;  %v8159_v46 = vpop.f32.mrb[7].mxu1 }
 0x2bd   : > { %4462 = vmax.xlane.f32.xlu1 %v4461_v62  ;;  %4438 = vmax.xlane.f32.xlu0 %v4437_v53 }
 0x2c1   : > { %4441 = vmax.xlane.f32.xlu0 %v4440_v55 }
 0x2c5   : > { %4465 = vmax.xlane.f32.xlu0 %v4464_v41 }
 0x2ce   : > { %3110 = vrot.lane.b32.xlu1 %v8170_v38, %s6493_s5 }
 0x2d2   : > { %3114 = vrot.lane.b32.xlu1 %v8175_v49, %s6493_s5 }
 0x2d3   : > { %v4430_v6 = vpop.xlane.xlu0 %4429 }
 0x2d4   : > { %v4451_v63 = vpop.xlane.xlu1 %4450  ;;  %v4474_v22 = vsub.f32 %v8033_v40, %v4430_v6  ;;  %v4467_v40 = vsel %vm4118_vm0, %v8159_v46, -inf }
 0x2d5   : > { %v4481_v29 = vsub.f32 %v8041_v44, %v4451_v63  ;;  %v8228_v44 = vld [vmem:[%s6709_s4 + $0xe2] sm:$0x1] }
 0x2d6   : > { %3116 = vrot.lane.b32.xlu1 %v8180_v45, %s6493_s5 }
 0x2d7   : > { %v8185_v24 = vpop.xlane.xlu0 %4453  ;;  %v4505_v15 = vmul.f32 1.442695, %v4481_v29 }
 0x2d8   : > { %8956 = vst [vmem:[#allocation23_spill] sm:$0xff] %v8185_v24 }
 0x2d9   : > { %6373 = vpow2.f32 %v4505_v15 }
 0x2da   : > { %3120 = vrot.lane.b32.xlu1 %v8190_v26, %s6493_s5 }
 0x2db   : > { %v4427_v9 = vpop.xlane.xlu0 %4426  ;;  %3112 = vrot.lane.b32.xlu0 %v8193_v31, %s6493_s5 }
 0x2dc   : > { %v4473_v23 = vsub.f32 %v8037_v34, %v4427_v9 }
 0x2de   : > { %v4489_v43 = vmul.f32 1.442695, %v4473_v23  ;;  %3124 = vrot.lane.b32.xlu1 %v8201_v39, %s6493_s5 }
 0x2df   : > { %3118 = vrot.lane.b32.xlu0 %v8204_v51, %s6493_s5 }
 0x2e0   : > { %6375 = vpow2.f32 %v4489_v43 }
 0x2e2   : > { %3128 = vrot.lane.b32.xlu1 %v8211_v11, %s6493_s5 }
 0x2e3   : > { %v8218_v34 = vpop.eup %6373  ;;  %3122 = vrot.lane.b32.xlu0 %v8214_v3, %s6493_s5 }
 0x2e4   : > { %8957 = vst [vmem:[#allocation24_spill] sm:$0xff] %v8218_v34  ;;  %6221 = vmatprep.mubr.msk.f32.mxu1 %vm4118_vm0, %v8218_v34 }
 0x2e6   : > { %3132 = vrot.lane.b32.xlu1 %v8223_v57, %s6493_s5 }
 0x2e7   : > { %3126 = vrot.lane.b32.xlu0 %v8228_v44, %s6493_s5 }
 0x2ea   : > { %v8240_v27 = vpop.eup %6375  ;;  %3136 = vrot.lane.b32.xlu1 %v8235_v13, %s6493_s5 }
 0x2eb   : > { %6193 = vmatprep.mubr.msk.f32.mxu0 %vm4118_vm0, %v8240_v27  ;;  %3130 = vrot.lane.b32.xlu0 %v8238_v56, %s6493_s5 }
 0x2ee   : > { %3140 = vrot.lane.b32.xlu1 %v8249_v4, %s6493_s5 }
 0x2ef   : > { %3134 = vrot.lane.b32.xlu0 %v8252_v8, %s6493_s5 }
 0x2f3   : > { %3138 = vrot.lane.b32.xlu0 %v8259_v42, %s6493_s5 }
 0x2f5   : > { %v8263_v18 = vpop.xlane.xlu1 %4456  ;;  %v4433_v62 = vpop.xlane.xlu0 %4432 }
 0x2f6   : > { %8960 = vst [vmem:[#allocation27_spill] sm:$0xff] %v8263_v18  ;;  %v4475_v43 = vsub.f32 %v8053_v28, %v4433_v62  ;;  %v4491_v18 = vmul.f32 1.442695, %v4474_v22  ;;  %v4443_v22 = vsel %vm4118_vm0, %v8157_v17, -inf }
 0x2f8   : > { %v4493_v21 = vmul.f32 1.442695, %v4475_v43 }
 0x2f9   : > { %v3079_v55 = vpop.permute.xlu1 %3078  ;;  %v4436_v41 = vpop.xlane.xlu0 %4435 }
 0x2fa   : > { %v4476_v53 = vsub.f32 %v8049_v25, %v4436_v41  ;;  %6377 = vpow2.f32 %v4493_v21 }
 0x2fb   : > { %6379 = vpow2.f32 %v4491_v18 }
 0x2fd   : > { %v3083_v63 = vpop.permute.xlu1 %3082  ;;  %v8267_v29 = vpop.xlane.xlu0 %4459 }
 0x2fe   : > { %8961 = vst [vmem:[#allocation28_spill] sm:$0xff] %v8267_v29  ;;  %v4495_v29 = vmul.f32 1.442695, %v4476_v53  ;;  %v4446_v53 = vsel %vm4118_vm0, %v8153_v0, -inf }
 0x300   : > { %6381 = vpow2.f32 %v4495_v29  ;;  %v4521_v29 = vsel %vm4118_vm0, %v8240_v27, 0.0 }
 0x301   : > { %v3085_v9 = vpop.permute.xlu1 %3084  ;;  %v3081_v23 = vpop.permute.xlu0 %3080 }
 0x302   : > { %v3458_v28 = vcombine.low %v8076_v33, %v3085_v9  ;;  %v3440_v62 = vcombine.low %v8084_v61, %v3081_v23 }
 0x305   : > { %v3089_v30 = vpop.permute.xlu1 %3088  ;;  %v3087_v34 = vpop.permute.xlu0 %3086 }
 0x306   : > { %v3476_v6 = vcombine.low %v8081_v59, %v3089_v30  ;;  %v3467_v25 = vcombine.low %v8102_v12, %v3087_v34  ;;  %v3431_v12 = vcombine.low %v8066_v48, %v3079_v55  ;;  %v8303_v55 = vpop.eup %6377 }
 0x307   : > { %v8314_v27 = vpop.eup %6379 }
 0x309   : > { %v3093_v24 = vpop.permute.xlu1 %3092  ;;  %v3091_v2 = vpop.permute.xlu0 %3090 }
 0x30a   : > { %v3494_v54 = vcombine.low %v8095_v16, %v3093_v24  ;;  %v3485_v15 = vcombine.low %v8112_v50, %v3091_v2  ;;  %v3449_v16 = vcombine.low %v8071_v5, %v3083_v63  ;;  %v3465_v5 = vrot.slane %v3458_v28, %v7054_v52 }
 0x30c   : > { %v3501_v2 = vrot.slane %v3494_v54, %v7054_v52  ;;  %v3492_v24 = vrot.slane %v3485_v15, %v7054_v52  ;;  %v3447_v54 = vrot.slane %v3440_v62, %v7054_v52  ;;  %v3438_v15 = vrot.slane %v3431_v12, %v7054_v52 }
 0x30d   : > { %v3097_v42 = vpop.permute.xlu1 %3096  ;;  %v3095_v4 = vpop.permute.xlu0 %3094 }
 0x30e   : > { %v3512_v21 = vcombine.low %v8109_v1, %v3097_v42  ;;  %v3503_v33 = vcombine.low %v8122_v32, %v3095_v4  ;;  %v3483_v1 = vrot.slane %v3476_v6, %v7054_v52  ;;  %v3474_v32 = vrot.slane %v3467_v25, %v7054_v52 }
 0x30f   : > { %v3926_v9 = vcombine.low %v3447_v54, %v3465_v5  ;;  %v8327_v5 = vpop.eup %6381 }
 0x310   : > { %v3510_v4 = vrot.slane %v3503_v33, %v7054_v52  ;;  %v3942_v41 = vcombine.low %v3483_v1, %v3501_v2  ;;  %v3934_v63 = vcombine.low %v3474_v32, %v3492_v24 }
 0x311   : > { %v3101_v61 = vpop.permute.xlu1 %3100  ;;  %v3099_v50 = vpop.permute.xlu0 %3098 }
 0x312   : > { %v3530_v18 = vcombine.low %v8119_v37, %v3101_v61  ;;  %v3521_v59 = vcombine.low %v8132_v10, %v3099_v50  ;;  %4468 = vmax.xlane.f32.xlu1 %v4467_v40  ;;  %4444 = vmax.xlane.f32.xlu0 %v4443_v22  ;;  %v3456_v37 = vrot.slane %v3449_v16, %v7054_v52  ;;  %v4470_v22 = vsel %vm4118_vm0, %v8155_v58, -inf }
 0x313   : > { %v3519_v10 = vrot.slane %v3512_v21, %v7054_v52  ;;  %v4527_v16 = vsel %vm4118_vm0, %v8303_v55, 0.0  ;;  %v3949_v2 = vrot.slane %v3942_v41, %v7103_v7  ;;  %v3941_v21 = vrot.slane %v3934_v63, %v7103_v7 }
 0x314   : > { %v3537_v30 = vrot.slane %v3530_v18, %v7054_v52  ;;  %v3528_v34 = vrot.slane %v3521_v59, %v7054_v52  ;;  %v3918_v40 = vcombine.low %v3438_v15, %v3456_v37 }
 0x315   : > { %v3105_v48 = vpop.permute.xlu1 %3104  ;;  %v3103_v42 = vpop.permute.xlu0 %3102  ;;  %v3958_v54 = vcombine.low %v3941_v21, %v3949_v2 }
 0x316   : > { %4447 = vmax.xlane.f32.xlu0 %v4446_v53  ;;  %v3976_v23 = vcombine.low %v3519_v10, %v3537_v30  ;;  %v3968_v43 = vcombine.low %v3510_v4, %v3528_v34  ;;  %4522 = vadd.xlane.f32.xlu1 %v4521_v29  ;;  %v3548_v28 = vcombine.low %v8129_v14, %v3105_v48  ;;  %v4530_v4 = vsel %vm4118_vm0, %v8327_v5, 0.0 }
 0x317   : > { %v3539_v62 = vcombine.low %v8142_v35, %v3103_v42  ;;  %v3933_v35 = vrot.slane %v3926_v9, %v7103_v7  ;;  %v3965_v42 = vrot.slane %v3958_v54, %v7054_v52 }
 0x318   : > { %v3983_v61 = vrot.slane %v3976_v23, %v7103_v7  ;;  %v3975_v50 = vrot.slane %v3968_v43, %v7103_v7  ;;  %v3555_v24 = vrot.slane %v3548_v28, %v7054_v52 }
 0x319   : > { %v3109_v6 = vpop.permute.xlu1 %3108  ;;  %v3107_v25 = vpop.permute.xlu0 %3106  ;;  %v3546_v18 = vrot.slane %v3539_v62, %v7054_v52 }
 0x31a   : > { %v3566_v33 = vcombine.low %v8139_v19, %v3109_v6  ;;  %v3557_v14 = vcombine.low %v8149_v36, %v3107_v25  ;;  %4471 = vmax.xlane.f32.xlu0 %v4470_v22  ;;  %4528 = vadd.xlane.f32.xlu1 %v4527_v16  ;;  %v4524_v19 = vsel %vm4118_vm0, %v8314_v27, 0.0  ;;  %v3925_v36 = vrot.slane %v3918_v40, %v7103_v7 }
 0x31b   : > { %v4000_v34 = vcombine.low %v3975_v50, %v3983_v61 }
 0x31c   : > { %v3573_v59 = vrot.slane %v3566_v33, %v7054_v52  ;;  %v3564_v12 = vrot.slane %v3557_v14, %v7054_v52  ;;  %v3950_v30 = vcombine.low %v3925_v36, %v3933_v35 }
 0x31d   : > { %v4007_v41 = vrot.slane %v4000_v34, %v7054_v52 }
 0x31e   : > { %v3992_v1 = vcombine.low %v3555_v24, %v3573_v59  ;;  %v3984_v32 = vcombine.low %v3546_v18, %v3564_v12  ;;  %4525 = vadd.xlane.f32.xlu0 %v4524_v19  ;;  %v3957_v53 = vrot.slane %v3950_v30, %v7054_v52 }
 0x320   : > { %v3999_v37 = vrot.slane %v3992_v1, %v7103_v7  ;;  %v3991_v10 = vrot.slane %v3984_v32, %v7103_v7  ;;  %v3966_v29 = vcombine.low %v3957_v53, %v3965_v42  ;;  %v3967_v9 = vcombine.high %v3957_v53, %v3965_v42 }
 0x322   : > { %v4008_v48 = vcombine.low %v3991_v10, %v3999_v37  ;;  %4531 = vadd.xlane.f32.xlu0 %v4530_v4 }
 0x324   : > { %v4015_v63 = vrot.slane %v4008_v48, %v7054_v52 }
 0x326   : > { %v4016_v15 = vcombine.low %v4007_v41, %v4015_v63  ;;  %v4017_v23 = vcombine.high %v4007_v41, %v4015_v63 }
 0x328   : > { %v6289_v43 = vpack.c.bf16 %v4016_v15, %v3966_v29  ;;  %v6305_v28 = vpack.c.bf16 %v4017_v23, %v3967_v9 }
 0x32a   : > { %6290 = vmatprep.subr.bf16.mxu0 %v6289_v43  ;;  %6306 = vmatprep.subr.bf16.mxu1 %v6305_v28 }
 0x32b   : > { %6292 = vmatpush3.bf16.msra.mxu0 %v6289_v43  ;;  %6308 = vmatpush3.bf16.msra.mxu1 %v6305_v28 }
 0x34a   : > { %v8340_v62 = vpop.xlane.xlu1 %4462  ;;  %v4439_v40 = vpop.xlane.xlu0 %4438 }
 0x34b   : > { %v4477_v6 = vsub.f32 %v8097_v47, %v4439_v40 }
 0x34d   : > { %v4497_v25 = vmul.f32 1.442695, %v4477_v6 }
 0x34e   : > { %v3111_v22 = vpop.permute.xlu1 %3110  ;;  %v4442_v16 = vpop.xlane.xlu0 %4441 }
 0x34f   : > { %v4478_v2 = vsub.f32 %v8088_v60, %v4442_v16  ;;  %6383 = vpow2.f32 %v4497_v25 }
 0x351   : > { %v4499_v21 = vmul.f32 1.442695, %v4478_v2 }
 0x352   : > { %v3115_v33 = vpop.permute.xlu1 %3114  ;;  %v8344_v14 = vpop.xlane.xlu0 %4465 }
 0x353   : > { %6385 = vpow2.f32 %v4499_v21  ;;  %v3593_v4 = vcombine.low %v8175_v49, %v3115_v33 }
 0x355   : > { %v3600_v15 = vrot.slane %v3593_v4, %v7054_v52 }
 0x356   : > { %v3117_v35 = vpop.permute.xlu1 %3116  ;;  %v3113_v61 = vpop.permute.xlu0 %3112 }
 0x357   : > { %v3602_v30 = vcombine.low %v8180_v45, %v3117_v35  ;;  %v3584_v34 = vcombine.low %v8193_v31, %v3113_v61 }
 0x359   : > { %v8346_v50 = vpop.eup %6383  ;;  %v3591_v49 = vrot.slane %v3584_v34, %v7054_v52 }
 0x35a   : > { %v3121_v24 = vpop.permute.xlu1 %3120  ;;  %v3119_v18 = vpop.permute.xlu0 %3118  ;;  %v4533_v47 = vsel %vm4118_vm0, %v8346_v50, 0.0 }
 0x35b   : > { %4534 = vadd.xlane.f32.xlu1 %v4533_v47  ;;  %v3620_v37 = vcombine.low %v8190_v26, %v3121_v24  ;;  %v3611_v10 = vcombine.low %v8204_v51, %v3119_v18  ;;  %v3575_v26 = vcombine.low %v8170_v38, %v3111_v22  ;;  %v3609_v51 = vrot.slane %v3602_v30, %v7054_v52  ;;  %v8962_v24 = vld [vmem:[#allocation25_spill] sm:$0xff]  ;;  %v8963_v47 = vld [vmem:[#allocation26_spill] sm:$0xff]  ;;  %v8965_v30 = vld [vmem:[#allocation23_spill] sm:$0xff] }
 0x35d   : > { %v8350_v59 = vpop.eup %6385  ;;  %v3582_v28 = vrot.slane %v3575_v26, %v7054_v52  ;;  %v4026_v40 = vcombine.low %v3591_v49, %v3609_v51 }
 0x35e   : > { %v3125_v12 = vpop.permute.xlu1 %3124  ;;  %v3123_v60 = vpop.permute.xlu0 %3122  ;;  %v4536_v19 = vsel %vm4118_vm0, %v8350_v59, 0.0 }
 0x35f   : > { %4537 = vadd.xlane.f32.xlu0 %v4536_v19  ;;  %v3638_v1 = vcombine.low %v8201_v39, %v3125_v12  ;;  %v3629_v32 = vcombine.low %v8214_v3, %v3123_v60  ;;  %v4018_v2 = vcombine.low %v3582_v28, %v3600_v15  ;;  %v4033_v60 = vrot.slane %v4026_v40, %v7103_v7 }
 0x361   : > { %v3645_v39 = vrot.slane %v3638_v1, %v7054_v52  ;;  %v3636_v3 = vrot.slane %v3629_v32, %v7054_v52  ;;  %v8964_v32 = vld [vmem:[#allocation21_spill] sm:$0xff] }
 0x362   : > { %v3129_v36 = vpop.permute.xlu1 %3128  ;;  %v3127_v54 = vpop.permute.xlu0 %3126  ;;  %v8966_v34 = vsub.f32 %v8964_v32, %v8965_v30 }
 0x363   : > { %v3656_v48 = vcombine.low %v8211_v11, %v3129_v36  ;;  %v3647_v42 = vcombine.low %v8228_v44, %v3127_v54  ;;  %v3627_v11 = vrot.slane %v3620_v37, %v7054_v52  ;;  %v3618_v44 = vrot.slane %v3611_v10, %v7054_v52 }
 0x364   : > { %v4507_v37 = vmul.f32 1.442695, %v8966_v34  ;;  %v4025_v10 = vrot.slane %v4018_v2, %v7103_v7 }
 0x365   : > { %v4042_v23 = vcombine.low %v3627_v11, %v3645_v39  ;;  %v4034_v43 = vcombine.low %v3618_v44, %v3636_v3 }
 0x366   : > { %v3133_v53 = vpop.permute.xlu1 %3132  ;;  %v3131_v41 = vpop.permute.xlu0 %3130  ;;  %v4050_v26 = vcombine.low %v4025_v10, %v4033_v60  ;;  %6387 = vpow2.f32 %v4507_v37 }
 0x367   : > { %v3674_v45 = vcombine.low %v8223_v57, %v3133_v53  ;;  %v3665_v31 = vcombine.low %v8238_v56, %v3131_v41  ;;  %v3663_v57 = vrot.slane %v3656_v48, %v7054_v52  ;;  %v3654_v56 = vrot.slane %v3647_v42, %v7054_v52  ;;  %v8967_v53 = vld [vmem:[#allocation18_spill] sm:$0xff]  ;;  %v8968_v41 = vld [vmem:[#allocation27_spill] sm:$0xff] }
 0x368   : > { %v4049_v35 = vrot.slane %v4042_v23, %v7103_v7  ;;  %v4041_v61 = vrot.slane %v4034_v43, %v7103_v7  ;;  %v8969_v39 = vsub.f32 %v8967_v53, %v8968_v41 }
 0x369   : > { %v3681_v63 = vrot.slane %v3674_v45, %v7054_v52  ;;  %v3672_v29 = vrot.slane %v3665_v31, %v7054_v52  ;;  %v8970_v45 = vld [vmem:[#allocation22_spill] sm:$0xff] }
 0x36a   : > { %v3137_v9 = vpop.permute.xlu1 %3136  ;;  %v3135_v38 = vpop.permute.xlu0 %3134  ;;  %v4058_v4 = vcombine.low %v4041_v61, %v4049_v35  ;;  %v4509_v3 = vmul.f32 1.442695, %v8969_v39  ;;  %v4485_v31 = vsub.f32 %v8970_v45, %v8340_v62  ;;  %v4057_v62 = vrot.slane %v4050_v26, %v7054_v52 }
 0x36b   : > { %v4076_v6 = vcombine.low %v3663_v57, %v3681_v63  ;;  %v4068_v25 = vcombine.low %v3654_v56, %v3672_v29  ;;  %v3692_v22 = vcombine.low %v8235_v13, %v3137_v9  ;;  %v3683_v16 = vcombine.low %v8252_v8, %v3135_v38  ;;  %v8971_v29 = vld [vmem:[#allocation28_spill] sm:$0xff]  ;;  %v8973_v56 = vld [vmem:[#allocation19_spill] sm:$0xff] }
 0x36c   : > { %v4065_v63 = vrot.slane %v4058_v4, %v7054_v52  ;;  %6389 = vpow2.f32 %v4509_v3  ;;  %v8972_v15 = vsub.f32 %v8051_v20, %v8971_v29  ;;  %v4486_v9 = vsub.f32 %v8973_v56, %v8344_v14 }
 0x36d   : > { %v4083_v19 = vrot.slane %v4076_v6, %v7103_v7  ;;  %v4075_v36 = vrot.slane %v4068_v25, %v7103_v7  ;;  %v3699_v13 = vrot.slane %v3692_v22, %v7054_v52  ;;  %v3690_v8 = vrot.slane %v3683_v16, %v7054_v52 }
 0x36e   : > { %v3141_v21 = vpop.permute.xlu1 %3140  ;;  %v3139_v33 = vpop.permute.xlu0 %3138  ;;  %v4511_v57 = vmul.f32 1.442695, %v8972_v15  ;;  %v4513_v38 = vmul.f32 1.442695, %v4485_v31  ;;  %v4066_v28 = vcombine.low %v4057_v62, %v4065_v63  ;;  %v4067_v6 = vcombine.high %v4057_v62, %v4065_v63 }
 0x36f   : > { %v3710_v18 = vcombine.low %v8962_v24, %v3141_v21  ;;  %v3701_v12 = vcombine.low %v8963_v47, %v3139_v33  ;;  %v4100_v51 = vcombine.low %v4075_v36, %v4083_v19  ;;  %v4515_v22 = vmul.f32 1.442695, %v4486_v9 }
 0x370   : > { %6391 = vpow2.f32 %v4511_v57  ;;  %v6388_v14 = vpop.eup %6387 }
 0x371   : > { %v3717_v54 = vrot.slane %v3710_v18, %v7054_v52  ;;  %v3708_v1 = vrot.slane %v3701_v12, %v7054_v52  ;;  %v4107_v23 = vrot.slane %v4100_v51, %v7054_v52  ;;  %6393 = vpow2.f32 %v4513_v38 }
 0x372   : > { %6395 = vpow2.f32 %v4515_v22 }
 0x373   : > { %v4092_v48 = vcombine.low %v3699_v13, %v3717_v54  ;;  %v4084_v42 = vcombine.low %v3690_v8, %v3708_v1  ;;  %v8974_v8 = vld [vmem:[#allocation24_spill] sm:$0xff]  ;;  %v4548_v1 = vsel %vm4118_vm0, %v6388_v14, 0.0 }
 0x374   : > { %v4545_v54 = vsel %vm4118_vm0, %v8974_v8, 0.0 }
 0x375   : > { %v4099_v49 = vrot.slane %v4092_v48, %v7103_v7  ;;  %v4091_v11 = vrot.slane %v4084_v42, %v7103_v7 }
 0x376   : > { %v6390_v2 = vpop.eup %6389 }
 0x377   : > { %v4108_v44 = vcombine.low %v4091_v11, %v4099_v49  ;;  %v4551_v32 = vsel %vm4118_vm0, %v6390_v2, 0.0 }
 0x379   : > { %v4115_v43 = vrot.slane %v4108_v44, %v7054_v52 }
 0x37a   : > { %v6392_v21 = vpop.eup %6391 }
 0x37b   : > { %v4116_v40 = vcombine.low %v4107_v23, %v4115_v43  ;;  %v4117_v25 = vcombine.high %v4107_v23, %v4115_v43  ;;  %v6394_v33 = vpop.eup %6393  ;;  %v4554_v30 = vsel %vm4118_vm0, %v6392_v21, 0.0 }
 0x37c   : > { %v4557_v34 = vsel %vm4118_vm0, %v6394_v33, 0.0 }
 0x37d   : > { %v6293_v16 = vpack.c.bf16 %v4116_v40, %v4066_v28  ;;  %v6309_v20 = vpack.c.bf16 %v4117_v25, %v4067_v6 }
 0x37f   : > { %6294 = vmatprep.subr.bf16.mxu0 %v6293_v16  ;;  %6310 = vmatprep.subr.bf16.mxu1 %v6309_v20 }
 0x380   : > { %6296 = vmatpush3.bf16.msra.mxu0 %v6293_v16  ;;  %6312 = vmatpush3.bf16.msra.mxu1 %v6309_v20 }
 0x383   : > { %6194 = vmatmul.mubr.msk.f32.vlgmr.msra.gmra.mrb[8].mxu0 %vm4118_vm0, %v8314_v27  ;;  %6222 = vmatmul.mubr.msk.f32.vlgmr.msra.gmra.mrb[8].mxu1 %vm4118_vm0, %v6388_v14  ;;  %v6396_v27 = vpop.eup %6395 }
 0x384   : > { %6196 = vmatprep.mubr.msk.f32.mxu0 %vm4118_vm0, %v8303_v55  ;;  %6224 = vmatprep.mubr.msk.f32.mxu1 %vm4118_vm0, %v6390_v2  ;;  %v4560_v37 = vsel %vm4118_vm0, %v6396_v27, 0.0  ;;  %v6496_v2 = vmov 0.0  }
 0x387   : > { %6197 = vmatmul.mubr.msk.f32.gmra.mrb[10].mxu0 %vm4118_vm0, %v8327_v5  ;;  %6225 = vmatmul.mubr.msk.f32.gmra.mrb[10].mxu1 %vm4118_vm0, %v6392_v21 }
 0x388   : > { %6199 = vmatprep.mubr.msk.f32.mxu0 %vm4118_vm0, %v8346_v50  ;;  %6227 = vmatprep.mubr.msk.f32.mxu1 %vm4118_vm0, %v6394_v33 }
 0x38b   : > { %6200 = vmatmul.mubr.msk.f32.gmra.mrb[12].mxu0 %vm4118_vm0, %v8350_v59  ;;  %6228 = vmatmul.mubr.msk.f32.gmra.mrb[12].mxu1 %vm4118_vm0, %v6396_v27 }
 0x39f   : > { %v4469_v55 = vpop.xlane.xlu1 %4468  ;;  %v4445_v35 = vpop.xlane.xlu0 %4444 }
 0x3a0   : > { %v4487_v61 = vsub.f32 %v8159_v46, %v4469_v55  ;;  %v4479_v24 = vsub.f32 %v8157_v17, %v4445_v35 }
 0x3a2   : > { %v4517_v5 = vmul.f32 1.442695, %v4487_v61  ;;  %v4501_v18 = vmul.f32 1.442695, %v4479_v24 }
 0x3a3   : > { %v4448_v47 = vpop.xlane.xlu0 %4447  ;;  %v4523_v48 = vpop.xlane.xlu1 %4522 }
 0x3a4   : > { %6397 = vpow2.f32 %v4517_v5  ;;  %v4480_v50 = vsub.f32 %v8153_v0, %v4448_v47 }
 0x3a5   : > { %6399 = vpow2.f32 %v4501_v18 }
 0x3a6   : > { %v4503_v12 = vmul.f32 1.442695, %v4480_v50 }
 0x3a7   : > { %v4472_v60 = vpop.xlane.xlu0 %4471  ;;  %v4529_v53 = vpop.xlane.xlu1 %4528 }
 0x3a8   : > { %6401 = vpow2.f32 %v4503_v12  ;;  %v4488_v59 = vsub.f32 %v8155_v58, %v4472_v60 }
 0x3aa   : > { %v4519_v19 = vmul.f32 1.442695, %v4488_v59 }
 0x3ab   : > { %v4526_v42 = vpop.xlane.xlu0 %4525 }
 0x3ac   : > { %6403 = vpow2.f32 %v4519_v19 }
 0x3ad   : > { %6405 = vrcp.f32 %v4523_v48 }
 0x3ae   : > { %v6398_v36 = vpop.eup %6397  ;;  %6407 = vrcp.f32 %v4529_v53 }
 0x3af   : > { %v6400_v13 = vpop.eup %6399  ;;  %6230 = vmatprep.mubr.msk.f32.mxu1 %vm4118_vm0, %v6398_v36  ;;  %v4563_v10 = vsel %vm4118_vm0, %v6398_v36, 0.0  ;;  %v4532_v41 = vpop.xlane.xlu0 %4531  ;;  %6409 = vrcp.f32 %v4526_v42 }
 0x3b0   : > { %6202 = vmatprep.mubr.msk.f32.mxu0 %vm4118_vm0, %v6400_v13  ;;  %v4539_v17 = vsel %vm4118_vm0, %v6400_v13, 0.0 }
 0x3b1   : > { %4540 = vadd.xlane.f32.xlu1 %v4539_v17 }
 0x3b2   : > { %v6402_v46 = vpop.eup %6401 }
 0x3b3   : > { %6203 = vmatmul.mubr.msk.f32.gmra.mrb[14].mxu0 %vm4118_vm0, %v6402_v46  ;;  %v4542_v0 = vsel %vm4118_vm0, %v6402_v46, 0.0 }
 0x3b4   : > { %4543 = vadd.xlane.f32.xlu0 %v4542_v0 }
 0x3b5   : > { %4546 = vadd.xlane.f32.xlu1 %v4545_v54 }
 0x3b6   : > { %v6404_v58 = vpop.eup %6403 }
 0x3b7   : > { %6231 = vmatmul.mubr.msk.f32.gmra.mrb[14].mxu1 %vm4118_vm0, %v6404_v58  ;;  %v4566_v4 = vsel %vm4118_vm0, %v6404_v58, 0.0  ;;  %v6406_v29 = vpop.eup %6405 }
 0x3b8   : > { %4549 = vadd.xlane.f32.xlu0 %v4548_v1  ;;  %v8445_v15 = vpop.eup %6407 }
 0x3b9   : > { %4552 = vadd.xlane.f32.xlu1 %v4551_v32  ;;  %v6410_v56 = vpop.eup %6409 }
 0x3bc   : > { %4555 = vadd.xlane.f32.xlu0 %v4554_v30 }
 0x3bd   : > { %4558 = vadd.xlane.f32.xlu1 %v4557_v34 }
 0x3c0   : > { %4561 = vadd.xlane.f32.xlu0 %v4560_v37 }
 0x3c1   : > { %4564 = vadd.xlane.f32.xlu1 %v4563_v10 }
 0x3c4   : > { %4567 = vadd.xlane.f32.xlu0 %v4566_v4 }
 0x3e8   : > { %v4535_v39 = vpop.xlane.xlu1 %4534 }
 0x3ec   : > { %v4538_v3 = vpop.xlane.xlu0 %4537 }
 0x43e   : > { %v4541_v45 = vpop.xlane.xlu1 %4540 }
 0x441   : > { %v4544_v31 = vpop.xlane.xlu0 %4543 }
 0x442   : > { %v4547_v26 = vpop.xlane.xlu1 %4546 }
 0x445   : > { %v4550_v51 = vpop.xlane.xlu0 %4549 }
 0x446   : > { %v4553_v49 = vpop.xlane.xlu1 %4552  ;;  %6411 = vrcp.f32 %v4550_v51 }
 0x447   : > { %6413 = vrcp.f32 %v4547_v26 }
 0x448   : > { %6415 = vrcp.f32 %v4532_v41 }
 0x449   : > { %v4556_v11 = vpop.xlane.xlu0 %4555  ;;  %6417 = vrcp.f32 %v4535_v39 }
 0x44a   : > { %v4559_v44 = vpop.xlane.xlu1 %4558  ;;  %6419 = vrcp.f32 %v4538_v3 }
 0x44b   : > { %6421 = vrcp.f32 %v4541_v45 }
 0x44c   : > { %6423 = vrcp.f32 %v4544_v31 }
 0x44d   : > { %v4562_v63 = vpop.xlane.xlu0 %4561  ;;  %6425 = vrcp.f32 %v4553_v49 }
 0x44e   : > { %6427 = vrcp.f32 %v4556_v11  ;;  %v4565_v57 = vpop.xlane.xlu1 %4564 }
 0x44f   : > { %6429 = vrcp.f32 %v4559_v44 }
 0x450   : > { %v6412_v38 = vpop.eup %6411  ;;  %6431 = vrcp.f32 %v4562_v63 }
 0x451   : > { %v4568_v9 = vpop.xlane.xlu0 %4567  ;;  %v6414_v43 = vpop.eup %6413  ;;  %6433 = vrcp.f32 %v4565_v57 }
 0x452   : > { %v8447_v22 = vpop.eup %6415  ;;  %6435 = vrcp.f32 %v4568_v9 }
 0x453   : > { %v8449_v14 = vpop.eup %6417 }
 0x454   : > { %v8455_v35 = vpop.eup %6419 }
 0x455   : > { %v8461_v12 = vpop.eup %6421 }
 0x456   : > { %v6195_v62 = vpop.f32.mrb[8].mxu0  ;;  %v6223_v23 = vpop.f32.mrb[8].mxu1 }
 0x457   : > { %v4844_v28 = vmul.f32 %v6410_v56, %v6195_v62  ;;  %v4852_v40 = vmul.f32 %v6412_v38, %v6223_v23  ;;  %v4659_v6 = vpop.f32.mrb[9].mxu0  ;;  %v4788_v25 = vpop.f32.mrb[9].mxu1 }
 0x458   : > { %v4843_v16 = vmul.f32 %v6406_v29, %v4659_v6  ;;  %v4851_v20 = vmul.f32 %v6414_v43, %v4788_v25  ;;  %v8465_v46 = vpop.eup %6423 }
 0x459   : > { %v4925_v21 = vcombine.high %v4844_v28, %v6496_v2  ;;  %v4932_v33 = vrot.slane %v4844_v28, %v7103_v7  ;;  %v4940_v27 = vcombine.high %v4852_v40, %v6496_v2  ;;  %v4947_v55 = vrot.slane %v4852_v40, %v7103_v7  ;;  %v6426_v1 = vpop.eup %6425 }
 0x45a   : > { %v4859_v61 = vcombine.high %v4843_v16, %v6496_v2  ;;  %v4866_v24 = vrot.slane %v4843_v16, %v7103_v7  ;;  %v4874_v5 = vcombine.high %v4851_v20, %v6496_v2  ;;  %v4881_v18 = vrot.slane %v4851_v20, %v7103_v7  ;;  %v6198_v47 = vpop.f32.mrb[10].mxu0  ;;  %v6226_v50 = vpop.f32.mrb[10].mxu1 }
 0x45b   : > { %v4939_v60 = vrot.slane %v4925_v21, %v7103_v7  ;;  %v4954_v59 = vrot.slane %v4940_v27, %v7103_v7  ;;  %v4955_v19 = vcombine.low %v4932_v33, %v4947_v55  ;;  %v4956_v36 = vcombine.high %v4932_v33, %v4947_v55  ;;  %v4669_v13 = vpop.f32.mrb[11].mxu0  ;;  %v4798_v17 = vpop.f32.mrb[11].mxu1 }
 0x45c   : > { %v4873_v0 = vrot.slane %v4859_v61, %v7103_v7  ;;  %v4888_v8 = vrot.slane %v4874_v5, %v7103_v7  ;;  %v4889_v54 = vcombine.low %v4866_v24, %v4881_v18  ;;  %v4890_v58 = vcombine.high %v4866_v24, %v4881_v18  ;;  %v6428_v10 = vpop.eup %6427 }
 0x45d   : > { %v4963_v32 = vrot.slane %v4955_v19, %v7054_v52  ;;  %v4970_v30 = vrot.slane %v4956_v36, %v7054_v52  ;;  %v4971_v34 = vcombine.low %v4939_v60, %v4954_v59  ;;  %v4972_v37 = vcombine.high %v4939_v60, %v4954_v59  ;;  %v8477_v3 = vpop.eup %6429 }
 0x45e   : > { %v4897_v4 = vrot.slane %v4889_v54, %v7054_v52  ;;  %v4904_v48 = vrot.slane %v4890_v58, %v7054_v52  ;;  %v4905_v42 = vcombine.low %v4873_v0, %v4888_v8  ;;  %v4906_v53 = vcombine.high %v4873_v0, %v4888_v8  ;;  %v8473_v41 = vpop.f32.mrb[12].mxu0  ;;  %v8475_v39 = vpop.f32.mrb[12].mxu1 }
 0x45f   : > { %v4979_v45 = vrot.slane %v4971_v34, %v7054_v52  ;;  %v4986_v31 = vrot.slane %v4972_v37, %v7054_v52  ;;  %v5437_v26 = vcombine.low %v4963_v32, %v4970_v30  ;;  %v6038_v51 = vcombine.high %v4963_v32, %v4970_v30  ;;  %v8481_v49 = vpop.f32.mrb[13].mxu0  ;;  %v8483_v11 = vpop.f32.mrb[13].mxu1 }
 0x460   : > { %v8485_v44 = vpop.eup %6431  ;;  %v4913_v63 = vrot.slane %v4905_v42, %v7054_v52  ;;  %v4920_v29 = vrot.slane %v4906_v53, %v7054_v52  ;;  %v5387_v57 = vcombine.low %v4897_v4, %v4904_v48  ;;  %v6036_v56 = vcombine.high %v4897_v4, %v4904_v48 }
 0x461   : > { %v8489_v9 = vpop.eup %6433  ;;  %v8492_v38 = vrot.slane %v5437_v26, %v7103_v7  ;;  %v8495_v62 = vrot.slane %v6038_v51, %v7103_v7  ;;  %v5453_v23 = vcombine.low %v4979_v45, %v4986_v31  ;;  %v6039_v43 = vcombine.high %v4979_v45, %v4986_v31 }
 0x462   : > { %v8497_v28 = vpop.eup %6435  ;;  %v8500_v40 = vrot.slane %v5387_v57, %v7103_v7  ;;  %v8503_v6 = vrot.slane %v6036_v56, %v7103_v7  ;;  %v5403_v25 = vcombine.low %v4913_v63, %v4920_v29  ;;  %v6037_v16 = vcombine.high %v4913_v63, %v4920_v29 }
 0x463   : > { %v8506_v20 = vrot.slane %v5453_v23, %v7103_v7  ;;  %v8509_v21 = vrot.slane %v6039_v43, %v7103_v7  ;;  %v4846_v33 = vmul.f32 %v8447_v22, %v6198_v47  ;;  %v4854_v27 = vmul.f32 %v6428_v10, %v6226_v50 }
 0x464   : > { %v8513_v55 = vrot.slane %v5403_v25, %v7103_v7  ;;  %v8516_v61 = vrot.slane %v6037_v16, %v7103_v7  ;;  %v4845_v24 = vmul.f32 %v8445_v15, %v4669_v13  ;;  %v4853_v5 = vmul.f32 %v6426_v1, %v4798_v17 }
 0x465   : > { %v5057_v18 = vcombine.high %v4846_v33, %v6496_v2  ;;  %v5064_v60 = vrot.slane %v4846_v33, %v7103_v7  ;;  %v5072_v59 = vcombine.high %v4854_v27, %v6496_v2  ;;  %v5079_v19 = vrot.slane %v4854_v27, %v7103_v7 }
 0x466   : > { %v4991_v22 = vcombine.high %v4845_v24, %v6496_v2  ;;  %v4998_v47 = vrot.slane %v4845_v24, %v7103_v7  ;;  %v5006_v50 = vcombine.high %v4853_v5, %v6496_v2  ;;  %v5013_v36 = vrot.slane %v4853_v5, %v7103_v7 }
 0x467   : > { %v5071_v0 = vrot.slane %v5057_v18, %v7103_v7  ;;  %v5086_v15 = vrot.slane %v5072_v59, %v7103_v7  ;;  %v5087_v13 = vcombine.low %v5064_v60, %v5079_v19  ;;  %v5088_v17 = vcombine.high %v5064_v60, %v5079_v19 }
 0x468   : > { %v5005_v8 = vrot.slane %v4991_v22, %v7103_v7  ;;  %v5020_v54 = vrot.slane %v5006_v50, %v7103_v7  ;;  %v5021_v58 = vcombine.low %v4998_v47, %v5013_v36  ;;  %v5022_v1 = vcombine.high %v4998_v47, %v5013_v36 }
 0x469   : > { %v5095_v32 = vrot.slane %v5087_v13, %v7054_v52  ;;  %v5102_v30 = vrot.slane %v5088_v17, %v7054_v52  ;;  %v5103_v34 = vcombine.low %v5071_v0, %v5086_v15  ;;  %v5104_v37 = vcombine.high %v5071_v0, %v5086_v15 }
 0x46a   : > { %v5029_v10 = vrot.slane %v5021_v58, %v7054_v52  ;;  %v5036_v4 = vrot.slane %v5022_v1, %v7054_v52  ;;  %v5037_v48 = vcombine.low %v5005_v8, %v5020_v54  ;;  %v5038_v42 = vcombine.high %v5005_v8, %v5020_v54 }
 0x46b   : > { %v5111_v53 = vrot.slane %v5103_v34, %v7054_v52  ;;  %v5118_v45 = vrot.slane %v5104_v37, %v7054_v52  ;;  %v5537_v31 = vcombine.low %v5095_v32, %v5102_v30  ;;  %v6042_v26 = vcombine.high %v5095_v32, %v5102_v30 }
 0x46c   : > { %v5045_v51 = vrot.slane %v5037_v48, %v7054_v52  ;;  %v5052_v63 = vrot.slane %v5038_v42, %v7054_v52  ;;  %v5487_v29 = vcombine.low %v5029_v10, %v5036_v4  ;;  %v6040_v57 = vcombine.high %v5029_v10, %v5036_v4 }
 0x46d   : > { %v8540_v56 = vrot.slane %v5537_v31, %v7103_v7  ;;  %v8543_v23 = vrot.slane %v6042_v26, %v7103_v7  ;;  %v5553_v43 = vcombine.low %v5111_v53, %v5118_v45  ;;  %v6043_v25 = vcombine.high %v5111_v53, %v5118_v45 }
 0x46e   : > { %v8546_v16 = vrot.slane %v5487_v29, %v7103_v7  ;;  %v8549_v33 = vrot.slane %v6040_v57, %v7103_v7  ;;  %v5503_v27 = vcombine.low %v5045_v51, %v5052_v63  ;;  %v6041_v24 = vcombine.high %v5045_v51, %v5052_v63 }
 0x46f   : > { %v8552_v5 = vrot.slane %v5553_v43, %v7103_v7  ;;  %v8555_v18 = vrot.slane %v6043_v25, %v7103_v7  ;;  %v4848_v60 = vmul.f32 %v8455_v35, %v8473_v41  ;;  %v4856_v59 = vmul.f32 %v8485_v44, %v8475_v39 }
 0x470   : > { %v8562_v19 = vrot.slane %v5503_v27, %v7103_v7  ;;  %v8565_v22 = vrot.slane %v6041_v24, %v7103_v7  ;;  %v4847_v47 = vmul.f32 %v8449_v14, %v8481_v49  ;;  %v4855_v50 = vmul.f32 %v8477_v3, %v8483_v11 }
 0x471   : > { %v5189_v36 = vcombine.high %v4848_v60, %v6496_v2  ;;  %v5196_v0 = vrot.slane %v4848_v60, %v7103_v7  ;;  %v5204_v35 = vcombine.high %v4856_v59, %v6496_v2  ;;  %v5211_v41 = vrot.slane %v4856_v59, %v7103_v7 }
 0x472   : > { %v5123_v39 = vcombine.high %v4847_v47, %v6496_v2  ;;  %v5130_v44 = vrot.slane %v4847_v47, %v7103_v7  ;;  %v5138_v15 = vcombine.high %v4855_v50, %v6496_v2  ;;  %v5145_v13 = vrot.slane %v4855_v50, %v7103_v7 }
 0x473   : > { %v5203_v14 = vrot.slane %v5189_v36, %v7103_v7  ;;  %v5218_v3 = vrot.slane %v5204_v35, %v7103_v7  ;;  %v5219_v49 = vcombine.low %v5196_v0, %v5211_v41  ;;  %v5220_v11 = vcombine.high %v5196_v0, %v5211_v41 }
 0x474   : > { %v5137_v17 = vrot.slane %v5123_v39, %v7103_v7  ;;  %v5152_v8 = vrot.slane %v5138_v15, %v7103_v7  ;;  %v5153_v54 = vcombine.low %v5130_v44, %v5145_v13  ;;  %v5154_v58 = vcombine.high %v5130_v44, %v5145_v13 }
 0x475   : > { %v5227_v1 = vrot.slane %v5219_v49, %v7054_v52  ;;  %v5234_v32 = vrot.slane %v5220_v11, %v7054_v52  ;;  %v5235_v30 = vcombine.low %v5203_v14, %v5218_v3  ;;  %v5236_v34 = vcombine.high %v5203_v14, %v5218_v3 }
 0x476   : > { %v5161_v37 = vrot.slane %v5153_v54, %v7054_v52  ;;  %v5168_v10 = vrot.slane %v5154_v58, %v7054_v52  ;;  %v5169_v4 = vcombine.low %v5137_v17, %v5152_v8  ;;  %v5170_v48 = vcombine.high %v5137_v17, %v5152_v8 }
 0x477   : > { %v5243_v42 = vrot.slane %v5235_v30, %v7054_v52  ;;  %v5250_v53 = vrot.slane %v5236_v34, %v7054_v52  ;;  %v5637_v45 = vcombine.low %v5227_v1, %v5234_v32  ;;  %v6046_v31 = vcombine.high %v5227_v1, %v5234_v32 }
 0x478   : > { %v5177_v26 = vrot.slane %v5169_v4, %v7054_v52  ;;  %v5184_v51 = vrot.slane %v5170_v48, %v7054_v52  ;;  %v5587_v63 = vcombine.low %v5161_v37, %v5168_v10  ;;  %v6044_v29 = vcombine.high %v5161_v37, %v5168_v10 }
 0x479   : > { %v5644_v57 = vrot.slane %v5637_v45, %v7103_v7  ;;  %v5652_v43 = vrot.slane %v6046_v31, %v7103_v7  ;;  %v5653_v25 = vcombine.low %v5243_v42, %v5250_v53  ;;  %v6047_v27 = vcombine.high %v5243_v42, %v5250_v53 }
 0x47a   : > { %v5594_v24 = vrot.slane %v5587_v63, %v7103_v7  ;;  %v5602_v60 = vrot.slane %v6044_v29, %v7103_v7  ;;  %v5603_v59 = vcombine.low %v5177_v26, %v5184_v51  ;;  %v6045_v47 = vcombine.high %v5177_v26, %v5184_v51 }
 0x47b   : > { %v5660_v50 = vrot.slane %v5653_v25, %v7103_v7  ;;  %v5668_v36 = vrot.slane %v6047_v27, %v7103_v7  ;;  %v5469_v0 = vcombine.low %v8492_v38, %v8495_v62  ;;  %v5477_v35 = vcombine.low %v8506_v20, %v8509_v21 }
 0x47c   : > { %v5610_v41 = vrot.slane %v5603_v59, %v7103_v7  ;;  %v5618_v39 = vrot.slane %v6045_v47, %v7103_v7  ;;  %v5419_v44 = vcombine.low %v8500_v40, %v8503_v6  ;;  %v5427_v15 = vcombine.low %v8513_v55, %v8516_v61 }
 0x47d   : > { %v8608_v13 = vrot.slane %v5469_v0, %v7054_v52  ;;  %v8611_v14 = vrot.slane %v5477_v35, %v7054_v52  ;;  %v5569_v38 = vcombine.low %v8540_v56, %v8543_v23  ;;  %v5577_v62 = vcombine.low %v8552_v5, %v8555_v18 }
 0x47e   : > { %v8618_v20 = vrot.slane %v5419_v44, %v7054_v52  ;;  %v8621_v40 = vrot.slane %v5427_v15, %v7054_v52  ;;  %v5619_v6 = vcombine.low %v5594_v24, %v5602_v60  ;;  %v5627_v21 = vcombine.low %v5610_v41, %v5618_v39 }
 0x47f   : > { %v5486_v55 = vcombine.high %v8608_v13, %v8611_v14  ;;  %v8626_v61 = vrot.slane %v5569_v38, %v7054_v52  ;;  %v8629_v3 = vrot.slane %v5577_v62, %v7054_v52  ;;  %v5519_v56 = vcombine.low %v8546_v16, %v8549_v33 }
 0x480   : > { %v5436_v23 = vcombine.high %v8618_v20, %v8621_v40  ;;  %v8636_v5 = vrot.slane %v5619_v6, %v7054_v52  ;;  %v8639_v18 = vrot.slane %v5627_v21, %v7054_v52  ;;  %v5527_v49 = vcombine.low %v8562_v19, %v8565_v22 }
 0x481   : > { %5797 = vrot.lane.b32.xlu0 %v5486_v55, %s6493_s5  ;;  %v5586_v11 = vcombine.high %v8626_v61, %v8629_v3  ;;  %v8647_v17 = vrot.slane %v5519_v56, %v7054_v52  ;;  %v5669_v16 = vcombine.low %v5644_v57, %v5652_v43  ;;  %v5677_v33 = vcombine.low %v5660_v50, %v5668_v36 }
 0x482   : > { %5795 = vrot.lane.b32.xlu1 %v5436_v23, %s6493_s5  ;;  %v5636_v8 = vcombine.high %v8636_v5, %v8639_v18  ;;  %v8653_v54 = vrot.slane %v5527_v49, %v7054_v52  ;;  %v5485_v19 = vcombine.low %v8608_v13, %v8611_v14  ;;  %v5435_v22 = vcombine.low %v8618_v20, %v8621_v40 }
 0x483   : > { %v8660_v58 = vrot.slane %v5669_v16, %v7054_v52  ;;  %v8663_v1 = vrot.slane %v5677_v33, %v7054_v52  ;;  %v5585_v32 = vcombine.low %v8626_v61, %v8629_v3  ;;  %v5635_v30 = vcombine.low %v8636_v5, %v8639_v18 }
 0x484   : > { %v5536_v34 = vcombine.high %v8647_v17, %v8653_v54  ;;  %v5535_v37 = vcombine.low %v8647_v17, %v8653_v54 }
 0x485   : > { %5803 = vrot.lane.b32.xlu0 %v5636_v8, %s6493_s5  ;;  %v5686_v10 = vcombine.high %v8660_v58, %v8663_v1  ;;  %v5685_v4 = vcombine.low %v8660_v58, %v8663_v1 }
 0x486   : > { %5801 = vrot.lane.b32.xlu1 %v5586_v11, %s6493_s5  ;;  %v6204_v48 = vpop.f32.mrb[14].mxu0 }
 0x487   : > { %v4850_v42 = vmul.f32 %v8465_v46, %v6204_v48  ;;  %v4689_v53 = vpop.f32.mrb[15].mxu0 }
 0x488   : > { %v4849_v45 = vmul.f32 %v8461_v12, %v4689_v53 }
 0x489   : > { %v5321_v26 = vcombine.high %v4850_v42, %v6496_v2  ;;  %v5328_v43 = vrot.slane %v4850_v42, %v7103_v7 }
 0x48a   : > { %5799 = vrot.lane.b32.xlu1 %v5536_v34, %s6493_s5  ;;  %v6232_v31 = vpop.f32.mrb[14].mxu1  ;;  %v5255_v29 = vcombine.high %v4849_v45, %v6496_v2  ;;  %v5262_v12 = vrot.slane %v4849_v45, %v7103_v7 }
 0x48b   : > { %v4858_v51 = vmul.f32 %v8497_v28, %v6232_v31  ;;  %v4818_v63 = vpop.f32.mrb[15].mxu1  ;;  %v5335_v28 = vrot.slane %v5321_v26, %v7103_v7 }
 0x48c   : > { %v4857_v57 = vmul.f32 %v8489_v9, %v4818_v63  ;;  %v5269_v47 = vrot.slane %v5255_v29, %v7103_v7 }
 0x48d   : > { %v5336_v25 = vcombine.high %v4858_v51, %v6496_v2  ;;  %v5343_v46 = vrot.slane %v4858_v51, %v7103_v7 }
 0x48e   : > { %5805 = vrot.lane.b32.xlu1 %v5686_v10, %s6493_s5  ;;  %v5270_v27 = vcombine.high %v4857_v57, %v6496_v2  ;;  %v5277_v24 = vrot.slane %v4857_v57, %v7103_v7 }
 0x48f   : > { %v5350_v60 = vrot.slane %v5336_v25, %v7103_v7  ;;  %v5351_v59 = vcombine.low %v5328_v43, %v5343_v46  ;;  %v5352_v9 = vcombine.high %v5328_v43, %v5343_v46 }
 0x490   : > { %v5284_v50 = vrot.slane %v5270_v27, %v7103_v7  ;;  %v5285_v36 = vcombine.low %v5262_v12, %v5277_v24  ;;  %v5286_v0 = vcombine.high %v5262_v12, %v5277_v24 }
 0x491   : > { %v5359_v35 = vrot.slane %v5351_v59, %v7054_v52  ;;  %v5366_v41 = vrot.slane %v5352_v9, %v7054_v52  ;;  %v5367_v39 = vcombine.low %v5335_v28, %v5350_v60  ;;  %v5368_v2 = vcombine.high %v5335_v28, %v5350_v60 }
 0x492   : > { %v5293_v44 = vrot.slane %v5285_v36, %v7054_v52  ;;  %v5300_v15 = vrot.slane %v5286_v0, %v7054_v52  ;;  %v5301_v38 = vcombine.low %v5269_v47, %v5284_v50  ;;  %v5302_v62 = vcombine.high %v5269_v47, %v5284_v50 }
 0x493   : > { %v5375_v6 = vrot.slane %v5367_v39, %v7054_v52  ;;  %v5382_v21 = vrot.slane %v5368_v2, %v7054_v52  ;;  %v5737_v55 = vcombine.low %v5359_v35, %v5366_v41  ;;  %v6050_v56 = vcombine.high %v5359_v35, %v5366_v41 }
 0x494   : > { %v5309_v23 = vrot.slane %v5301_v38, %v7054_v52  ;;  %v5316_v49 = vrot.slane %v5302_v62, %v7054_v52  ;;  %v5687_v11 = vcombine.low %v5293_v44, %v5300_v15  ;;  %v6048_v16 = vcombine.high %v5293_v44, %v5300_v15 }
 0x495   : > { %v5744_v33 = vrot.slane %v5737_v55, %v7103_v7  ;;  %v5752_v8 = vrot.slane %v6050_v56, %v7103_v7  ;;  %v5753_v34 = vcombine.low %v5375_v6, %v5382_v21  ;;  %v6051_v10 = vcombine.high %v5375_v6, %v5382_v21 }
 0x496   : > { %v5694_v48 = vrot.slane %v5687_v11, %v7103_v7  ;;  %v5702_v42 = vrot.slane %v6048_v16, %v7103_v7  ;;  %v5703_v53 = vcombine.low %v5309_v23, %v5316_v49  ;;  %v6049_v45 = vcombine.high %v5309_v23, %v5316_v49 }
 0x497   : > { %v5760_v31 = vrot.slane %v5753_v34, %v7103_v7  ;;  %v5768_v26 = vrot.slane %v6051_v10, %v7103_v7  ;;  %v5769_v51 = vcombine.low %v5744_v33, %v5752_v8 }
 0x498   : > { %v5710_v63 = vrot.slane %v5703_v53, %v7103_v7  ;;  %v5718_v29 = vrot.slane %v6049_v45, %v7103_v7  ;;  %v5719_v57 = vcombine.low %v5694_v48, %v5702_v42 }
 0x499   : > { %v5777_v43 = vcombine.low %v5760_v31, %v5768_v26  ;;  %v5776_v46 = vrot.slane %v5769_v51, %v7054_v52 }
 0x49a   : > { %v5727_v25 = vcombine.low %v5710_v63, %v5718_v29  ;;  %v5726_v27 = vrot.slane %v5719_v57, %v7054_v52 }
 0x49b   : > { %v5784_v12 = vrot.slane %v5777_v43, %v7054_v52 }
 0x49c   : > { %v5734_v24 = vrot.slane %v5727_v25, %v7054_v52 }
 0x49d   : > { %v5786_v28 = vcombine.high %v5776_v46, %v5784_v12  ;;  %v5785_v60 = vcombine.low %v5776_v46, %v5784_v12 }
 0x49e   : > { %v5736_v59 = vcombine.high %v5726_v27, %v5734_v24  ;;  %v5735_v9 = vcombine.low %v5726_v27, %v5734_v24 }
 0x49f   : > { %5809 = vrot.lane.b32.xlu1 %v5786_v28, %s6493_s5 }
 0x4a0   : > { %5807 = vrot.lane.b32.xlu0 %v5736_v59, %s6493_s5 }
 0x4f3   : > { %v5798_v7 = vpop.permute.xlu0 %5797 }
 0x4f4   : > { %v5820_v47 = vsel %vm4118_vm0, %v5485_v19, %v5798_v7  ;;  %v5796_v50 = vpop.permute.xlu1 %5795 }
 0x4f5   : > { %5828 = vst [vmem:[%s8725_s16 + $0x8] sm:$0xff] %v5820_v47  ;;  %v5819_v52 = vsel %vm4118_vm0, %v5435_v22, %v5796_v50 }
 0x4f6   : > { %5827 = vst [vmem:[%s8725_s16] sm:$0xff] %v5819_v52 }
 0x4f7   : > { %v5804_v13 = vpop.permute.xlu0 %5803 }
 0x4f8   : > { %v5802_v14 = vpop.permute.xlu1 %5801  ;;  %v5823_v19 = vsel %vm4118_vm0, %v5635_v30, %v5804_v13 }
 0x4f9   : > { %v5822_v36 = vsel %vm4118_vm0, %v5585_v32, %v5802_v14  ;;  %5831 = vst [vmem:[%s8725_s16 + $0x20] sm:$0xff] %v5823_v19 }
 0x4fa   : > { %5830 = vst [vmem:[%s8725_s16 + $0x18] sm:$0xff] %v5822_v36 }
 0x4fc   : > { %v5800_v20 = vpop.permute.xlu1 %5799  ;;  %v5889_v54 = vld [vmem:[%s8725_s16 + $0x8] sm:$0xff] (%p6555_p6) }
 0x4fd   : > { %v5821_v40 = vsel %vm4118_vm0, %v5535_v37, %v5800_v20  ;;  %v5887_v17 = vld [vmem:[%s8725_s16] sm:$0xff] (%p6555_p6)  ;;  %5890 = vst [vmem:[%s5845_s22 + $0x10] sm:$0xff] (%p6555_p6), %v5889_v54 }
 0x4fe   : > { %5829 = vst [vmem:[%s8725_s16 + $0x10] sm:$0xff] %v5821_v40  ;;  %5888 = vst [vmem:[%s5845_s22] sm:$0xff] (%p6555_p6), %v5887_v17 }
 0x500   : > { %v5806_v22 = vpop.permute.xlu1 %5805  ;;  %v5895_v30 = vld [vmem:[%s8725_s16 + $0x20] sm:$0xff] (%p6555_p6) }
 0x501   : > { %v5824_v5 = vsel %vm4118_vm0, %v5685_v4, %v5806_v22  ;;  %v5893_v1 = vld [vmem:[%s8725_s16 + $0x18] sm:$0xff] (%p6555_p6)  ;;  %5896 = vst [vmem:[%s5845_s22 + $0x40] sm:$0xff] (%p6555_p6), %v5895_v30 }
 0x502   : > { %5832 = vst [vmem:[%s8725_s16 + $0x28] sm:$0xff] %v5824_v5  ;;  %5894 = vst [vmem:[%s5845_s22 + $0x30] sm:$0xff] (%p6555_p6), %v5893_v1 }
 0x505   : > { %v5891_v58 = vld [vmem:[%s8725_s16 + $0x10] sm:$0xff] (%p6555_p6) }
 0x506   : > { %5892 = vst [vmem:[%s5845_s22 + $0x20] sm:$0xff] (%p6555_p6), %v5891_v58 }
 0x509   : > { %v5897_v37 = vld [vmem:[%s8725_s16 + $0x28] sm:$0xff] (%p6555_p6) }
 0x50a   : > { %5898 = vst [vmem:[%s5845_s22 + $0x50] sm:$0xff] (%p6555_p6), %v5897_v37 }
 0x50e   : > { %5841 = sbr.rel (!%p6555_p6) target bundleno = 1309 (0x51d), region = 69 }
 0x511   : > { %v5810_v18 = vpop.permute.xlu1 %5809 }
 0x512   : > { %v5826_v61 = vsel %vm4118_vm0, %v5785_v60, %v5810_v18  ;;  %v5808_v3 = vpop.permute.xlu0 %5807 }
 0x513   : > { %5834 = vst [vmem:[%s8725_s16 + $0x38] sm:$0xff] %v5826_v61  ;;  %v5825_v32 = vsel %vm4118_vm0, %v5735_v9, %v5808_v3 }
 0x514   : > { %5833 = vst [vmem:[%s8725_s16 + $0x30] sm:$0xff] %v5825_v32 }
 0x51a   : > { %v5901_v0 = vld [vmem:[%s8725_s16 + $0x38] sm:$0xff] }
 0x51b   : > { %v5899_v4 = vld [vmem:[%s8725_s16 + $0x30] sm:$0xff]  ;;  %5902 = vst [vmem:[%s5845_s22 + $0x70] sm:$0xff] %v5901_v0 }
 0x51c   : > { %5900 = vst [vmem:[%s5845_s22 + $0x60] sm:$0xff] %v5899_v4 }
 0x51d PF: > { %s11_s12 = sadd.s32 1, %s6491_s12   ;;  %s8975_s6 = smov %s6471_s7 }
 0x51e   : > { %p8_p12 = scmp.ge.s32.totalorder %s11_s12, 6   ;;  %s8976_s7 = smov %s6563_s21 }
 0x51f   : > { %s8977_s8 = smov %s6483_s10  ;;  %s8978_s9 = smov %s6487_s11 }
 0x520   : > { %s8979_s10 = smov %s8982_s13  ;;  %s8980_s11 = smov %s8986_s14 }
 0x521   :  { %10 = sbr.rel (!%p8_p12) target bundleno = 4 (0x4), region = 138 }

</bundles_post_ra>
